<compile_context>
chip_gen: v7x
topology: tpu7x:2x2x1
jax: 0.10.0
libtpu: 0.0.40
codegen_flags: <defaults>
</compile_context>

<pallas_src>
import jax
import jax.numpy as jnp
from jax import lax
from jax.experimental import pallas as pl
from jax.experimental.pallas import tpu as pltpu


def _make_lstm_kernel(use_reg_carry, unroll):
    """Builds the kernel body; `use_reg_carry`/`unroll` are trace-time flags."""

    def kernel(zx_ref,                         # (Tc, Bb, 4H) f32, pipelined over T
               w0h_ref,                        # (H, 4H)  bf16   layer-0 hidden path
               w1i_ref, w1h_ref, b1_ref,       # (H,4H) (H,4H) (1,4H)  layer-1 split
               fc1w_ref, fc1b_ref,             # (H, D1p) (1, D1p)
               fc2w_ref, fc2b_ref,             # (D1p, Cp) (1, Cp)
               mask_ref,                       # (Tp,) SMEM, mask / mask.sum()
               out_ref,                        # (Bb, Cp) f32
               h0_s, c0_s, h1_s, c1_s, acc_s):  # (Bb, H) f32 VMEM scratch
        t_blk = pl.program_id(1)
        n_tblk = pl.num_programs(1)
        Tc, Bb, fourH = zx_ref.shape
        H = fourH // 4

        @pl.when(t_blk == 0)
        def _init():
            h0_s[...] = jnp.zeros_like(h0_s)
            c0_s[...] = jnp.zeros_like(c0_s)
            h1_s[...] = jnp.zeros_like(h1_s)
            c1_s[...] = jnp.zeros_like(c1_s)
            acc_s[...] = jnp.zeros_like(acc_s)

        w_dt = w0h_ref.dtype
        # Hoisted out of the time loop (broadcasts are not CSE'd by JAX).
        b1 = jnp.broadcast_to(b1_ref[...], (Bb, fourH))
        m_base = t_blk * Tc

        def _sig(z):
            # sigmoid(x) = 0.5*tanh(0.5*x) + 0.5 -> single EUP op per vreg.
            return 0.5 * jnp.tanh(0.5 * z) + 0.5

        def gates(z):
            # PyTorch LSTM gate order: i | f | g | o.
            # i and f are a contiguous lane slab -> one activation expression.
            s_if = _sig(z[:, :2 * H])
            g = jnp.tanh(z[:, 2 * H:3 * H])
            o = _sig(z[:, 3 * H:])
            return s_if[:, :H], s_if[:, H:], g, o

        def step(lt, h0, c0, h1, c1, acc):
            # Layer-1 hidden-path matmul first: depends only on the PREVIOUS
            # timestep's h1, so it overlaps layer-0's matmul / EUP work.
            z1h = jnp.dot(h1.astype(w_dt), w1h_ref[...],
                          preferred_element_type=jnp.float32)
            # Layer 0 (input projection streamed in, already includes b0).
            z0 = zx_ref[lt] + jnp.dot(h0.astype(w_dt), w0h_ref[...],
                                      preferred_element_type=jnp.float32)
            i0, f0, g0, o0 = gates(z0)
            c0n = f0 * c0 + i0 * g0
            h0n = o0 * jnp.tanh(c0n)
            # Layer 1: only the input-path matmul sits on the critical chain.
            z1 = z1h + b1 + jnp.dot(h0n.astype(w_dt), w1i_ref[...],
                                    preferred_element_type=jnp.float32)
            i1, f1, g1, o1 = gates(z1)
            c1n = f1 * c1 + i1 * g1
            h1n = o1 * jnp.tanh(c1n)
            # Weighted temporal pooling; mask is pre-normalized by its sum and
            # zero for padded timesteps.
            accn = acc + mask_ref[m_base + lt] * h1n
            return h0n, c0n, h1n, c1n, accn

        if use_reg_carry:
            # Small batch block: carry the state in vregs across the chunk;
            # touch the VMEM scratch only once per chunk (removes per-step
            # store->load serialization on the recurrent critical path).
            init = (h0_s[...], c0_s[...], h1_s[...], c1_s[...], acc_s[...])
            fin = lax.fori_loop(0, Tc, lambda lt, c: step(lt, *c), init,
                                unroll=unroll)
            h0_s[...], c0_s[...], h1_s[...], c1_s[...], acc_s[...] = fin
        else:
            # Large batch block: state does not fit in vregs -> keep in scratch.
            def body(lt, _):
                nxt = step(lt, h0_s[...], c0_s[...], h1_s[...], c1_s[...],
                           acc_s[...])
                h0_s[...], c0_s[...], h1_s[...], c1_s[...], acc_s[...] = nxt
                return 0

            lax.fori_loop(0, Tc, body, 0, unroll=unroll)

        @pl.when(t_blk == n_tblk - 1)
        def _finalize():
            pooled = acc_s[...]                                 # (Bb, H) f32
            # fc1 + ReLU  (dropout = identity in eval mode)
            y = jnp.dot(pooled.astype(fc1w_ref.dtype), fc1w_ref[...],
                        preferred_element_type=jnp.float32) + fc1b_ref[...]
            y = jnp.maximum(y, 0.0)
            # fc2 (lane-padded; real classes live in the first C columns)
            out_ref[...] = (jnp.dot(y.astype(fc2w_ref.dtype), fc2w_ref[...],
                                    preferred_element_type=jnp.float32)
                            + fc2b_ref[...]).astype(out_ref.dtype)

    return kernel


def make_mask(T, weight_threshold, _max_weight):
    # Mirrors the PyTorch forward exactly (note: forward hard-codes 1.05,
    # ignoring the max_weight constructor argument).
    if T > weight_threshold:
        t = jnp.arange(T, dtype=jnp.float32)
        denom = max(T - weight_threshold, 1)
        new_max_weight = 1.05
        mask = jnp.where(
            t < weight_threshold,
            jnp.ones_like(t),
            1.0 + (new_max_weight - 1.0) * ((t - weight_threshold) / denom))
    else:
        mask = jnp.ones((T,), dtype=jnp.float32)
    return mask


def _round_up(v, m):
    return (v + m - 1) // m * m


def lstm_model_forward(x, params, weight_threshold=60, max_weight=1.2,
                       time_chunk=32, compute_dtype=jnp.bfloat16):
    """x: (B, T, F) float32 -> (B, num_classes) float32."""
    B, T, F = x.shape
    H = params["whh0"].shape[1]          # 128 by default (lane-aligned gates)
    C = params["fc2w"].shape[0]
    D1 = params["fc1w"].shape[0]         # 64
    fourH = 4 * H
    wdt = compute_dtype
    # NOTE: the hidden state is cast to `compute_dtype` for the recurrent
    # matmuls (f32 accumulation); pass compute_dtype=jnp.float32 if exact
    # f32-LSTM accuracy over very long sequences is required.

    # ---- batch blocking: >= 2 blocks when B >= 16 (v7x has 2 TCs/chip),
    #      block capped at 128 rows; batch padded to a sublane multiple. ----
    if B < 16:
        Bb = _round_up(max(B, 8), 8)
        Bp = Bb
    else:
        Bb = min(128, _round_up((B + 1) // 2, 8))
        Bp = _round_up(B, Bb)
    nb = Bp // Bb
    use_reg_carry = Bb <= 32             # state fits in vregs -> carry it

    # ---- time chunking: keep the streamed-zx double buffer <= ~8 MiB and
    #      prefer a chunk size that divides T (no wasted padded steps). ----
    Tc = max(1, min(time_chunk, T))
    Tc = min(Tc, max(8, 2048 // Bb))
    if T % Tc != 0:
        for cand in range(Tc, max(Tc // 2, 1) - 1, -1):
            if T % cand == 0:
                Tc = cand
                break
    Tp = _round_up(T, Tc)
    nt = Tp // Tc
    unroll = True if Tc <= 32 else 8     # partial unroll for long chunks

    Cp = _round_up(C, 128)               # lane-dense output stores
    D1p = _round_up(D1, 128)             # lane-dense fc1 intermediate

    # ---- weights: pre-transposed, bf16 for the MXU, f32 biases ----
    w0x = params["wih0"].T.astype(wdt)                           # (F, 4H)
    b0 = (params["bih0"] + params["bhh0"]).reshape(1, -1).astype(jnp.float32)
    w0h = params["whh0"].T.astype(wdt)                           # (H, 4H)
    w1i = params["wih1"].T.astype(wdt)                           # (H, 4H)
    w1h = params["whh1"].T.astype(wdt)                           # (H, 4H)
    b1 = (params["bih1"] + params["bhh1"]).reshape(1, -1).astype(jnp.float32)
    fc1w = jnp.zeros((H, D1p), jnp.float32).at[:, :D1].set(
        params["fc1w"].T).astype(wdt)                            # (H, D1p)
    fc1b = jnp.zeros((1, D1p), jnp.float32).at[:, :D1].set(params["fc1b"])
    fc2w = jnp.zeros((D1p, Cp), jnp.float32).at[:D1, :C].set(
        params["fc2w"].T).astype(wdt)                            # (D1p, Cp)
    fc2b = jnp.zeros((1, Cp), jnp.float32).at[:, :C].set(params["fc2b"])

    # ---- normalized pooling mask (padded timesteps get weight 0) ----
    mask = make_mask(T, weight_threshold, max_weight)
    mask_norm = jnp.zeros((Tp,), jnp.float32).at[:T].set(mask / jnp.sum(mask))

    # ---- layer-0 input projection precomputed in XLA (lane-dense stream) ----
    x_tm = jnp.transpose(x, (1, 0, 2))                           # (T, B, F)
    x_pad = jnp.zeros((Tp, Bp, F), jnp.float32).at[:T, :B, :].set(x_tm)
    zx = (jnp.dot(x_pad.reshape(Tp * Bp, F).astype(wdt), w0x,
                  preferred_element_type=jnp.float32)
          .reshape(Tp, Bp, fourH) + b0)                          # f32

    smem = pl.BlockSpec(memory_space=pltpu.MemorySpace.SMEM)

    grid_spec = pltpu.PrefetchScalarGridSpec(
        num_scalar_prefetch=0,
        grid=(nb, nt),
        in_specs=[
            pl.BlockSpec((Tc, Bb, fourH), lambda b, t: (t, b, 0)),  # zx stream
            pl.BlockSpec((H, fourH), lambda b, t: (0, 0)),          # w0h
            pl.BlockSpec((H, fourH), lambda b, t: (0, 0)),          # w1i
            pl.BlockSpec((H, fourH), lambda b, t: (0, 0)),          # w1h
            pl.BlockSpec((1, fourH), lambda b, t: (0, 0)),          # b1
            pl.BlockSpec((H, D1p), lambda b, t: (0, 0)),            # fc1w
            pl.BlockSpec((1, D1p), lambda b, t: (0, 0)),            # fc1b
            pl.BlockSpec((D1p, Cp), lambda b, t: (0, 0)),           # fc2w
            pl.BlockSpec((1, Cp), lambda b, t: (0, 0)),             # fc2b
            smem,                                                    # mask
        ],
        out_specs=pl.BlockSpec((Bb, Cp), lambda b, t: (b, 0)),
        scratch_shapes=[
            pltpu.VMEM((Bb, H), jnp.float32),        # h0
            pltpu.VMEM((Bb, H), jnp.float32),        # c0
            pltpu.VMEM((Bb, H), jnp.float32),        # h1
            pltpu.VMEM((Bb, H), jnp.float32),        # c1
            pltpu.VMEM((Bb, H), jnp.float32),        # acc (pooled)
        ],
    )

    out = pl.pallas_call(
        _make_lstm_kernel(use_reg_carry, unroll),
        out_shape=jax.ShapeDtypeStruct((Bp, Cp), jnp.float32),
        grid_spec=grid_spec,
        compiler_params=pltpu.CompilerParams(
            dimension_semantics=("parallel", "arbitrary"),
            vmem_limit_bytes=32 * 1024 * 1024),
    )(zx, w0h, w1i, w1h, b1, fc1w, fc1b, fc2w, fc2b, mask_norm)

    return out[:B, :C]


def reference_forward(x, params, weight_threshold=60, max_weight=1.2):
    """Pure-JAX f32 reference matching PyTorch LSTMModel.forward (eval mode)."""
    B, T, F = x.shape
    H = params["whh0"].shape[1]

    def cell(x_t, h, c, wih, whh, bih, bhh):
        z = x_t @ wih.T + h @ whh.T + bih + bhh
        i = jax.nn.sigmoid(z[:, 0 * H:1 * H])
        f = jax.nn.sigmoid(z[:, 1 * H:2 * H])
        g = jnp.tanh(z[:, 2 * H:3 * H])
        o = jax.nn.sigmoid(z[:, 3 * H:4 * H])
        c = f * c + i * g
        h = o * jnp.tanh(c)
        return h, c

    h0 = c0 = h1 = c1 = jnp.zeros((B, H), jnp.float32)
    outs = []
    for t in range(T):
        h0, c0 = cell(x[:, t, :], h0, c0, params["wih0"], params["whh0"],
                      params["bih0"], params["bhh0"])
        h1, c1 = cell(h0, h1, c1, params["wih1"], params["whh1"],
                      params["bih1"], params["bhh1"])
        outs.append(h1)
    out = jnp.stack(outs, axis=1)                      # (B, T, H)

    mask = make_mask(T, weight_threshold, max_weight).reshape(1, T, 1)
    pooled = (out * mask).sum(axis=1) / mask.sum()
    y = jnp.maximum(pooled @ params["fc1w"].T + params["fc1b"], 0.0)
    return y @ params["fc2w"].T + params["fc2b"]


def init_params(key, input_features, hidden_size, num_classes):
    """Deterministic PyTorch-like init: uniform(-1/sqrt(H), 1/sqrt(H))."""
    H, F, C = hidden_size, input_features, num_classes
    k = 1.0 / jnp.sqrt(jnp.float32(H))
    keys = jax.random.split(key, 12)
    u = lambda kk, shape: jax.random.uniform(kk, shape, jnp.float32, -k, k)
    return {
        "wih0": u(keys[0], (4 * H, F)),
        "whh0": u(keys[1], (4 * H, H)),
        "bih0": u(keys[2], (4 * H,)),
        "bhh0": u(keys[3], (4 * H,)),
        "wih1": u(keys[4], (4 * H, H)),
        "whh1": u(keys[5], (4 * H, H)),
        "bih1": u(keys[6], (4 * H,)),
        "bhh1": u(keys[7], (4 * H,)),
        "fc1w": u(keys[8], (64, H)),
        "fc1b": u(keys[9], (64,)),
        "fc2w": u(keys[10], (C, 64)),
        "fc2b": u(keys[11], (C,)),
    }


if __name__ == "__main__":
    B, T, F = 2, 8, 16           # batch, timesteps, sensor features
    H = 128                       # hidden size (module default; lane-aligned gates)
    C = 5                         # num_classes

    key = jax.random.PRNGKey(0)
    kx, kp = jax.random.split(key)
    x = jax.random.normal(kx, (B, T, F), dtype=jnp.float32)
    params = init_params(kp, F, H, C)

    # Small batch -> register-carried state path; time_chunk=4 -> 2 time
    # chunks, exercising the init / accumulate / finalize path.
    out = jax.block_until_ready(lstm_model_forward(x, params, time_chunk=4))
    ref = reference_forward(x, params)
    assert out.shape == (B, C)
    assert jnp.allclose(out, ref, atol=2e-2, rtol=2e-2), (out, ref)

    # Larger batch -> >= 2 batch blocks (v7x dual-TC) and the scratch-carried
    # state path (Bb > 32).
    B2 = 80
    x2 = jax.random.normal(jax.random.PRNGKey(1), (B2, T, F), dtype=jnp.float32)
    out2 = jax.block_until_ready(lstm_model_forward(x2, params, time_chunk=4))
    ref2 = reference_forward(x2, params)
    assert out2.shape == (B2, C)
    assert jnp.allclose(out2, ref2, atol=2e-2, rtol=2e-2), (out2, ref2)

    print("KERNEL_OK")
</pallas_src>

<mosaic_0001>
module attributes {stable_mosaic.version = 11 : i64} {
  func.func @kernel(%arg0: i32, %arg1: i32, %arg2: memref<4x8x512xf32, #tpu.memory_space<vmem>>, %arg3: memref<128x512xbf16, #tpu.memory_space<vmem>>, %arg4: memref<128x512xbf16, #tpu.memory_space<vmem>>, %arg5: memref<128x512xbf16, #tpu.memory_space<vmem>>, %arg6: memref<1x512xf32, #tpu.memory_space<vmem>>, %arg7: memref<128x128xbf16, #tpu.memory_space<vmem>>, %arg8: memref<1x128xf32, #tpu.memory_space<vmem>>, %arg9: memref<128x128xbf16, #tpu.memory_space<vmem>>, %arg10: memref<1x128xf32, #tpu.memory_space<vmem>>, %arg11: memref<8xf32, #tpu.memory_space<smem>>, %arg12: memref<8x128xf32, #tpu.memory_space<vmem>>, %arg13: memref<8x128xf32, #tpu.memory_space<vmem>>, %arg14: memref<8x128xf32, #tpu.memory_space<vmem>>, %arg15: memref<8x128xf32, #tpu.memory_space<vmem>>, %arg16: memref<8x128xf32, #tpu.memory_space<vmem>>, %arg17: memref<8x128xf32, #tpu.memory_space<vmem>>) attributes {dimension_semantics = [#tpu.dimension_semantics<parallel>, #tpu.dimension_semantics<arbitrary>], iteration_bounds = array<i64: 1, 2>, scalar_prefetch = 0 : i64, scratch_operands = 5 : i64, tpu.core_type = #tpu.core_type<tc>, window_params = [{transform_indices = @transform_0, window_bounds = array<i64: 4, 8, 512>}, {pipeline_mode = #tpu.pipeline_mode<synchronous>, transform_indices = @transform_1, window_bounds = array<i64: 128, 512>}, {pipeline_mode = #tpu.pipeline_mode<synchronous>, transform_indices = @transform_2, window_bounds = array<i64: 128, 512>}, {pipeline_mode = #tpu.pipeline_mode<synchronous>, transform_indices = @transform_3, window_bounds = array<i64: 128, 512>}, {pipeline_mode = #tpu.pipeline_mode<synchronous>, transform_indices = @transform_4, window_bounds = array<i64: 1, 512>}, {pipeline_mode = #tpu.pipeline_mode<synchronous>, transform_indices = @transform_5, window_bounds = array<i64: 128, 128>}, {pipeline_mode = #tpu.pipeline_mode<synchronous>, transform_indices = @transform_6, window_bounds = array<i64: 1, 128>}, {pipeline_mode = #tpu.pipeline_mode<synchronous>, transform_indices = @transform_7, window_bounds = array<i64: 128, 128>}, {pipeline_mode = #tpu.pipeline_mode<synchronous>, transform_indices = @transform_8, window_bounds = array<i64: 1, 128>}, {transform_indices = @transform_9, window_bounds = array<i64: 8>}, {transform_indices = @transform_10, window_bounds = array<i64: 8, 128>}]} {
    %c0_i32 = arith.constant 0 : i32
    %0 = arith.cmpi eq, %arg1, %c0_i32 : i32
    %1 = arith.extui %0 : i1 to i32
    %c0_i32_0 = arith.constant 0 : i32
    %2 = arith.cmpi ne, %1, %c0_i32_0 : i32
    scf.if %2 {
      %cst_117 = arith.constant 0.000000e+00 : f32
      %304 = vector.broadcast %cst_117 : f32 to vector<8x128xf32>
      %c0_118 = arith.constant 0 : index
      %c0_119 = arith.constant 0 : index
      %305 = vector.load %arg13[%c0_118, %c0_119] : memref<8x128xf32, #tpu.memory_space<vmem>>, vector<8x128xf32>
      tpu.vector_store %arg13[%c0_118, %c0_119], %304 {strides = array<i32>} : memref<8x128xf32, #tpu.memory_space<vmem>>, vector<8x128xf32>,
      %cst_120 = arith.constant 0.000000e+00 : f32
      %306 = vector.broadcast %cst_120 : f32 to vector<8x128xf32>
      %c0_121 = arith.constant 0 : index
      %c0_122 = arith.constant 0 : index
      %307 = vector.load %arg14[%c0_121, %c0_122] : memref<8x128xf32, #tpu.memory_space<vmem>>, vector<8x128xf32>
      tpu.vector_store %arg14[%c0_121, %c0_122], %306 {strides = array<i32>} : memref<8x128xf32, #tpu.memory_space<vmem>>, vector<8x128xf32>,
      %cst_123 = arith.constant 0.000000e+00 : f32
      %308 = vector.broadcast %cst_123 : f32 to vector<8x128xf32>
      %c0_124 = arith.constant 0 : index
      %c0_125 = arith.constant 0 : index
      %309 = vector.load %arg15[%c0_124, %c0_125] : memref<8x128xf32, #tpu.memory_space<vmem>>, vector<8x128xf32>
      tpu.vector_store %arg15[%c0_124, %c0_125], %308 {strides = array<i32>} : memref<8x128xf32, #tpu.memory_space<vmem>>, vector<8x128xf32>,
      %cst_126 = arith.constant 0.000000e+00 : f32
      %310 = vector.broadcast %cst_126 : f32 to vector<8x128xf32>
      %c0_127 = arith.constant 0 : index
      %c0_128 = arith.constant 0 : index
      %311 = vector.load %arg16[%c0_127, %c0_128] : memref<8x128xf32, #tpu.memory_space<vmem>>, vector<8x128xf32>
      tpu.vector_store %arg16[%c0_127, %c0_128], %310 {strides = array<i32>} : memref<8x128xf32, #tpu.memory_space<vmem>>, vector<8x128xf32>,
      %cst_129 = arith.constant 0.000000e+00 : f32
      %312 = vector.broadcast %cst_129 : f32 to vector<8x128xf32>
      %c0_130 = arith.constant 0 : index
      %c0_131 = arith.constant 0 : index
      %313 = vector.load %arg17[%c0_130, %c0_131] : memref<8x128xf32, #tpu.memory_space<vmem>>, vector<8x128xf32>
      tpu.vector_store %arg17[%c0_130, %c0_131], %312 {strides = array<i32>} : memref<8x128xf32, #tpu.memory_space<vmem>>, vector<8x128xf32>,
    } else {
    }
    %c0 = arith.constant 0 : index
    %c0_1 = arith.constant 0 : index
    %3 = vector.load %arg6[%c0, %c0_1] : memref<1x512xf32, #tpu.memory_space<vmem>>, vector<1x512xf32>
    %4 = vector.shape_cast %3 : vector<1x512xf32> to vector<1x512xf32>
    %5 = vector.broadcast %4 : vector<1x512xf32> to vector<8x512xf32>
    %c4_i32 = arith.constant 4 : i32
    %6 = arith.muli %arg1, %c4_i32 : i32
    %c0_2 = arith.constant 0 : index
    %c0_3 = arith.constant 0 : index
    %7 = vector.load %arg13[%c0_2, %c0_3] : memref<8x128xf32, #tpu.memory_space<vmem>>, vector<8x128xf32>
    %c0_4 = arith.constant 0 : index
    %c0_5 = arith.constant 0 : index
    %8 = vector.load %arg14[%c0_4, %c0_5] : memref<8x128xf32, #tpu.memory_space<vmem>>, vector<8x128xf32>
    %c0_6 = arith.constant 0 : index
    %c0_7 = arith.constant 0 : index
    %9 = vector.load %arg15[%c0_6, %c0_7] : memref<8x128xf32, #tpu.memory_space<vmem>>, vector<8x128xf32>
    %c0_8 = arith.constant 0 : index
    %c0_9 = arith.constant 0 : index
    %10 = vector.load %arg16[%c0_8, %c0_9] : memref<8x128xf32, #tpu.memory_space<vmem>>, vector<8x128xf32>
    %c0_10 = arith.constant 0 : index
    %c0_11 = arith.constant 0 : index
    %11 = vector.load %arg17[%c0_10, %c0_11] : memref<8x128xf32, #tpu.memory_space<vmem>>, vector<8x128xf32>
    %c0_i32_12 = arith.constant 0 : i32
    %12 = arith.truncf %9 : vector<8x128xf32> to vector<8x128xbf16>
    %c0_13 = arith.constant 0 : index
    %c0_14 = arith.constant 0 : index
    %13 = vector.load %arg5[%c0_13, %c0_14] : memref<128x512xbf16, #tpu.memory_space<vmem>>, vector<128x512xbf16>
    %cst = arith.constant dense<0.000000e+00> : vector<8x512xf32>
    %14 = tpu.matmul %12, %13, %cst {dimension_numbers = #tpu.dot_dimension_numbers<[1], [0], [0], [1], [0, 0, 1, 1], [], []>} : vector<8x128xbf16>, vector<128x512xbf16>, vector<8x512xf32> -> vector<8x512xf32>
    %15 = arith.index_cast %c0_i32_12 : i32 to index
    %c0_15 = arith.constant 0 : index
    %c0_16 = arith.constant 0 : index
    %16 = vector.load %arg2[%15, %c0_15, %c0_16] : memref<4x8x512xf32, #tpu.memory_space<vmem>>, vector<1x8x512xf32>
    %17 = vector.shape_cast %16 : vector<1x8x512xf32> to vector<8x512xf32>
    %18 = arith.truncf %7 : vector<8x128xf32> to vector<8x128xbf16>
    %c0_17 = arith.constant 0 : index
    %c0_18 = arith.constant 0 : index
    %19 = vector.load %arg3[%c0_17, %c0_18] : memref<128x512xbf16, #tpu.memory_space<vmem>>, vector<128x512xbf16>
    %cst_19 = arith.constant dense<0.000000e+00> : vector<8x512xf32>
    %20 = tpu.matmul %18, %19, %cst_19 {dimension_numbers = #tpu.dot_dimension_numbers<[1], [0], [0], [1], [0, 0, 1, 1], [], []>} : vector<8x128xbf16>, vector<128x512xbf16>, vector<8x512xf32> -> vector<8x512xf32>
    %21 = arith.addf %17, %20 : vector<8x512xf32>
    %22 = vector.extract_strided_slice %21 {offsets = [0, 0], sizes = [8, 256], strides = [1, 1]} : vector<8x512xf32> to vector<8x256xf32>
    %cst_20 = arith.constant 5.000000e-01 : f32
    %23 = vector.broadcast %cst_20 : f32 to vector<8x256xf32>
    %24 = arith.mulf %23, %22 : vector<8x256xf32>
    %25 = math.tanh %24 : vector<8x256xf32>
    %cst_21 = arith.constant 5.000000e-01 : f32
    %26 = vector.broadcast %cst_21 : f32 to vector<8x256xf32>
    %27 = arith.mulf %26, %25 : vector<8x256xf32>
    %cst_22 = arith.constant 5.000000e-01 : f32
    %28 = vector.broadcast %cst_22 : f32 to vector<8x256xf32>
    %29 = arith.addf %27, %28 : vector<8x256xf32>
    %30 = vector.extract_strided_slice %21 {offsets = [0, 256], sizes = [8, 128], strides = [1, 1]} : vector<8x512xf32> to vector<8x128xf32>
    %31 = math.tanh %30 : vector<8x128xf32>
    %32 = vector.extract_strided_slice %21 {offsets = [0, 384], sizes = [8, 128], strides = [1, 1]} : vector<8x512xf32> to vector<8x128xf32>
    %cst_23 = arith.constant 5.000000e-01 : f32
    %33 = vector.broadcast %cst_23 : f32 to vector<8x128xf32>
    %34 = arith.mulf %33, %32 : vector<8x128xf32>
    %35 = math.tanh %34 : vector<8x128xf32>
    %cst_24 = arith.constant 5.000000e-01 : f32
    %36 = vector.broadcast %cst_24 : f32 to vector<8x128xf32>
    %37 = arith.mulf %36, %35 : vector<8x128xf32>
    %cst_25 = arith.constant 5.000000e-01 : f32
    %38 = vector.broadcast %cst_25 : f32 to vector<8x128xf32>
    %39 = arith.addf %37, %38 : vector<8x128xf32>
    %40 = vector.extract_strided_slice %29 {offsets = [0, 0], sizes = [8, 128], strides = [1, 1]} : vector<8x256xf32> to vector<8x128xf32>
    %41 = vector.extract_strided_slice %29 {offsets = [0, 128], sizes = [8, 128], strides = [1, 1]} : vector<8x256xf32> to vector<8x128xf32>
    %42 = arith.mulf %41, %8 : vector<8x128xf32>
    %43 = arith.mulf %40, %31 : vector<8x128xf32>
    %44 = arith.addf %42, %43 : vector<8x128xf32>
    %45 = math.tanh %44 : vector<8x128xf32>
    %46 = arith.mulf %39, %45 : vector<8x128xf32>
    %47 = arith.addf %14, %5 : vector<8x512xf32>
    %48 = arith.truncf %46 : vector<8x128xf32> to vector<8x128xbf16>
    %c0_26 = arith.constant 0 : index
    %c0_27 = arith.constant 0 : index
    %49 = vector.load %arg4[%c0_26, %c0_27] : memref<128x512xbf16, #tpu.memory_space<vmem>>, vector<128x512xbf16>
    %cst_28 = arith.constant dense<0.000000e+00> : vector<8x512xf32>
    %50 = tpu.matmul %48, %49, %cst_28 {dimension_numbers = #tpu.dot_dimension_numbers<[1], [0], [0], [1], [0, 0, 1, 1], [], []>} : vector<8x128xbf16>, vector<128x512xbf16>, vector<8x512xf32> -> vector<8x512xf32>
    %51 = arith.addf %47, %50 : vector<8x512xf32>
    %52 = vector.extract_strided_slice %51 {offsets = [0, 0], sizes = [8, 256], strides = [1, 1]} : vector<8x512xf32> to vector<8x256xf32>
    %cst_29 = arith.constant 5.000000e-01 : f32
    %53 = vector.broadcast %cst_29 : f32 to vector<8x256xf32>
    %54 = arith.mulf %53, %52 : vector<8x256xf32>
    %55 = math.tanh %54 : vector<8x256xf32>
    %cst_30 = arith.constant 5.000000e-01 : f32
    %56 = vector.broadcast %cst_30 : f32 to vector<8x256xf32>
    %57 = arith.mulf %56, %55 : vector<8x256xf32>
    %cst_31 = arith.constant 5.000000e-01 : f32
    %58 = vector.broadcast %cst_31 : f32 to vector<8x256xf32>
    %59 = arith.addf %57, %58 : vector<8x256xf32>
    %60 = vector.extract_strided_slice %51 {offsets = [0, 256], sizes = [8, 128], strides = [1, 1]} : vector<8x512xf32> to vector<8x128xf32>
    %61 = math.tanh %60 : vector<8x128xf32>
    %62 = vector.extract_strided_slice %51 {offsets = [0, 384], sizes = [8, 128], strides = [1, 1]} : vector<8x512xf32> to vector<8x128xf32>
    %cst_32 = arith.constant 5.000000e-01 : f32
    %63 = vector.broadcast %cst_32 : f32 to vector<8x128xf32>
    %64 = arith.mulf %63, %62 : vector<8x128xf32>
    %65 = math.tanh %64 : vector<8x128xf32>
    %cst_33 = arith.constant 5.000000e-01 : f32
    %66 = vector.broadcast %cst_33 : f32 to vector<8x128xf32>
    %67 = arith.mulf %66, %65 : vector<8x128xf32>
    %cst_34 = arith.constant 5.000000e-01 : f32
    %68 = vector.broadcast %cst_34 : f32 to vector<8x128xf32>
    %69 = arith.addf %67, %68 : vector<8x128xf32>
    %70 = vector.extract_strided_slice %59 {offsets = [0, 0], sizes = [8, 128], strides = [1, 1]} : vector<8x256xf32> to vector<8x128xf32>
    %71 = vector.extract_strided_slice %59 {offsets = [0, 128], sizes = [8, 128], strides = [1, 1]} : vector<8x256xf32> to vector<8x128xf32>
    %72 = arith.mulf %71, %10 : vector<8x128xf32>
    %73 = arith.mulf %70, %61 : vector<8x128xf32>
    %74 = arith.addf %72, %73 : vector<8x128xf32>
    %75 = math.tanh %74 : vector<8x128xf32>
    %76 = arith.mulf %69, %75 : vector<8x128xf32>
    %77 = arith.addi %6, %c0_i32_12 : i32
    %78 = arith.index_cast %77 : i32 to index
    %79 = memref.load %arg11[%78] : memref<8xf32, #tpu.memory_space<smem>>
    %80 = vector.broadcast %79 : f32 to vector<8x128xf32>
    %81 = arith.mulf %80, %76 : vector<8x128xf32>
    %82 = arith.addf %11, %81 : vector<8x128xf32>
    %c1_i32 = arith.constant 1 : i32
    %83 = arith.truncf %76 : vector<8x128xf32> to vector<8x128xbf16>
    %c0_35 = arith.constant 0 : index
    %c0_36 = arith.constant 0 : index
    %84 = vector.load %arg5[%c0_35, %c0_36] : memref<128x512xbf16, #tpu.memory_space<vmem>>, vector<128x512xbf16>
    %cst_37 = arith.constant dense<0.000000e+00> : vector<8x512xf32>
    %85 = tpu.matmul %83, %84, %cst_37 {dimension_numbers = #tpu.dot_dimension_numbers<[1], [0], [0], [1], [0, 0, 1, 1], [], []>} : vector<8x128xbf16>, vector<128x512xbf16>, vector<8x512xf32> -> vector<8x512xf32>
    %86 = arith.index_cast %c1_i32 : i32 to index
    %c0_38 = arith.constant 0 : index
    %c0_39 = arith.constant 0 : index
    %87 = vector.load %arg2[%86, %c0_38, %c0_39] : memref<4x8x512xf32, #tpu.memory_space<vmem>>, vector<1x8x512xf32>
    %88 = vector.shape_cast %87 : vector<1x8x512xf32> to vector<8x512xf32>
    %89 = arith.truncf %46 : vector<8x128xf32> to vector<8x128xbf16>
    %c0_40 = arith.constant 0 : index
    %c0_41 = arith.constant 0 : index
    %90 = vector.load %arg3[%c0_40, %c0_41] : memref<128x512xbf16, #tpu.memory_space<vmem>>, vector<128x512xbf16>
    %cst_42 = arith.constant dense<0.000000e+00> : vector<8x512xf32>
    %91 = tpu.matmul %89, %90, %cst_42 {dimension_numbers = #tpu.dot_dimension_numbers<[1], [0], [0], [1], [0, 0, 1, 1], [], []>} : vector<8x128xbf16>, vector<128x512xbf16>, vector<8x512xf32> -> vector<8x512xf32>
    %92 = arith.addf %88, %91 : vector<8x512xf32>
    %93 = vector.extract_strided_slice %92 {offsets = [0, 0], sizes = [8, 256], strides = [1, 1]} : vector<8x512xf32> to vector<8x256xf32>
    %cst_43 = arith.constant 5.000000e-01 : f32
    %94 = vector.broadcast %cst_43 : f32 to vector<8x256xf32>
    %95 = arith.mulf %94, %93 : vector<8x256xf32>
    %96 = math.tanh %95 : vector<8x256xf32>
    %cst_44 = arith.constant 5.000000e-01 : f32
    %97 = vector.broadcast %cst_44 : f32 to vector<8x256xf32>
    %98 = arith.mulf %97, %96 : vector<8x256xf32>
    %cst_45 = arith.constant 5.000000e-01 : f32
    %99 = vector.broadcast %cst_45 : f32 to vector<8x256xf32>
    %100 = arith.addf %98, %99 : vector<8x256xf32>
    %101 = vector.extract_strided_slice %92 {offsets = [0, 256], sizes = [8, 128], strides = [1, 1]} : vector<8x512xf32> to vector<8x128xf32>
    %102 = math.tanh %101 : vector<8x128xf32>
    %103 = vector.extract_strided_slice %92 {offsets = [0, 384], sizes = [8, 128], strides = [1, 1]} : vector<8x512xf32> to vector<8x128xf32>
    %cst_46 = arith.constant 5.000000e-01 : f32
    %104 = vector.broadcast %cst_46 : f32 to vector<8x128xf32>
    %105 = arith.mulf %104, %103 : vector<8x128xf32>
    %106 = math.tanh %105 : vector<8x128xf32>
    %cst_47 = arith.constant 5.000000e-01 : f32
    %107 = vector.broadcast %cst_47 : f32 to vector<8x128xf32>
    %108 = arith.mulf %107, %106 : vector<8x128xf32>
    %cst_48 = arith.constant 5.000000e-01 : f32
    %109 = vector.broadcast %cst_48 : f32 to vector<8x128xf32>
    %110 = arith.addf %108, %109 : vector<8x128xf32>
    %111 = vector.extract_strided_slice %100 {offsets = [0, 0], sizes = [8, 128], strides = [1, 1]} : vector<8x256xf32> to vector<8x128xf32>
    %112 = vector.extract_strided_slice %100 {offsets = [0, 128], sizes = [8, 128], strides = [1, 1]} : vector<8x256xf32> to vector<8x128xf32>
    %113 = arith.mulf %112, %44 : vector<8x128xf32>
    %114 = arith.mulf %111, %102 : vector<8x128xf32>
    %115 = arith.addf %113, %114 : vector<8x128xf32>
    %116 = math.tanh %115 : vector<8x128xf32>
    %117 = arith.mulf %110, %116 : vector<8x128xf32>
    %118 = arith.addf %85, %5 : vector<8x512xf32>
    %119 = arith.truncf %117 : vector<8x128xf32> to vector<8x128xbf16>
    %c0_49 = arith.constant 0 : index
    %c0_50 = arith.constant 0 : index
    %120 = vector.load %arg4[%c0_49, %c0_50] : memref<128x512xbf16, #tpu.memory_space<vmem>>, vector<128x512xbf16>
    %cst_51 = arith.constant dense<0.000000e+00> : vector<8x512xf32>
    %121 = tpu.matmul %119, %120, %cst_51 {dimension_numbers = #tpu.dot_dimension_numbers<[1], [0], [0], [1], [0, 0, 1, 1], [], []>} : vector<8x128xbf16>, vector<128x512xbf16>, vector<8x512xf32> -> vector<8x512xf32>
    %122 = arith.addf %118, %121 : vector<8x512xf32>
    %123 = vector.extract_strided_slice %122 {offsets = [0, 0], sizes = [8, 256], strides = [1, 1]} : vector<8x512xf32> to vector<8x256xf32>
    %cst_52 = arith.constant 5.000000e-01 : f32
    %124 = vector.broadcast %cst_52 : f32 to vector<8x256xf32>
    %125 = arith.mulf %124, %123 : vector<8x256xf32>
    %126 = math.tanh %125 : vector<8x256xf32>
    %cst_53 = arith.constant 5.000000e-01 : f32
    %127 = vector.broadcast %cst_53 : f32 to vector<8x256xf32>
    %128 = arith.mulf %127, %126 : vector<8x256xf32>
    %cst_54 = arith.constant 5.000000e-01 : f32
    %129 = vector.broadcast %cst_54 : f32 to vector<8x256xf32>
    %130 = arith.addf %128, %129 : vector<8x256xf32>
    %131 = vector.extract_strided_slice %122 {offsets = [0, 256], sizes = [8, 128], strides = [1, 1]} : vector<8x512xf32> to vector<8x128xf32>
    %132 = math.tanh %131 : vector<8x128xf32>
    %133 = vector.extract_strided_slice %122 {offsets = [0, 384], sizes = [8, 128], strides = [1, 1]} : vector<8x512xf32> to vector<8x128xf32>
    %cst_55 = arith.constant 5.000000e-01 : f32
    %134 = vector.broadcast %cst_55 : f32 to vector<8x128xf32>
    %135 = arith.mulf %134, %133 : vector<8x128xf32>
    %136 = math.tanh %135 : vector<8x128xf32>
    %cst_56 = arith.constant 5.000000e-01 : f32
    %137 = vector.broadcast %cst_56 : f32 to vector<8x128xf32>
    %138 = arith.mulf %137, %136 : vector<8x128xf32>
    %cst_57 = arith.constant 5.000000e-01 : f32
    %139 = vector.broadcast %cst_57 : f32 to vector<8x128xf32>
    %140 = arith.addf %138, %139 : vector<8x128xf32>
    %141 = vector.extract_strided_slice %130 {offsets = [0, 0], sizes = [8, 128], strides = [1, 1]} : vector<8x256xf32> to vector<8x128xf32>
    %142 = vector.extract_strided_slice %130 {offsets = [0, 128], sizes = [8, 128], strides = [1, 1]} : vector<8x256xf32> to vector<8x128xf32>
    %143 = arith.mulf %142, %74 : vector<8x128xf32>
    %144 = arith.mulf %141, %132 : vector<8x128xf32>
    %145 = arith.addf %143, %144 : vector<8x128xf32>
    %146 = math.tanh %145 : vector<8x128xf32>
    %147 = arith.mulf %140, %146 : vector<8x128xf32>
    %148 = arith.addi %6, %c1_i32 : i32
    %149 = arith.index_cast %148 : i32 to index
    %150 = memref.load %arg11[%149] : memref<8xf32, #tpu.memory_space<smem>>
    %151 = vector.broadcast %150 : f32 to vector<8x128xf32>
    %152 = arith.mulf %151, %147 : vector<8x128xf32>
    %153 = arith.addf %82, %152 : vector<8x128xf32>
    %c2_i32 = arith.constant 2 : i32
    %154 = arith.truncf %147 : vector<8x128xf32> to vector<8x128xbf16>
    %c0_58 = arith.constant 0 : index
    %c0_59 = arith.constant 0 : index
    %155 = vector.load %arg5[%c0_58, %c0_59] : memref<128x512xbf16, #tpu.memory_space<vmem>>, vector<128x512xbf16>
    %cst_60 = arith.constant dense<0.000000e+00> : vector<8x512xf32>
    %156 = tpu.matmul %154, %155, %cst_60 {dimension_numbers = #tpu.dot_dimension_numbers<[1], [0], [0], [1], [0, 0, 1, 1], [], []>} : vector<8x128xbf16>, vector<128x512xbf16>, vector<8x512xf32> -> vector<8x512xf32>
    %157 = arith.index_cast %c2_i32 : i32 to index
    %c0_61 = arith.constant 0 : index
    %c0_62 = arith.constant 0 : index
    %158 = vector.load %arg2[%157, %c0_61, %c0_62] : memref<4x8x512xf32, #tpu.memory_space<vmem>>, vector<1x8x512xf32>
    %159 = vector.shape_cast %158 : vector<1x8x512xf32> to vector<8x512xf32>
    %160 = arith.truncf %117 : vector<8x128xf32> to vector<8x128xbf16>
    %c0_63 = arith.constant 0 : index
    %c0_64 = arith.constant 0 : index
    %161 = vector.load %arg3[%c0_63, %c0_64] : memref<128x512xbf16, #tpu.memory_space<vmem>>, vector<128x512xbf16>
    %cst_65 = arith.constant dense<0.000000e+00> : vector<8x512xf32>
    %162 = tpu.matmul %160, %161, %cst_65 {dimension_numbers = #tpu.dot_dimension_numbers<[1], [0], [0], [1], [0, 0, 1, 1], [], []>} : vector<8x128xbf16>, vector<128x512xbf16>, vector<8x512xf32> -> vector<8x512xf32>
    %163 = arith.addf %159, %162 : vector<8x512xf32>
    %164 = vector.extract_strided_slice %163 {offsets = [0, 0], sizes = [8, 256], strides = [1, 1]} : vector<8x512xf32> to vector<8x256xf32>
    %cst_66 = arith.constant 5.000000e-01 : f32
    %165 = vector.broadcast %cst_66 : f32 to vector<8x256xf32>
    %166 = arith.mulf %165, %164 : vector<8x256xf32>
    %167 = math.tanh %166 : vector<8x256xf32>
    %cst_67 = arith.constant 5.000000e-01 : f32
    %168 = vector.broadcast %cst_67 : f32 to vector<8x256xf32>
    %169 = arith.mulf %168, %167 : vector<8x256xf32>
    %cst_68 = arith.constant 5.000000e-01 : f32
    %170 = vector.broadcast %cst_68 : f32 to vector<8x256xf32>
    %171 = arith.addf %169, %170 : vector<8x256xf32>
    %172 = vector.extract_strided_slice %163 {offsets = [0, 256], sizes = [8, 128], strides = [1, 1]} : vector<8x512xf32> to vector<8x128xf32>
    %173 = math.tanh %172 : vector<8x128xf32>
    %174 = vector.extract_strided_slice %163 {offsets = [0, 384], sizes = [8, 128], strides = [1, 1]} : vector<8x512xf32> to vector<8x128xf32>
    %cst_69 = arith.constant 5.000000e-01 : f32
    %175 = vector.broadcast %cst_69 : f32 to vector<8x128xf32>
    %176 = arith.mulf %175, %174 : vector<8x128xf32>
    %177 = math.tanh %176 : vector<8x128xf32>
    %cst_70 = arith.constant 5.000000e-01 : f32
    %178 = vector.broadcast %cst_70 : f32 to vector<8x128xf32>
    %179 = arith.mulf %178, %177 : vector<8x128xf32>
    %cst_71 = arith.constant 5.000000e-01 : f32
    %180 = vector.broadcast %cst_71 : f32 to vector<8x128xf32>
    %181 = arith.addf %179, %180 : vector<8x128xf32>
    %182 = vector.extract_strided_slice %171 {offsets = [0, 0], sizes = [8, 128], strides = [1, 1]} : vector<8x256xf32> to vector<8x128xf32>
    %183 = vector.extract_strided_slice %171 {offsets = [0, 128], sizes = [8, 128], strides = [1, 1]} : vector<8x256xf32> to vector<8x128xf32>
    %184 = arith.mulf %183, %115 : vector<8x128xf32>
    %185 = arith.mulf %182, %173 : vector<8x128xf32>
    %186 = arith.addf %184, %185 : vector<8x128xf32>
    %187 = math.tanh %186 : vector<8x128xf32>
    %188 = arith.mulf %181, %187 : vector<8x128xf32>
    %189 = arith.addf %156, %5 : vector<8x512xf32>
    %190 = arith.truncf %188 : vector<8x128xf32> to vector<8x128xbf16>
    %c0_72 = arith.constant 0 : index
    %c0_73 = arith.constant 0 : index
    %191 = vector.load %arg4[%c0_72, %c0_73] : memref<128x512xbf16, #tpu.memory_space<vmem>>, vector<128x512xbf16>
    %cst_74 = arith.constant dense<0.000000e+00> : vector<8x512xf32>
    %192 = tpu.matmul %190, %191, %cst_74 {dimension_numbers = #tpu.dot_dimension_numbers<[1], [0], [0], [1], [0, 0, 1, 1], [], []>} : vector<8x128xbf16>, vector<128x512xbf16>, vector<8x512xf32> -> vector<8x512xf32>
    %193 = arith.addf %189, %192 : vector<8x512xf32>
    %194 = vector.extract_strided_slice %193 {offsets = [0, 0], sizes = [8, 256], strides = [1, 1]} : vector<8x512xf32> to vector<8x256xf32>
    %cst_75 = arith.constant 5.000000e-01 : f32
    %195 = vector.broadcast %cst_75 : f32 to vector<8x256xf32>
    %196 = arith.mulf %195, %194 : vector<8x256xf32>
    %197 = math.tanh %196 : vector<8x256xf32>
    %cst_76 = arith.constant 5.000000e-01 : f32
    %198 = vector.broadcast %cst_76 : f32 to vector<8x256xf32>
    %199 = arith.mulf %198, %197 : vector<8x256xf32>
    %cst_77 = arith.constant 5.000000e-01 : f32
    %200 = vector.broadcast %cst_77 : f32 to vector<8x256xf32>
    %201 = arith.addf %199, %200 : vector<8x256xf32>
    %202 = vector.extract_strided_slice %193 {offsets = [0, 256], sizes = [8, 128], strides = [1, 1]} : vector<8x512xf32> to vector<8x128xf32>
    %203 = math.tanh %202 : vector<8x128xf32>
    %204 = vector.extract_strided_slice %193 {offsets = [0, 384], sizes = [8, 128], strides = [1, 1]} : vector<8x512xf32> to vector<8x128xf32>
    %cst_78 = arith.constant 5.000000e-01 : f32
    %205 = vector.broadcast %cst_78 : f32 to vector<8x128xf32>
    %206 = arith.mulf %205, %204 : vector<8x128xf32>
    %207 = math.tanh %206 : vector<8x128xf32>
    %cst_79 = arith.constant 5.000000e-01 : f32
    %208 = vector.broadcast %cst_79 : f32 to vector<8x128xf32>
    %209 = arith.mulf %208, %207 : vector<8x128xf32>
    %cst_80 = arith.constant 5.000000e-01 : f32
    %210 = vector.broadcast %cst_80 : f32 to vector<8x128xf32>
    %211 = arith.addf %209, %210 : vector<8x128xf32>
    %212 = vector.extract_strided_slice %201 {offsets = [0, 0], sizes = [8, 128], strides = [1, 1]} : vector<8x256xf32> to vector<8x128xf32>
    %213 = vector.extract_strided_slice %201 {offsets = [0, 128], sizes = [8, 128], strides = [1, 1]} : vector<8x256xf32> to vector<8x128xf32>
    %214 = arith.mulf %213, %145 : vector<8x128xf32>
    %215 = arith.mulf %212, %203 : vector<8x128xf32>
    %216 = arith.addf %214, %215 : vector<8x128xf32>
    %217 = math.tanh %216 : vector<8x128xf32>
    %218 = arith.mulf %211, %217 : vector<8x128xf32>
    %219 = arith.addi %6, %c2_i32 : i32
    %220 = arith.index_cast %219 : i32 to index
    %221 = memref.load %arg11[%220] : memref<8xf32, #tpu.memory_space<smem>>
    %222 = vector.broadcast %221 : f32 to vector<8x128xf32>
    %223 = arith.mulf %222, %218 : vector<8x128xf32>
    %224 = arith.addf %153, %223 : vector<8x128xf32>
    %c3_i32 = arith.constant 3 : i32
    %225 = arith.truncf %218 : vector<8x128xf32> to vector<8x128xbf16>
    %c0_81 = arith.constant 0 : index
    %c0_82 = arith.constant 0 : index
    %226 = vector.load %arg5[%c0_81, %c0_82] : memref<128x512xbf16, #tpu.memory_space<vmem>>, vector<128x512xbf16>
    %cst_83 = arith.constant dense<0.000000e+00> : vector<8x512xf32>
    %227 = tpu.matmul %225, %226, %cst_83 {dimension_numbers = #tpu.dot_dimension_numbers<[1], [0], [0], [1], [0, 0, 1, 1], [], []>} : vector<8x128xbf16>, vector<128x512xbf16>, vector<8x512xf32> -> vector<8x512xf32>
    %228 = arith.index_cast %c3_i32 : i32 to index
    %c0_84 = arith.constant 0 : index
    %c0_85 = arith.constant 0 : index
    %229 = vector.load %arg2[%228, %c0_84, %c0_85] : memref<4x8x512xf32, #tpu.memory_space<vmem>>, vector<1x8x512xf32>
    %230 = vector.shape_cast %229 : vector<1x8x512xf32> to vector<8x512xf32>
    %231 = arith.truncf %188 : vector<8x128xf32> to vector<8x128xbf16>
    %c0_86 = arith.constant 0 : index
    %c0_87 = arith.constant 0 : index
    %232 = vector.load %arg3[%c0_86, %c0_87] : memref<128x512xbf16, #tpu.memory_space<vmem>>, vector<128x512xbf16>
    %cst_88 = arith.constant dense<0.000000e+00> : vector<8x512xf32>
    %233 = tpu.matmul %231, %232, %cst_88 {dimension_numbers = #tpu.dot_dimension_numbers<[1], [0], [0], [1], [0, 0, 1, 1], [], []>} : vector<8x128xbf16>, vector<128x512xbf16>, vector<8x512xf32> -> vector<8x512xf32>
    %234 = arith.addf %230, %233 : vector<8x512xf32>
    %235 = vector.extract_strided_slice %234 {offsets = [0, 0], sizes = [8, 256], strides = [1, 1]} : vector<8x512xf32> to vector<8x256xf32>
    %cst_89 = arith.constant 5.000000e-01 : f32
    %236 = vector.broadcast %cst_89 : f32 to vector<8x256xf32>
    %237 = arith.mulf %236, %235 : vector<8x256xf32>
    %238 = math.tanh %237 : vector<8x256xf32>
    %cst_90 = arith.constant 5.000000e-01 : f32
    %239 = vector.broadcast %cst_90 : f32 to vector<8x256xf32>
    %240 = arith.mulf %239, %238 : vector<8x256xf32>
    %cst_91 = arith.constant 5.000000e-01 : f32
    %241 = vector.broadcast %cst_91 : f32 to vector<8x256xf32>
    %242 = arith.addf %240, %241 : vector<8x256xf32>
    %243 = vector.extract_strided_slice %234 {offsets = [0, 256], sizes = [8, 128], strides = [1, 1]} : vector<8x512xf32> to vector<8x128xf32>
    %244 = math.tanh %243 : vector<8x128xf32>
    %245 = vector.extract_strided_slice %234 {offsets = [0, 384], sizes = [8, 128], strides = [1, 1]} : vector<8x512xf32> to vector<8x128xf32>
    %cst_92 = arith.constant 5.000000e-01 : f32
    %246 = vector.broadcast %cst_92 : f32 to vector<8x128xf32>
    %247 = arith.mulf %246, %245 : vector<8x128xf32>
    %248 = math.tanh %247 : vector<8x128xf32>
    %cst_93 = arith.constant 5.000000e-01 : f32
    %249 = vector.broadcast %cst_93 : f32 to vector<8x128xf32>
    %250 = arith.mulf %249, %248 : vector<8x128xf32>
    %cst_94 = arith.constant 5.000000e-01 : f32
    %251 = vector.broadcast %cst_94 : f32 to vector<8x128xf32>
    %252 = arith.addf %250, %251 : vector<8x128xf32>
    %253 = vector.extract_strided_slice %242 {offsets = [0, 0], sizes = [8, 128], strides = [1, 1]} : vector<8x256xf32> to vector<8x128xf32>
    %254 = vector.extract_strided_slice %242 {offsets = [0, 128], sizes = [8, 128], strides = [1, 1]} : vector<8x256xf32> to vector<8x128xf32>
    %255 = arith.mulf %254, %186 : vector<8x128xf32>
    %256 = arith.mulf %253, %244 : vector<8x128xf32>
    %257 = arith.addf %255, %256 : vector<8x128xf32>
    %258 = math.tanh %257 : vector<8x128xf32>
    %259 = arith.mulf %252, %258 : vector<8x128xf32>
    %260 = arith.addf %227, %5 : vector<8x512xf32>
    %261 = arith.truncf %259 : vector<8x128xf32> to vector<8x128xbf16>
    %c0_95 = arith.constant 0 : index
    %c0_96 = arith.constant 0 : index
    %262 = vector.load %arg4[%c0_95, %c0_96] : memref<128x512xbf16, #tpu.memory_space<vmem>>, vector<128x512xbf16>
    %cst_97 = arith.constant dense<0.000000e+00> : vector<8x512xf32>
    %263 = tpu.matmul %261, %262, %cst_97 {dimension_numbers = #tpu.dot_dimension_numbers<[1], [0], [0], [1], [0, 0, 1, 1], [], []>} : vector<8x128xbf16>, vector<128x512xbf16>, vector<8x512xf32> -> vector<8x512xf32>
    %264 = arith.addf %260, %263 : vector<8x512xf32>
    %265 = vector.extract_strided_slice %264 {offsets = [0, 0], sizes = [8, 256], strides = [1, 1]} : vector<8x512xf32> to vector<8x256xf32>
    %cst_98 = arith.constant 5.000000e-01 : f32
    %266 = vector.broadcast %cst_98 : f32 to vector<8x256xf32>
    %267 = arith.mulf %266, %265 : vector<8x256xf32>
    %268 = math.tanh %267 : vector<8x256xf32>
    %cst_99 = arith.constant 5.000000e-01 : f32
    %269 = vector.broadcast %cst_99 : f32 to vector<8x256xf32>
    %270 = arith.mulf %269, %268 : vector<8x256xf32>
    %cst_100 = arith.constant 5.000000e-01 : f32
    %271 = vector.broadcast %cst_100 : f32 to vector<8x256xf32>
    %272 = arith.addf %270, %271 : vector<8x256xf32>
    %273 = vector.extract_strided_slice %264 {offsets = [0, 256], sizes = [8, 128], strides = [1, 1]} : vector<8x512xf32> to vector<8x128xf32>
    %274 = math.tanh %273 : vector<8x128xf32>
    %275 = vector.extract_strided_slice %264 {offsets = [0, 384], sizes = [8, 128], strides = [1, 1]} : vector<8x512xf32> to vector<8x128xf32>
    %cst_101 = arith.constant 5.000000e-01 : f32
    %276 = vector.broadcast %cst_101 : f32 to vector<8x128xf32>
    %277 = arith.mulf %276, %275 : vector<8x128xf32>
    %278 = math.tanh %277 : vector<8x128xf32>
    %cst_102 = arith.constant 5.000000e-01 : f32
    %279 = vector.broadcast %cst_102 : f32 to vector<8x128xf32>
    %280 = arith.mulf %279, %278 : vector<8x128xf32>
    %cst_103 = arith.constant 5.000000e-01 : f32
    %281 = vector.broadcast %cst_103 : f32 to vector<8x128xf32>
    %282 = arith.addf %280, %281 : vector<8x128xf32>
    %283 = vector.extract_strided_slice %272 {offsets = [0, 0], sizes = [8, 128], strides = [1, 1]} : vector<8x256xf32> to vector<8x128xf32>
    %284 = vector.extract_strided_slice %272 {offsets = [0, 128], sizes = [8, 128], strides = [1, 1]} : vector<8x256xf32> to vector<8x128xf32>
    %285 = arith.mulf %284, %216 : vector<8x128xf32>
    %286 = arith.mulf %283, %274 : vector<8x128xf32>
    %287 = arith.addf %285, %286 : vector<8x128xf32>
    %288 = math.tanh %287 : vector<8x128xf32>
    %289 = arith.mulf %282, %288 : vector<8x128xf32>
    %290 = arith.addi %6, %c3_i32 : i32
    %291 = arith.index_cast %290 : i32 to index
    %292 = memref.load %arg11[%291] : memref<8xf32, #tpu.memory_space<smem>>
    %293 = vector.broadcast %292 : f32 to vector<8x128xf32>
    %294 = arith.mulf %293, %289 : vector<8x128xf32>
    %295 = arith.addf %224, %294 : vector<8x128xf32>
    %c4_i32_104 = arith.constant 4 : i32
    %c0_105 = arith.constant 0 : index
    %c0_106 = arith.constant 0 : index
    %296 = vector.load %arg13[%c0_105, %c0_106] : memref<8x128xf32, #tpu.memory_space<vmem>>, vector<8x128xf32>
    tpu.vector_store %arg13[%c0_105, %c0_106], %259 {strides = array<i32>} : memref<8x128xf32, #tpu.memory_space<vmem>>, vector<8x128xf32>,
    %c0_107 = arith.constant 0 : index
    %c0_108 = arith.constant 0 : index
    %297 = vector.load %arg14[%c0_107, %c0_108] : memref<8x128xf32, #tpu.memory_space<vmem>>, vector<8x128xf32>
    tpu.vector_store %arg14[%c0_107, %c0_108], %257 {strides = array<i32>} : memref<8x128xf32, #tpu.memory_space<vmem>>, vector<8x128xf32>,
    %c0_109 = arith.constant 0 : index
    %c0_110 = arith.constant 0 : index
    %298 = vector.load %arg15[%c0_109, %c0_110] : memref<8x128xf32, #tpu.memory_space<vmem>>, vector<8x128xf32>
    tpu.vector_store %arg15[%c0_109, %c0_110], %289 {strides = array<i32>} : memref<8x128xf32, #tpu.memory_space<vmem>>, vector<8x128xf32>,
    %c0_111 = arith.constant 0 : index
    %c0_112 = arith.constant 0 : index
    %299 = vector.load %arg16[%c0_111, %c0_112] : memref<8x128xf32, #tpu.memory_space<vmem>>, vector<8x128xf32>
    tpu.vector_store %arg16[%c0_111, %c0_112], %287 {strides = array<i32>} : memref<8x128xf32, #tpu.memory_space<vmem>>, vector<8x128xf32>,
    %c0_113 = arith.constant 0 : index
    %c0_114 = arith.constant 0 : index
    %300 = vector.load %arg17[%c0_113, %c0_114] : memref<8x128xf32, #tpu.memory_space<vmem>>, vector<8x128xf32>
    tpu.vector_store %arg17[%c0_113, %c0_114], %295 {strides = array<i32>} : memref<8x128xf32, #tpu.memory_space<vmem>>, vector<8x128xf32>,
    %c1_i32_115 = arith.constant 1 : i32
    %301 = arith.cmpi eq, %arg1, %c1_i32_115 : i32
    %302 = arith.extui %301 : i1 to i32
    %c0_i32_116 = arith.constant 0 : i32
    %303 = arith.cmpi ne, %302, %c0_i32_116 : i32
    scf.if %303 {
      %c0_117 = arith.constant 0 : index
      %c0_118 = arith.constant 0 : index
      %304 = vector.load %arg17[%c0_117, %c0_118] : memref<8x128xf32, #tpu.memory_space<vmem>>, vector<8x128xf32>
      %305 = arith.truncf %304 : vector<8x128xf32> to vector<8x128xbf16>
      %c0_119 = arith.constant 0 : index
      %c0_120 = arith.constant 0 : index
      %306 = vector.load %arg7[%c0_119, %c0_120] : memref<128x128xbf16, #tpu.memory_space<vmem>>, vector<128x128xbf16>
      %cst_121 = arith.constant dense<0.000000e+00> : vector<8x128xf32>
      %307 = tpu.matmul %305, %306, %cst_121 {dimension_numbers = #tpu.dot_dimension_numbers<[1], [0], [0], [1], [0, 0, 1, 1], [], []>} : vector<8x128xbf16>, vector<128x128xbf16>, vector<8x128xf32> -> vector<8x128xf32>
      %c0_122 = arith.constant 0 : index
      %c0_123 = arith.constant 0 : index
      %308 = vector.load %arg8[%c0_122, %c0_123] : memref<1x128xf32, #tpu.memory_space<vmem>>, vector<1x128xf32>
      %309 = vector.broadcast %308 : vector<1x128xf32> to vector<8x128xf32>
      %310 = arith.addf %307, %309 : vector<8x128xf32>
      %cst_124 = arith.constant 0.000000e+00 : f32
      %311 = vector.broadcast %cst_124 : f32 to vector<8x128xf32>
      %312 = arith.maximumf %310, %311 : vector<8x128xf32>
      %313 = arith.truncf %312 : vector<8x128xf32> to vector<8x128xbf16>
      %c0_125 = arith.constant 0 : index
      %c0_126 = arith.constant 0 : index
      %314 = vector.load %arg9[%c0_125, %c0_126] : memref<128x128xbf16, #tpu.memory_space<vmem>>, vector<128x128xbf16>
      %cst_127 = arith.constant dense<0.000000e+00> : vector<8x128xf32>
      %315 = tpu.matmul %313, %314, %cst_127 {dimension_numbers = #tpu.dot_dimension_numbers<[1], [0], [0], [1], [0, 0, 1, 1], [], []>} : vector<8x128xbf16>, vector<128x128xbf16>, vector<8x128xf32> -> vector<8x128xf32>
      %c0_128 = arith.constant 0 : index
      %c0_129 = arith.constant 0 : index
      %316 = vector.load %arg10[%c0_128, %c0_129] : memref<1x128xf32, #tpu.memory_space<vmem>>, vector<1x128xf32>
      %317 = vector.broadcast %316 : vector<1x128xf32> to vector<8x128xf32>
      %318 = arith.addf %315, %317 : vector<8x128xf32>
      %c0_130 = arith.constant 0 : index
      %c0_131 = arith.constant 0 : index
      %319 = vector.load %arg12[%c0_130, %c0_131] : memref<8x128xf32, #tpu.memory_space<vmem>>, vector<8x128xf32>
      tpu.vector_store %arg12[%c0_130, %c0_131], %318 {strides = array<i32>} : memref<8x128xf32, #tpu.memory_space<vmem>>, vector<8x128xf32>,
    } else {
    }
    return
  }
  func.func @transform_0(%arg0: i32, %arg1: i32) -> (i32, i32, i32) {
    %c0_i32 = arith.constant 0 : i32
    %c0_i32_0 = arith.constant 0 : i32
    return %arg1, %arg0, %c0_i32 : i32, i32, i32
  }
  func.func @transform_1(%arg0: i32, %arg1: i32) -> (i32, i32) {
    %c0_i32 = arith.constant 0 : i32
    %c0_i32_0 = arith.constant 0 : i32
    %c0_i32_1 = arith.constant 0 : i32
    return %c0_i32, %c0_i32_0 : i32, i32
  }
  func.func @transform_2(%arg0: i32, %arg1: i32) -> (i32, i32) {
    %c0_i32 = arith.constant 0 : i32
    %c0_i32_0 = arith.constant 0 : i32
    %c0_i32_1 = arith.constant 0 : i32
    return %c0_i32, %c0_i32_0 : i32, i32
  }
  func.func @transform_3(%arg0: i32, %arg1: i32) -> (i32, i32) {
    %c0_i32 = arith.constant 0 : i32
    %c0_i32_0 = arith.constant 0 : i32
    %c0_i32_1 = arith.constant 0 : i32
    return %c0_i32, %c0_i32_0 : i32, i32
  }
  func.func @transform_4(%arg0: i32, %arg1: i32) -> (i32, i32) {
    %c0_i32 = arith.constant 0 : i32
    %c0_i32_0 = arith.constant 0 : i32
    %c0_i32_1 = arith.constant 0 : i32
    return %c0_i32, %c0_i32_0 : i32, i32
  }
  func.func @transform_5(%arg0: i32, %arg1: i32) -> (i32, i32) {
    %c0_i32 = arith.constant 0 : i32
    %c0_i32_0 = arith.constant 0 : i32
    %c0_i32_1 = arith.constant 0 : i32
    return %c0_i32, %c0_i32_0 : i32, i32
  }
  func.func @transform_6(%arg0: i32, %arg1: i32) -> (i32, i32) {
    %c0_i32 = arith.constant 0 : i32
    %c0_i32_0 = arith.constant 0 : i32
    %c0_i32_1 = arith.constant 0 : i32
    return %c0_i32, %c0_i32_0 : i32, i32
  }
  func.func @transform_7(%arg0: i32, %arg1: i32) -> (i32, i32) {
    %c0_i32 = arith.constant 0 : i32
    %c0_i32_0 = arith.constant 0 : i32
    %c0_i32_1 = arith.constant 0 : i32
    return %c0_i32, %c0_i32_0 : i32, i32
  }
  func.func @transform_8(%arg0: i32, %arg1: i32) -> (i32, i32) {
    %c0_i32 = arith.constant 0 : i32
    %c0_i32_0 = arith.constant 0 : i32
    %c0_i32_1 = arith.constant 0 : i32
    return %c0_i32, %c0_i32_0 : i32, i32
  }
  func.func @transform_9(%arg0: i32, %arg1: i32) -> i32 {
    %c0_i32 = arith.constant 0 : i32
    %c0_i32_0 = arith.constant 0 : i32
    return %c0_i32 : i32
  }
  func.func @transform_10(%arg0: i32, %arg1: i32) -> (i32, i32) {
    %c0_i32 = arith.constant 0 : i32
    %c0_i32_0 = arith.constant 0 : i32
    return %arg0, %c0_i32 : i32, i32
  }
}

</mosaic_0001>

<bundles_post_ra>
// kernel: tpu_custom_call.1
= control target key start
LH: loop header
LB: loop body
LE: loop exit
PB: predicated region body
PF: predicated region fallthrough
CT: control target
= control target key end

     0   :  { %s4721_s0 = inlined_call_operand.hbm [shape: f32[8,8,512], index: 0, kind: input, shape index: {}]   ;;  %s4722_s1 = inlined_call_operand.hbm [shape: bf16[128,512], index: 1, kind: input, shape index: {}]   ;;  %s4723_s2 = inlined_call_operand.hbm [shape: bf16[128,512], index: 2, kind: input, shape index: {}]   ;;  %s4724_s3 = inlined_call_operand.hbm [shape: bf16[128,512], index: 3, kind: input, shape index: {}]   ;;  %s4725_s4 = inlined_call_operand.vmem [shape: f32[1,512], index: 4, kind: input, shape index: {}]   ;;  %s4726_s5 = inlined_call_operand.hbm [shape: bf16[128,128], index: 5, kind: input, shape index: {}]   ;;  %s4727_s6 = inlined_call_operand.vmem [shape: f32[1,128], index: 6, kind: input, shape index: {}]   ;;  %s4728_s7 = inlined_call_operand.hbm [shape: bf16[128,128], index: 7, kind: input, shape index: {}]   ;;  %s4729_s8 = inlined_call_operand.vmem [shape: f32[1,128], index: 8, kind: input, shape index: {}]   ;;  %s4730_s9 = inlined_call_operand.vmem [shape: f32[8], index: 9, kind: input, shape index: {}]   ;;  %s4731_s10 = inlined_call_operand.hbm [shape: f32[8,128], index: 10, kind: output, shape index: {}]  }
   0x1   :  { %4862 = sst [smem:[#allocation79_spill]] %s4722_s1 }
   0x2   :  { %4863 = sst [smem:[#allocation80_spill]] %s4725_s4 }
   0x3   :  { %4864 = sst [smem:[#allocation81_spill]] %s4727_s6 }
   0x4   :  { %4865 = sst [smem:[#allocation82_spill]] %s4729_s8 }
   0x5   :  { %4866 = sst [smem:[#allocation83_spill]] %s4731_s10 }
   0x6   :  { %15 = vsyncpa [#allocation8], 0 }
   0x7   :  { %17 = vsyncpa [#allocation8 + $0x1], 0 }
   0x8   :  { %18 = vsyncpa [#allocation12], 0 }
   0x9   :  { %19 = vsyncpa [#allocation15], 0 }
   0xa   :  { %20 = vsyncpa [#allocation18], 0 }
   0xb   :  { %21 = vsyncpa [#allocation10], 0 }
   0xc   :  { %22 = vsyncpa [#allocation9], 0  ;;  %s3753_s13 = smov 0   ;;  %s3755_s14 = smov 0  }
   0xd   :  { %s3757_s15 = smov 0   ;;  %s3759_s16 = smov 0  }
   0xe   :  { %s3761_s17 = smov 0   ;;  %s3763_s18 = smov 0  }
   0xf LB: > { %s4732_s19 = sadd.s32 4294967295, %s3678_s18   ;;  %p2667_p0 = scmp.ge.s32.totalorder %s3678_s18, 1  ;;  %s3678_s18 = sphi %s3763_s18, %s28_s18   ;;  %s3674_s17 = sphi %s3761_s17, %s5049_s17   ;;  %s3670_s16 = sphi %s3759_s16, %s5048_s16   ;;  %s3666_s15 = sphi %s3757_s15, %s5047_s15   ;;  %s3662_s14 = sphi %s3755_s14, %s5046_s14   ;;  %s3658_s13 = sphi %s3753_s13, %s5045_s13  }
  0x10   : > { %p3787_p1 = scmp.eq.s32.totalorder %s4732_s19, 0  ;;  %p288_p2 = scmp.lt.s32.totalorder %s3678_s18, 3 }
  0x11   : > { %s3680_s22 = smov [#allocation11]   ;;  %s3681_s25 = smov [#allocation14]  }
  0x12   : > { %s4867_s20 = scalar_select %p3787_p1, 1, 0 }
  0x13   : > { %p3792_p3 = pnand %p2667_p0, %p288_p2  ;;  %s300_s23 = sshll.u32 %s3680_s22, 4  ;;  %s3796_s23 = int_to_ptr.vmem [resolvable:$true] %s300_s23 }
  0x14   : > { %s326_s26 = sshll.u32 %s3681_s25, 4  ;;  %s3682_s27 = smov [#allocation13]   ;;  %s3806_s26 = int_to_ptr.vmem [resolvable:$true] %s326_s26 }
  0x15   : > { %s4868_s21 = scalar_select %p3792_p3, 1, 0 }
  0x16   : > { %p2958_p4 = pneg %p3792_p3  ;;  %s3808_s28 = sshll.u32 %s3682_s27, 4  ;;  %s314_s28 = int_to_ptr.vmem [resolvable:$true] %s3808_s28 }
  0x17   : > { %s4870_s1 = sld [smem:[#allocation79_spill]] }
  0x18   : > { %p3802_p5 = pnand %p2958_p4, %p3787_p1 }
  0x1a   : > { %p3818_p7 = pneg %p3802_p5 }
  0x1d   : > { %s3397_s11 = scalar_lea.hbm %s4870_s1, 4096 }
  0x1e   : > { %p3398_p6 = scmp.ne.s32.totalorder %s4870_s1, %s3397_s11  ;;  %p3404_p10 = scmp.lt.u32.totalorder %s3397_s11, %s4870_s1 }
  0x20   : > { %p3400_p8 = pnand %p3818_p7, %p3398_p6 }
  0x22   : > { %p3401_p9 = pneg %p3400_p8 }
  0x24   : > { %p3406_p11 = pnand %p3404_p10, %p3401_p9 }
  0x26   : > { %3409 = shalt.err (!%p3406_p11)
}
  0x27   : > { %s3410_s29 = scalar_lea.vmem %s3796_s23, 4096  ;;  %p3418_p2 = scmp.lt.s32.totalorder %s3796_s23, %s3796_s23 }
  0x28   : > { %p3411_p12 = scmp.ne.s32.totalorder %s3796_s23, %s3410_s29  ;;  %p3419_p4 = scmp.lt.s32.totalorder %s3410_s29, %s3410_s29 }
  0x2a   : > { %p3413_p13 = pnand %p3411_p12, %p3818_p7  ;;  %p3420_p6 = por %p3419_p4, %p3418_p2 }
  0x2c   : > { %p3414_p0 = pneg %p3413_p13 }
  0x2e   : > { %p3421_p8 = pnand %p3420_p6, %p3414_p0 }
  0x30   : > { %3424 = shalt.err (!%p3421_p8)
}
  0x31   : > { %s3683_s30 = smov 256   ;;  %s3684_s11 = smov 16  }
  0x32   : > { %2961 = dma.hbm_to_vmem [thread:$0]  (!%p3802_p5), %s4870_s1, 4096, %s3796_s23, [#allocation12], %s3683_s30, %s3683_s30, %s3684_s11  }
  0x33   : > { %s3425_s29 = scalar_lea.hbm %s4724_s3, 4096 }
  0x34   : > { %p3426_p9 = scmp.ne.s32.totalorder %s4724_s3, %s3425_s29  ;;  %p3432_p12 = scmp.lt.u32.totalorder %s3425_s29, %s4724_s3 }
  0x36   : > { %p3428_p10 = pnand %p3426_p9, %p3818_p7 }
  0x38   : > { %p3429_p11 = pneg %p3428_p10 }
  0x3a   : > { %p3434_p13 = pnand %p3432_p12, %p3429_p11 }
  0x3c   : > { %3437 = shalt.err (!%p3434_p13)
}
  0x3d   : > { %s3438_s23 = scalar_lea.vmem %s3806_s26, 4096  ;;  %p3446_p6 = scmp.lt.s32.totalorder %s3806_s26, %s3806_s26 }
  0x3e   : > { %p3439_p0 = scmp.ne.s32.totalorder %s3806_s26, %s3438_s23  ;;  %p3447_p8 = scmp.lt.s32.totalorder %s3438_s23, %s3438_s23 }
  0x40   : > { %p3441_p2 = pnand %p3439_p0, %p3818_p7  ;;  %p3448_p9 = por %p3447_p8, %p3446_p6 }
  0x42   : > { %p3442_p4 = pneg %p3441_p2 }
  0x44   : > { %p3449_p10 = pnand %p3448_p9, %p3442_p4 }
  0x46   : > { %3452 = shalt.err (!%p3449_p10)
}
  0x47   : > { %2967 = dma.hbm_to_vmem [thread:$0]  (!%p3802_p5), %s4724_s3, 4096, %s3806_s26, [#allocation15], %s3683_s30, %s3683_s30, %s3684_s11  }
  0x48   : > { %s3453_s12 = scalar_lea.hbm %s4723_s2, 4096 }
  0x49   : > { %p3454_p11 = scmp.ne.s32.totalorder %s4723_s2, %s3453_s12  ;;  %p3460_p0 = scmp.lt.u32.totalorder %s3453_s12, %s4723_s2 }
  0x4b   : > { %p3456_p12 = pnand %p3454_p11, %p3818_p7 }
  0x4d   : > { %p3457_p13 = pneg %p3456_p12 }
  0x4f   : > { %p3462_p2 = pnand %p3460_p0, %p3457_p13 }
  0x51   : > { %3465 = shalt.err (!%p3462_p2)
}
  0x52   : > { %s3466_s23 = scalar_lea.vmem %s314_s28, 4096  ;;  %p3474_p9 = scmp.lt.s32.totalorder %s314_s28, %s314_s28 }
  0x53   : > { %p3467_p4 = scmp.ne.s32.totalorder %s314_s28, %s3466_s23  ;;  %p3475_p10 = scmp.lt.s32.totalorder %s3466_s23, %s3466_s23 }
  0x55   : > { %p3469_p6 = pnand %p3467_p4, %p3818_p7  ;;  %p3476_p3 = por %p3475_p10, %p3474_p9 }
  0x57   : > { %p3470_p8 = pneg %p3469_p6 }
  0x59   : > { %p3477_p1 = pnand %p3476_p3, %p3470_p8 }
  0x5b   : > { %3480 = shalt.err (!%p3477_p1)
}
  0x5c   : > { %2964 = dma.hbm_to_vmem [thread:$0]  (!%p3802_p5), %s4723_s2, 4096, %s314_s28, [#allocation12], %s3683_s30, %s3683_s30, %s3684_s11  }
  0x5d   : > { %s3685_s6 = smov [#allocation16]   ;;  %s3481_s22 = scalar_lea.hbm %s4726_s5, 1024 }
  0x5e   : > { %s342_s8 = sshll.u32 %s3685_s6, 4  ;;  %p3482_p1 = scmp.ne.s32.totalorder %s4726_s5, %s3481_s22  ;;  %s343_s8 = int_to_ptr.vmem [resolvable:$true] %s342_s8 }
  0x5f   : > { %p3488_p12 = scmp.lt.u32.totalorder %s3481_s22, %s4726_s5 }
  0x60   : > { %p3484_p3 = pnand %p3482_p1, %p3818_p7 }
  0x62   : > { %p3485_p11 = pneg %p3484_p3 }
  0x64   : > { %p3490_p13 = pnand %p3488_p12, %p3485_p11 }
  0x66   : > { %3493 = shalt.err (!%p3490_p13)
}
  0x67   : > { %s3494_s28 = scalar_lea.vmem %s343_s8, 1024  ;;  %p3502_p6 = scmp.lt.s32.totalorder %s343_s8, %s343_s8 }
  0x68   : > { %p3495_p0 = scmp.ne.s32.totalorder %s343_s8, %s3494_s28  ;;  %p3503_p8 = scmp.lt.s32.totalorder %s3494_s28, %s3494_s28 }
  0x6a   : > { %p3497_p2 = pnand %p3495_p0, %p3818_p7  ;;  %p3504_p9 = por %p3503_p8, %p3502_p6 }
  0x6c   : > { %p3498_p4 = pneg %p3497_p2 }
  0x6e   : > { %p3505_p10 = pnand %p3504_p9, %p3498_p4 }
  0x70   : > { %3508 = shalt.err (!%p3505_p10)
}
  0x71   : > { %s3686_s30 = smov 64   ;;  %s3687_s11 = smov 4  }
  0x72   : > { %2970 = dma.hbm_to_vmem [thread:$0]  (!%p3802_p5), %s4726_s5, 1024, %s343_s8, [#allocation15], %s3686_s30, %s3686_s30, %s3687_s11  }
  0x73   : > { %s375_s12 = sshll.u32 %s4730_s9, 4  ;;  %s3688_s22 = smov [#allocation17]   ;;  %s3911_s12 = int_to_ptr.vmem [resolvable:$true] %s375_s12 }
  0x74   : > { %s358_s25 = sshll.u32 %s3688_s22, 4  ;;  %s3509_s23 = scalar_lea.hbm %s4728_s7, 1024  ;;  %s359_s25 = int_to_ptr.vmem [resolvable:$true] %s358_s25 }
  0x75   : > { %p3510_p1 = scmp.ne.s32.totalorder %s4728_s7, %s3509_s23  ;;  %p3516_p12 = scmp.lt.u32.totalorder %s3509_s23, %s4728_s7 }
  0x77   : > { %p3512_p3 = pnand %p3510_p1, %p3818_p7 }
  0x79   : > { %p3513_p11 = pneg %p3512_p3 }
  0x7b   : > { %p3518_p13 = pnand %p3516_p12, %p3513_p11 }
  0x7d   : > { %3521 = shalt.err (!%p3518_p13)
}
  0x7e   : > { %s3522_s4 = scalar_lea.vmem %s359_s25, 1024  ;;  %p3530_p6 = scmp.lt.s32.totalorder %s359_s25, %s359_s25 }
  0x7f   : > { %p3523_p0 = scmp.ne.s32.totalorder %s359_s25, %s3522_s4  ;;  %p3531_p8 = scmp.lt.s32.totalorder %s3522_s4, %s3522_s4 }
  0x81   : > { %p3525_p2 = pnand %p3523_p0, %p3818_p7  ;;  %p3532_p9 = por %p3531_p8, %p3530_p6 }
  0x83   : > { %p3526_p4 = pneg %p3525_p2 }
  0x85   : > { %p3533_p10 = pnand %p3532_p9, %p3526_p4 }
  0x87   : > { %3536 = shalt.err (!%p3533_p10)
}
  0x88   : > { %2973 = dma.hbm_to_vmem [thread:$0]  (!%p3802_p5), %s4728_s7, 1024, %s359_s25, [#allocation18], %s3686_s30, %s3686_s30, %s3687_s11  }
  0x89   : > { %s3537_s10 = scalar_lea.vmem %s3911_s12, 16  ;;  %p3545_p12 = scmp.lt.s32.totalorder %s3911_s12, %s3911_s12 }
  0x8a   : > { %p3538_p1 = scmp.ne.s32.totalorder %s3911_s12, %s3537_s10  ;;  %p3546_p13 = scmp.lt.s32.totalorder %s3537_s10, %s3537_s10 }
  0x8c   : > { %p3540_p3 = pnand %p3538_p1, %p3818_p7  ;;  %p3547_p0 = por %p3546_p13, %p3545_p12 }
  0x8e   : > { %p3541_p11 = pneg %p3540_p3 }
  0x90   : > { %p3548_p2 = pnand %p3547_p0, %p3541_p11 }
  0x92   : > { %3551 = shalt.err (!%p3548_p2)
}
  0x93   : > { %s3689_s22 = smov [#allocation19]   ;;  %s37_s19 = sadd.s32 1, %s3674_s17 }
  0x94   : > { %2976 = dma.vmem_to_smem (!%p3802_p5), %s3911_s12, 16, %s3689_s22, [#allocation10]  }
  0x95   : > { %s49_s30 = sadd.s32 1, %s3666_s15  ;;  %p38_p7 = scmp.ge.s32.totalorder %s37_s19, 2 }
  0x96   : > { %p56_p4 = scmp.ne.s32.totalorder %s3666_s15, %s3662_s14  ;;  %p57_p6 = scmp.eq.s32.totalorder %s3678_s18, 0 }
  0x97   : > { %p62_p8 = scmp.ne.s32.totalorder %s3662_s14, %s3658_s13  ;;  %s5051_s19 = smov (%p38_p7, %s37_s19), 0 }
  0x98   : > { %p3949_p9 = por %p57_p6, %p56_p4  ;;  %p4873_p10 = scmp.ne.s32.totalorder %s4867_s20, 0 }
  0x99   : > { %s44_s12 = ssub.s32 %s3674_s17, %s5051_s19  ;;  %p2987_p5 = scmp.lt.s32.totalorder %s3678_s18, 2 }
  0x9a   : > { %p3955_p1 = por %p4873_p10, %p62_p8  ;;  %p47_p3 = scmp.eq.s32.totalorder %s44_s12, 0 }
  0x9b   : > { %s386_s25 = sand.u32 1, %s3666_s15   ;;  %s2821_s13 = sshll.u32 %s3674_s17, 11 }
  0x9c   : > { %s2675_s27 = sshll.u32 %s386_s25, 7  ;;  %s3970_s8 = scalar_lea.hbm %s4721_s0, %s2821_s13 }
  0x9d   : > { %s3964_s29 = scalar_select %p47_p3, %s3666_s15, %s49_s30  }
  0x9e   : > { %s390_s26 = scalar_lea.vmem [#allocation7], %s2675_s27  ;;  %p3976_p11 = pnand %p2987_p5, %p3949_p9 }
  0x9f   : > { %s400_s4 = sshll.u32 %s390_s26, 4  ;;  %s3980_s6 = scalar_lea.sflag [#allocation8], %s386_s25  ;;  %s3972_s4 = int_to_ptr.vmem [resolvable:$true] %s400_s4 }
  0xa0   : > { %s3552_s10 = scalar_lea.hbm %s3970_s8, 2048  ;;  %p3554_p13 = pneg %p3976_p11 }
  0xa1   : > { %p3553_p12 = scmp.ne.s32.totalorder %s3970_s8, %s3552_s10  ;;  %s3557_s24 = scalar_lea.hbm %s4721_s0, 4096 }
  0xa2   : > { %p3558_p7 = scmp.lt.u32.totalorder %s3970_s8, %s4721_s0  ;;  %p3559_p4 = scmp.lt.u32.totalorder %s3557_s24, %s3552_s10 }
  0xa3   : > { %p3555_p0 = pnand %p3554_p13, %p3553_p12  ;;  %p3561_p8 = scmp.lt.u32.totalorder %s3552_s10, %s3970_s8 }
  0xa4   : > { %p3560_p6 = por %p3559_p4, %p3558_p7 }
  0xa5   : > { %p3556_p2 = pneg %p3555_p0 }
  0xa6   : > { %p3562_p9 = por %p3561_p8, %p3560_p6 }
  0xa8   : > { %p3563_p10 = pnand %p3562_p9, %p3556_p2 }
  0xaa   : > { %3566 = shalt.err (!%p3563_p10)
}
  0xab   : > { %s3567_s25 = scalar_lea.vmem %s3972_s4, 2048  ;;  %s3690_s13 = smov [#allocation7]  }
  0xac   : > { %p3568_p5 = scmp.ne.s32.totalorder %s3972_s4, %s3567_s25  ;;  %s3572_s23 = sshll.u32 %s3690_s13, 4  ;;  %s3573_s23 = int_to_ptr.vmem [resolvable:$false] %s3572_s23 }
  0xad   : > { %s3574_s28 = scalar_lea.vmem %s3573_s23, 4096  ;;  %p3575_p0 = scmp.lt.s32.totalorder %s3972_s4, %s3573_s23 }
  0xae   : > { %p3570_p3 = pnand %p3568_p5, %p3554_p13  ;;  %p3576_p7 = scmp.lt.s32.totalorder %s3574_s28, %s3567_s25 }
  0xb0   : > { %p3571_p12 = pneg %p3570_p3  ;;  %p3577_p4 = por %p3576_p7, %p3575_p0 }
  0xb2   : > { %p3578_p6 = pnand %p3577_p4, %p3571_p12 }
  0xb4   : > { %3581 = shalt.err (!%p3578_p6)
}
  0xb5   : > { %s3691_s26 = smov 512   ;;  %s3692_s10 = smov 32  }
  0xb6   : > { %2980 = dma.hbm_to_vmem [thread:$0]  (!%p3976_p11), %s3970_s8, 2048, %s3972_s4, %s3980_s6, %s3691_s26, %s3691_s26, %s3692_s10  }
  0xb7   : > { %p4876_p13 = scmp.ne.s32.totalorder %s4868_s21, 0 }
  0xb9   : > { %412 = sbr.rel (%p4876_p13) target bundleno = 2085 (0x825), region = 60 }
  0xc0   : > { %s414_s22 = sand.u32 1, %s3662_s14  }
  0xc1   : > { %s2680_s30 = sshll.u32 %s414_s22, 7  ;;  %s415_s24 = scalar_lea.sflag [#allocation8], %s414_s22 }
  0xc2   : > { %s4011_s12 = scalar_lea.vmem [#allocation7], %s2680_s30 }
  0xc3   : > { %3633 = dma.done.wait (%p3955_p1), %s415_s24, 2048  }
  0xc4   : > { %3635 = vsyncadd (%p3955_p1), %s415_s24, 4294965248  ;;  %p4877_p2 = scmp.ne.s32.totalorder %s4867_s20, 0 }
  0xc6   : > { %3637 = dma.done.wait (%p4877_p2), [#allocation12], 8192  }
  0xc7   : > { %3639 = vsyncadd (%p4877_p2), [#allocation12], 4294959104 }
  0xc8   : > { %3641 = dma.done.wait (%p4877_p2), [#allocation15], 5120  }
  0xc9   : > { %3643 = vsyncadd (%p4877_p2), [#allocation15], 4294962176 }
  0xca   : > { %3645 = dma.done.wait (%p4877_p2), [#allocation18], 1024  }
  0xcb   : > { %3647 = vsyncadd (%p4877_p2), [#allocation18], 4294966272 }
  0xcc   : > { %3649 = dma.done.wait (%p4877_p2), [#allocation10], 16  }
  0xcd   : > { %3651 = vsyncadd (%p4877_p2), [#allocation10], 4294967280 }
  0xce   : > { %447 = sfence }
  0xcf   : > { %p2687_p1 = scmp.ne.s32.totalorder %s3670_s16, 0 }
  0xd0   : > { %v3693_v0 = vmov (!%p2687_p1), 0.0  }
  0xd1   : > { %480 = sbr.rel (%p2687_p1) target bundleno = 216 (0xd8), region = 92  ;;  %481 = vst [vmem:[#allocation2] sm:$0xff] (!%p2687_p1), %v3693_v0  ;;  %482 = vst [vmem:[#allocation3] sm:$0xff] (!%p2687_p1), %v3693_v0 }
  0xd2   : > { %483 = vst [vmem:[#allocation4] sm:$0xff] (!%p2687_p1), %v3693_v0  ;;  %484 = vst [vmem:[#allocation5] sm:$0xff] (!%p2687_p1), %v3693_v0 }
  0xd3   : > { %485 = vst [vmem:[#allocation6] sm:$0xff] (!%p2687_p1), %v3693_v0 }
  0xd8 PF: > { %v4034_v1 = vld [vmem:[#allocation11 + $0x4] ss:$16 sps:$4 sm:$0xff]   ;;  %v4036_v2 = vld [vmem:[#allocation11] ss:$16 sps:$4 sm:$0xff]   ;;  %v4737_v3 = vmov 0   ;;  %v509_v32 = vld [vmem:[#allocation2] sm:$0xff] }
  0xd9   : > { %776 = vmatprep.mubr.bf16.mxu0 %v4737_v3  ;;  %817 = vmatprep.mubr.bf16.mxu1 %v4737_v3  ;;  %v4041_v4 = vld [vmem:[#allocation11 + $0x24] ss:$16 sps:$4 sm:$0xff]   ;;  %v4044_v5 = vld [vmem:[#allocation11 + $0xc] ss:$16 sps:$4 sm:$0xff]   ;;  %v4046_v6 = vld [vmem:[#allocation11 + $0x20] ss:$16 sps:$4 sm:$0xff]   ;;  %v551_v35 = vpack.c.bf16 %v509_v32, %v509_v32 }
  0xda   : > { %744 = vmatprep.subr.bf16.mxu0 %v4034_v1  ;;  %v4048_v7 = vld [vmem:[#allocation11 + $0x8] ss:$16 sps:$4 sm:$0xff]   ;;  %v4051_v8 = vld [vmem:[#allocation11 + $0x44] ss:$16 sps:$4 sm:$0xff]   ;;  %785 = vmatprep.subr.bf16.mxu1 %v4044_v5  ;;  %v4054_v9 = vld [vmem:[#allocation11 + $0x2c] ss:$16 sps:$4 sm:$0xff]  }
  0xdb   : > { %745 = vmatpush1.bf16.msra.mxu0 %v4036_v2  ;;  %786 = vmatpush1.bf16.msra.mxu1 %v4048_v7  ;;  %v4057_v10 = vld [vmem:[#allocation11 + $0x28] ss:$16 sps:$4 sm:$0xff]   ;;  %v4061_v11 = vld [vmem:[#allocation11 + $0x40] ss:$16 sps:$4 sm:$0xff]   ;;  %v4064_v12 = vld [vmem:[#allocation11 + $0x64] ss:$16 sps:$4 sm:$0xff]  }
  0xdc   : > { %746 = vmatprep.subr.bf16.mxu0 %v4041_v4  ;;  %787 = vmatprep.subr.bf16.mxu1 %v4054_v9  ;;  %v4066_v13 = vld [vmem:[#allocation11 + $0x4c] ss:$16 sps:$4 sm:$0xff]   ;;  %v4069_v14 = vld [vmem:[#allocation11 + $0x48] ss:$16 sps:$4 sm:$0xff]   ;;  %v4073_v15 = vld [vmem:[#allocation11 + $0x60] ss:$16 sps:$4 sm:$0xff]  }
  0xdd   : > { %v4075_v16 = vld [vmem:[#allocation11 + $0x6c] ss:$16 sps:$4 sm:$0xff]   ;;  %v4078_v17 = vld [vmem:[#allocation11 + $0x84] ss:$16 sps:$4 sm:$0xff]   ;;  %v4081_v18 = vld [vmem:[#allocation11 + $0x80] ss:$16 sps:$4 sm:$0xff]  }
  0xde   : > { %v4083_v19 = vld [vmem:[#allocation11 + $0x68] ss:$16 sps:$4 sm:$0xff]   ;;  %v4087_v20 = vld [vmem:[#allocation11 + $0x8c] ss:$16 sps:$4 sm:$0xff]   ;;  %v4090_v21 = vld [vmem:[#allocation11 + $0xa4] ss:$16 sps:$4 sm:$0xff]  }
  0xdf   : > { %747 = vmatpush1.bf16.msra.mxu0 %v4046_v6  ;;  %788 = vmatpush1.bf16.msra.mxu1 %v4057_v10  ;;  %v4093_v22 = vld [vmem:[#allocation11 + $0x88] ss:$16 sps:$4 sm:$0xff]   ;;  %v4097_v23 = vld [vmem:[#allocation11 + $0xa0] ss:$16 sps:$4 sm:$0xff]   ;;  %v4099_v24 = vld [vmem:[#allocation11 + $0xac] ss:$16 sps:$4 sm:$0xff]  }
  0xe0   : > { %748 = vmatprep.subr.bf16.mxu0 %v4051_v8  ;;  %789 = vmatprep.subr.bf16.mxu1 %v4066_v13  ;;  %v4102_v25 = vld [vmem:[#allocation11 + $0xc4] ss:$16 sps:$4 sm:$0xff]   ;;  %v4105_v26 = vld [vmem:[#allocation11 + $0xa8] ss:$16 sps:$4 sm:$0xff]   ;;  %v4109_v27 = vld [vmem:[#allocation11 + $0xc0] ss:$16 sps:$4 sm:$0xff]  }
  0xe1   : > { %v4111_v28 = vld [vmem:[#allocation11 + $0xcc] ss:$16 sps:$4 sm:$0xff]   ;;  %v4114_v29 = vld [vmem:[#allocation11 + $0xe4] ss:$16 sps:$4 sm:$0xff]   ;;  %v4117_v30 = vld [vmem:[#allocation11 + $0xe0] ss:$16 sps:$4 sm:$0xff]  }
  0xe2   : > { %v4119_v31 = vld [vmem:[#allocation11 + $0xc8] ss:$16 sps:$4 sm:$0xff]   ;;  %v4123_v33 = vld [vmem:[#allocation11 + $0xec] ss:$16 sps:$4 sm:$0xff]   ;;  %v4126_v34 = vld [vmem:[#allocation14 + $0x4] ss:$16 sps:$4 sm:$0xff]  }
  0xe3   : > { %749 = vmatpush1.bf16.msra.mxu0 %v4061_v11  ;;  %790 = vmatpush1.bf16.msra.mxu1 %v4069_v14  ;;  %v4129_v36 = vld [vmem:[#allocation11 + $0xe8] ss:$16 sps:$4 sm:$0xff]   ;;  %v4133_v37 = vld [vmem:[#allocation14 + $0xc] ss:$16 sps:$4 sm:$0xff]   ;;  %v4135_v38 = vld [vmem:[#allocation14] ss:$16 sps:$4 sm:$0xff]  }
  0xe4   : > { %750 = vmatprep.subr.bf16.mxu0 %v4064_v12  ;;  %791 = vmatprep.subr.bf16.mxu1 %v4075_v16  ;;  %v4138_v39 = vld [vmem:[#allocation14 + $0x24] ss:$16 sps:$4 sm:$0xff]   ;;  %v4141_v40 = vld [vmem:[#allocation14 + $0x8] ss:$16 sps:$4 sm:$0xff]   ;;  %v4143_v41 = vld [vmem:[#allocation14 + $0x2c] ss:$16 sps:$4 sm:$0xff]  }
  0xe5   : > { %v4147_v42 = vld [vmem:[#allocation14 + $0x20] ss:$16 sps:$4 sm:$0xff]   ;;  %v4150_v43 = vld [vmem:[#allocation14 + $0x44] ss:$16 sps:$4 sm:$0xff]   ;;  %v4153_v44 = vld [vmem:[#allocation14 + $0x28] ss:$16 sps:$4 sm:$0xff]  }
  0xe6   : > { %v4156_v45 = vld [vmem:[#allocation14 + $0x4c] ss:$16 sps:$4 sm:$0xff]   ;;  %v4161_v46 = vld [vmem:[#allocation14 + $0x40] ss:$16 sps:$4 sm:$0xff]   ;;  %v4163_v47 = vld [vmem:[#allocation14 + $0x64] ss:$16 sps:$4 sm:$0xff]  }
  0xe7   : > { %751 = vmatpush1.bf16.msra.mxu0 %v4073_v15  ;;  %792 = vmatpush1.bf16.msra.mxu1 %v4083_v19  ;;  %4878 = vst [vmem:[#allocation27_spill] sm:$0xff] %v4163_v47  ;;  %v4166_v48 = vld [vmem:[#allocation14 + $0x48] ss:$16 sps:$4 sm:$0xff]   ;;  %v4168_v49 = vld [vmem:[#allocation14 + $0x6c] ss:$16 sps:$4 sm:$0xff]   ;;  %s4953_s11 = sld [smem:[#allocation80_spill]] }
  0xe8   : > { %752 = vmatprep.subr.bf16.mxu0 %v4078_v17  ;;  %793 = vmatprep.subr.bf16.mxu1 %v4087_v20  ;;  %4879 = vst [vmem:[#allocation28_spill] sm:$0xff] %v4168_v49  ;;  %v4170_v50 = vld [vmem:[#allocation14 + $0x60] ss:$16 sps:$4 sm:$0xff]   ;;  %v4173_v51 = vld [vmem:[#allocation14 + $0x84] ss:$16 sps:$4 sm:$0xff]   ;;  %s4572_s8 = sshll.u32 %s3670_s16, 2 }
  0xe9   : > { %4880 = vst [vmem:[#allocation29_spill] sm:$0xff] %v4170_v50  ;;  %4881 = vst [vmem:[#allocation30_spill] sm:$0xff] %v4173_v51  ;;  %v4178_v52 = vld [vmem:[#allocation14 + $0x68] ss:$16 sps:$4 sm:$0xff]   ;;  %v4180_v53 = vld [vmem:[#allocation14 + $0x8c] ss:$16 sps:$4 sm:$0xff]  }
  0xea   : > { %4882 = vst [vmem:[#allocation31_spill] sm:$0xff] %v4178_v52  ;;  %4883 = vst [vmem:[#allocation32_spill] sm:$0xff] %v4180_v53  ;;  %v4182_v54 = vld [vmem:[#allocation14 + $0x80] ss:$16 sps:$4 sm:$0xff]   ;;  %v4185_v55 = vld [vmem:[#allocation14 + $0xa4] ss:$16 sps:$4 sm:$0xff]  }
  0xeb   : > { %753 = vmatpush1.bf16.msra.mxu0 %v4081_v18  ;;  %794 = vmatpush1.bf16.msra.mxu1 %v4093_v22  ;;  %4884 = vst [vmem:[#allocation33_spill] sm:$0xff] %v4182_v54  ;;  %4885 = vst [vmem:[#allocation34_spill] sm:$0xff] %v4185_v55  ;;  %v4190_v56 = vld [vmem:[#allocation14 + $0x88] ss:$16 sps:$4 sm:$0xff]   ;;  %v4192_v57 = vld [vmem:[#allocation14 + $0xac] ss:$16 sps:$4 sm:$0xff]  }
  0xec   : > { %754 = vmatprep.subr.bf16.mxu0 %v4090_v21  ;;  %795 = vmatprep.subr.bf16.mxu1 %v4099_v24  ;;  %4886 = vst [vmem:[#allocation35_spill] sm:$0xff] %v4190_v56  ;;  %4887 = vst [vmem:[#allocation36_spill] sm:$0xff] %v4192_v57  ;;  %v4194_v58 = vld [vmem:[#allocation14 + $0xa0] ss:$16 sps:$4 sm:$0xff]   ;;  %v4200_v59 = vld [vmem:[#allocation14 + $0xc4] ss:$16 sps:$4 sm:$0xff]  }
  0xed   : > { %4888 = vst [vmem:[#allocation37_spill] sm:$0xff] %v4194_v58  ;;  %4889 = vst [vmem:[#allocation38_spill] sm:$0xff] %v4200_v59  ;;  %v4203_v60 = vld [vmem:[#allocation14 + $0xa8] ss:$16 sps:$4 sm:$0xff]   ;;  %v4207_v61 = vld [vmem:[#allocation14 + $0xcc] ss:$16 sps:$4 sm:$0xff]  }
  0xee   : > { %4890 = vst [vmem:[#allocation39_spill] sm:$0xff] %v4203_v60  ;;  %4891 = vst [vmem:[#allocation40_spill] sm:$0xff] %v4207_v61  ;;  %v4212_v62 = vld [vmem:[#allocation14 + $0xc0] ss:$16 sps:$4 sm:$0xff]   ;;  %v4214_v63 = vld [vmem:[#allocation14 + $0xc8] ss:$16 sps:$4 sm:$0xff]  }
  0xef   : > { %755 = vmatpush1.bf16.msra.mxu0 %v4097_v23  ;;  %796 = vmatpush1.bf16.msra.mxu1 %v4105_v26  ;;  %4892 = vst [vmem:[#allocation41_spill] sm:$0xff] %v4212_v62  ;;  %4893 = vst [vmem:[#allocation42_spill] sm:$0xff] %v4214_v63  ;;  %v4218_v0 = vld [vmem:[#allocation14 + $0xe4] ss:$16 sps:$4 sm:$0xff]   ;;  %v4220_v32 = vld [vmem:[#allocation14 + $0xec] ss:$16 sps:$4 sm:$0xff]  }
  0xf0   : > { %756 = vmatprep.subr.bf16.mxu0 %v4102_v25  ;;  %797 = vmatprep.subr.bf16.mxu1 %v4111_v28  ;;  %4894 = vst [vmem:[#allocation43_spill] sm:$0xff] %v4218_v0  ;;  %4895 = vst [vmem:[#allocation44_spill] sm:$0xff] %v4220_v32  ;;  %s1387_s4 = sld [smem:[#allocation19 + %s4572_s8]]  ;;  %s1688_s1 = sadd.s32 1, %s4572_s8 }
  0xf1   : > { %s1689_s6 = sld [smem:[#allocation19 + %s1688_s1]]  ;;  %s1990_s27 = sadd.s32 2, %s4572_s8 }
  0xf2   : > { %s1991_s25 = sld [smem:[#allocation19 + %s1990_s27]]  ;;  %s2292_s13 = sadd.s32 3, %s4572_s8 }
  0xf3   : > { %757 = vmatpush1.bf16.msra.mxu0 %v4109_v27  ;;  %798 = vmatpush1.bf16.msra.mxu1 %v4119_v31  ;;  %s2293_s23 = sld [smem:[#allocation19 + %s2292_s13]]  ;;  %p2797_p11 = scmp.ne.s32.totalorder %s3670_s16, 1 }
  0xf4   : > { %758 = vmatprep.subr.bf16.mxu0 %v4114_v29  ;;  %799 = vmatprep.subr.bf16.mxu1 %v4123_v33  ;;  %vm3696_vm0 = vmmov (!%p2797_p11), 0   ;;  %s5040_s26 = sld [smem:[#allocation81_spill]] (!%p2797_p11)  ;;  %s5041_s30 = sld [smem:[#allocation82_spill]] (!%p2797_p11) }
  0xf7   : > { %759 = vmatpush1.bf16.msra.mxu0 %v4117_v30  ;;  %800 = vmatpush1.bf16.msra.mxu1 %v4129_v36 }
  0xf8   : > { %1008 = vmatprep.subr.bf16.mxu0 %v4126_v34  ;;  %1049 = vmatprep.subr.bf16.mxu1 %v4133_v37 }
  0xfa   : > { %777 = vmatmul.mubr.bf16.vlgmr.msra.gmra.mrb[0].mxu0 %v551_v35  ;;  %818 = vmatmul.mubr.bf16.vlgmr.msra.gmra.mrb[0].mxu1 %v551_v35  ;;  %v4222_v35 = vld [vmem:[#allocation14 + $0xe0] ss:$16 sps:$4 sm:$0xff]  }
  0xfb   : > { %1009 = vmatpush1.bf16.msra.mxu0 %v4135_v38  ;;  %1040 = vmatprep.mubr.bf16.mxu0 %v4737_v3  ;;  %4896 = vst [vmem:[#allocation45_spill] sm:$0xff] %v4222_v35 }
  0xfc   : > { %1010 = vmatprep.subr.bf16.mxu0 %v4138_v39  ;;  %1050 = vmatpush1.bf16.msra.mxu1 %v4141_v40 }
  0xfd   : > { %1081 = vmatprep.mubr.bf16.mxu1 %v4737_v3  ;;  %1051 = vmatprep.subr.bf16.mxu1 %v4143_v41  ;;  %v4224_v3 = vld [vmem:[#allocation14 + $0xe8] ss:$16 sps:$4 sm:$0xff]  }
  0xfe   : > { %4897 = vst [vmem:[#allocation46_spill] sm:$0xff] %v4224_v3 }
  0xff   : > { %1011 = vmatpush1.bf16.msra.mxu0 %v4147_v42 }
 0x100   : > { %1012 = vmatprep.subr.bf16.mxu0 %v4150_v43  ;;  %1052 = vmatpush1.bf16.msra.mxu1 %v4153_v44 }
 0x101   : > { %1053 = vmatprep.subr.bf16.mxu1 %v4156_v45 }
 0x103   : > { %1013 = vmatpush1.bf16.msra.mxu0 %v4161_v46 }
 0x104   : > { %1014 = vmatprep.subr.bf16.mxu0 %v4163_v47  ;;  %1054 = vmatpush1.bf16.msra.mxu1 %v4166_v48 }
 0x105   : > { %1055 = vmatprep.subr.bf16.mxu1 %v4168_v49 }
 0x107   : > { %1015 = vmatpush1.bf16.msra.mxu0 %v4170_v50 }
 0x108   : > { %1016 = vmatprep.subr.bf16.mxu0 %v4173_v51  ;;  %1056 = vmatpush1.bf16.msra.mxu1 %v4178_v52 }
 0x109   : > { %1057 = vmatprep.subr.bf16.mxu1 %v4180_v53 }
 0x10b   : > { %1017 = vmatpush1.bf16.msra.mxu0 %v4182_v54 }
 0x10c   : > { %1018 = vmatprep.subr.bf16.mxu0 %v4185_v55  ;;  %1058 = vmatpush1.bf16.msra.mxu1 %v4190_v56 }
 0x10d   : > { %1059 = vmatprep.subr.bf16.mxu1 %v4192_v57  ;;  %v549_v57 = vld [vmem:[%s4011_s12 + $0x10] sm:$0xff] }
 0x10f   : > { %1019 = vmatpush1.bf16.msra.mxu0 %v4194_v58  ;;  %v4236_v58 = vld [vmem:[#allocation13 + $0x8] ss:$16 sps:$4 sm:$0xff]  }
 0x110   : > { %1020 = vmatprep.subr.bf16.mxu0 %v4200_v59  ;;  %1060 = vmatpush1.bf16.msra.mxu1 %v4203_v60  ;;  %v4234_v60 = vld [vmem:[#allocation13] ss:$16 sps:$4 sm:$0xff]   ;;  %4901 = vst [vmem:[#allocation50_spill] sm:$0xff] %v4236_v58 }
 0x111   : > { %1061 = vmatprep.subr.bf16.mxu1 %v4207_v61  ;;  %v4230_v61 = vld [vmem:[#allocation13 + $0x4] ss:$16 sps:$4 sm:$0xff]   ;;  %4900 = vst [vmem:[#allocation49_spill] sm:$0xff] %v4234_v60 }
 0x112   : > { %4898 = vst [vmem:[#allocation47_spill] sm:$0xff] %v4230_v61 }
 0x113   : > { %1021 = vmatpush1.bf16.msra.mxu0 %v4212_v62  ;;  %v4232_v62 = vld [vmem:[#allocation13 + $0xc] ss:$16 sps:$4 sm:$0xff]  }
 0x114   : > { %1062 = vmatpush1.bf16.msra.mxu1 %v4214_v63  ;;  %1022 = vmatprep.subr.bf16.mxu0 %v4218_v0  ;;  %4899 = vst [vmem:[#allocation48_spill] sm:$0xff] %v4232_v62  ;;  %v511_v63 = vld [vmem:[#allocation4] sm:$0xff]  ;;  %v4906_v0 = vmov 0  }
 0x115   : > { %1063 = vmatprep.subr.bf16.mxu1 %v4220_v32  ;;  %v514_v59 = vpack.c.bf16 %v511_v63, %v511_v63  ;;  %v4246_v32 = vld [vmem:[#allocation13 + $0x20] ss:$16 sps:$4 sm:$0xff]   ;;  %v4248_v63 = vld [vmem:[#allocation13 + $0x28] ss:$16 sps:$4 sm:$0xff]  }
 0x116   : > { %4904 = vst [vmem:[#allocation53_spill] sm:$0xff] %v4246_v32  ;;  %4905 = vst [vmem:[#allocation54_spill] sm:$0xff] %v4248_v63 }
 0x117   : > { %1023 = vmatpush1.bf16.msra.mxu0 %v4222_v35  ;;  %v4244_v35 = vld [vmem:[#allocation13 + $0x2c] ss:$16 sps:$4 sm:$0xff]  }
 0x118   : > { %1064 = vmatpush1.bf16.msra.mxu1 %v4224_v3  ;;  %1283 = vmatprep.subr.bf16.mxu0 %v4230_v61  ;;  %v4242_v3 = vld [vmem:[#allocation13 + $0x24] ss:$16 sps:$4 sm:$0xff]   ;;  %4903 = vst [vmem:[#allocation52_spill] sm:$0xff] %v4244_v35 }
 0x119   : > { %1324 = vmatprep.subr.bf16.mxu1 %v4232_v62  ;;  %4902 = vst [vmem:[#allocation51_spill] sm:$0xff] %v4242_v3  ;;  %v4262_v62 = vld [vmem:[#allocation13 + $0x48] ss:$16 sps:$4 sm:$0xff]  }
 0x11a   : > { %1041 = vmatmul.mubr.bf16.vlgmr.msra.gmra.mrb[4].mxu0 %v514_v59  ;;  %4910 = vst [vmem:[#allocation58_spill] sm:$0xff] %v4262_v62 }
 0x11b   : > { %1082 = vmatmul.mubr.bf16.vlgmr.msra.gmra.mrb[4].mxu1 %v514_v59  ;;  %1284 = vmatpush1.bf16.msra.mxu0 %v4234_v60  ;;  %v4256_v59 = vld [vmem:[#allocation13 + $0x44] ss:$16 sps:$4 sm:$0xff]   ;;  %v4260_v60 = vld [vmem:[#allocation13 + $0x40] ss:$16 sps:$4 sm:$0xff]  }
 0x11c   : > { %1325 = vmatpush1.bf16.msra.mxu1 %v4236_v58  ;;  %1315 = vmatprep.mubr.bf16.mxu0 %v4906_v0  ;;  %4907 = vst [vmem:[#allocation55_spill] sm:$0xff] %v4256_v59  ;;  %v4258_v58 = vld [vmem:[#allocation13 + $0x4c] ss:$16 sps:$4 sm:$0xff]   ;;  %4909 = vst [vmem:[#allocation57_spill] sm:$0xff] %v4260_v60 }
 0x11d   : > { %1356 = vmatprep.mubr.bf16.mxu1 %v4906_v0  ;;  %1285 = vmatprep.subr.bf16.mxu0 %v4242_v3  ;;  %4908 = vst [vmem:[#allocation56_spill] sm:$0xff] %v4258_v58  ;;  %v4274_v3 = vld [vmem:[#allocation13 + $0x68] ss:$16 sps:$4 sm:$0xff]  }
 0x11e   : > { %1326 = vmatprep.subr.bf16.mxu1 %v4244_v35  ;;  %v4268_v35 = vld [vmem:[#allocation13 + $0x64] ss:$16 sps:$4 sm:$0xff]   ;;  %4914 = vst [vmem:[#allocation62_spill] sm:$0xff] %v4274_v3 }
 0x11f   : > { %1286 = vmatpush1.bf16.msra.mxu0 %v4246_v32  ;;  %4911 = vst [vmem:[#allocation59_spill] sm:$0xff] %v4268_v35  ;;  %v4270_v32 = vld [vmem:[#allocation13 + $0x6c] ss:$16 sps:$4 sm:$0xff]  }
 0x120   : > { %1327 = vmatpush1.bf16.msra.mxu1 %v4248_v63  ;;  %1287 = vmatprep.subr.bf16.mxu0 %v4256_v59  ;;  %4912 = vst [vmem:[#allocation60_spill] sm:$0xff] %v4270_v32  ;;  %v4272_v63 = vld [vmem:[#allocation13 + $0x60] ss:$16 sps:$4 sm:$0xff]   ;;  %v4286_v59 = vld [vmem:[#allocation13 + $0x88] ss:$16 sps:$4 sm:$0xff]  }
 0x121   : > { %1328 = vmatprep.subr.bf16.mxu1 %v4258_v58  ;;  %4913 = vst [vmem:[#allocation61_spill] sm:$0xff] %v4272_v63  ;;  %v4280_v58 = vld [vmem:[#allocation13 + $0x84] ss:$16 sps:$4 sm:$0xff]   ;;  %4918 = vst [vmem:[#allocation66_spill] sm:$0xff] %v4286_v59 }
 0x122   : > { %4915 = vst [vmem:[#allocation63_spill] sm:$0xff] %v4280_v58 }
 0x123   : > { %1288 = vmatpush1.bf16.msra.mxu0 %v4260_v60  ;;  %v4282_v60 = vld [vmem:[#allocation13 + $0x8c] ss:$16 sps:$4 sm:$0xff]  }
 0x124   : > { %1329 = vmatpush1.bf16.msra.mxu1 %v4262_v62  ;;  %1289 = vmatprep.subr.bf16.mxu0 %v4268_v35  ;;  %4916 = vst [vmem:[#allocation64_spill] sm:$0xff] %v4282_v60  ;;  %v4284_v62 = vld [vmem:[#allocation13 + $0x80] ss:$16 sps:$4 sm:$0xff]   ;;  %v4298_v35 = vld [vmem:[#allocation13 + $0xa8] ss:$16 sps:$4 sm:$0xff]  }
 0x125   : > { %1330 = vmatprep.subr.bf16.mxu1 %v4270_v32  ;;  %4917 = vst [vmem:[#allocation65_spill] sm:$0xff] %v4284_v62  ;;  %v4292_v32 = vld [vmem:[#allocation13 + $0xa4] ss:$16 sps:$4 sm:$0xff]   ;;  %4922 = vst [vmem:[#allocation70_spill] sm:$0xff] %v4298_v35 }
 0x126   : > { %4919 = vst [vmem:[#allocation67_spill] sm:$0xff] %v4292_v32 }
 0x127   : > { %1290 = vmatpush1.bf16.msra.mxu0 %v4272_v63  ;;  %v4294_v63 = vld [vmem:[#allocation13 + $0xac] ss:$16 sps:$4 sm:$0xff]  }
 0x128   : > { %1331 = vmatpush1.bf16.msra.mxu1 %v4274_v3  ;;  %1291 = vmatprep.subr.bf16.mxu0 %v4280_v58  ;;  %4920 = vst [vmem:[#allocation68_spill] sm:$0xff] %v4294_v63  ;;  %v4296_v3 = vld [vmem:[#allocation13 + $0xa0] ss:$16 sps:$4 sm:$0xff]   ;;  %v4310_v58 = vld [vmem:[#allocation13 + $0xc8] ss:$16 sps:$4 sm:$0xff]  }
 0x129   : > { %1332 = vmatprep.subr.bf16.mxu1 %v4282_v60  ;;  %4921 = vst [vmem:[#allocation69_spill] sm:$0xff] %v4296_v3  ;;  %v4304_v60 = vld [vmem:[#allocation13 + $0xc4] ss:$16 sps:$4 sm:$0xff]   ;;  %4926 = vst [vmem:[#allocation74_spill] sm:$0xff] %v4310_v58 }
 0x12a   : > { %4923 = vst [vmem:[#allocation71_spill] sm:$0xff] %v4304_v60 }
 0x12b   : > { %1292 = vmatpush1.bf16.msra.mxu0 %v4284_v62  ;;  %v4306_v62 = vld [vmem:[#allocation13 + $0xcc] ss:$16 sps:$4 sm:$0xff]  }
 0x12c   : > { %1333 = vmatpush1.bf16.msra.mxu1 %v4286_v59  ;;  %1293 = vmatprep.subr.bf16.mxu0 %v4292_v32  ;;  %4924 = vst [vmem:[#allocation72_spill] sm:$0xff] %v4306_v62  ;;  %v4308_v59 = vld [vmem:[#allocation13 + $0xc0] ss:$16 sps:$4 sm:$0xff]   ;;  %v4322_v32 = vld [vmem:[#allocation13 + $0xe8] ss:$16 sps:$4 sm:$0xff]  }
 0x12d   : > { %1334 = vmatprep.subr.bf16.mxu1 %v4294_v63  ;;  %4925 = vst [vmem:[#allocation73_spill] sm:$0xff] %v4308_v59  ;;  %v4320_v63 = vld [vmem:[#allocation13 + $0xe0] ss:$16 sps:$4 sm:$0xff]   ;;  %4930 = vst [vmem:[#allocation78_spill] sm:$0xff] %v4322_v32 }
 0x12e   : > { %4929 = vst [vmem:[#allocation77_spill] sm:$0xff] %v4320_v63 }
 0x12f   : > { %1294 = vmatpush1.bf16.msra.mxu0 %v4296_v3  ;;  %v4318_v3 = vld [vmem:[#allocation13 + $0xec] ss:$16 sps:$4 sm:$0xff]  }
 0x130   : > { %1335 = vmatpush1.bf16.msra.mxu1 %v4298_v35  ;;  %1295 = vmatprep.subr.bf16.mxu0 %v4304_v60  ;;  %v4316_v35 = vld [vmem:[#allocation13 + $0xe4] ss:$16 sps:$4 sm:$0xff]   ;;  %4928 = vst [vmem:[#allocation76_spill] sm:$0xff] %v4318_v3 }
 0x131   : > { %1336 = vmatprep.subr.bf16.mxu1 %v4306_v62  ;;  %4927 = vst [vmem:[#allocation75_spill] sm:$0xff] %v4316_v35 }
 0x133   : > { %1296 = vmatpush1.bf16.msra.mxu0 %v4308_v59  ;;  %v548_v59 = vld [vmem:[%s4011_s12 + $0x8] sm:$0xff] }
 0x134   : > { %1337 = vmatpush1.bf16.msra.mxu1 %v4310_v58  ;;  %1297 = vmatprep.subr.bf16.mxu0 %v4316_v35  ;;  %v547_v58 = vld [vmem:[%s4011_s12] sm:$0xff] }
 0x135   : > { %1338 = vmatprep.subr.bf16.mxu1 %v4318_v3 }
 0x137   : > { %1298 = vmatpush1.bf16.msra.mxu0 %v4320_v63 }
 0x138   : > { %1339 = vmatpush1.bf16.msra.mxu1 %v4322_v32  ;;  %1397 = vmatprep.subr.bf16.mxu0 %v4034_v1  ;;  %v550_v1 = vld [vmem:[%s4011_s12 + $0x18] sm:$0xff] }
 0x139   : > { %1438 = vmatprep.subr.bf16.mxu1 %v4044_v5 }
 0x1cd   : > { %v778_v62 = vpop.f32.mrb[0].mxu0  ;;  %v819_v3 = vpop.f32.mrb[0].mxu1 }
 0x1ce   : > { %v826_v60 = vadd.f32 %v778_v62, %v547_v58  ;;  %v780_v61 = vpop.f32.mrb[1].mxu0  ;;  %v828_v63 = vadd.f32 %v819_v3, %v549_v57  ;;  %v821_v51 = vpop.f32.mrb[1].mxu1 }
 0x1cf   : > { %v827_v55 = vadd.f32 %v780_v61, %v548_v59  ;;  %v782_v56 = vpop.f32.mrb[2].mxu0  ;;  %v823_v32 = vpop.f32.mrb[2].mxu1  ;;  %v829_v52 = vadd.f32 %v821_v51, %v550_v1  ;;  %v4947_v59 = vld [vmem:[#allocation43_spill] sm:$0xff]  ;;  %v4948_v1 = vld [vmem:[#allocation44_spill] sm:$0xff] }
 0x1d0   : > { %v830_v35 = vmul.f32 0.5, %v826_v60  ;;  %v783_v54 = vpop.f32.mrb[3].mxu0  ;;  %v824_v5 = vpop.f32.mrb[3].mxu1 }
 0x1d1   : > { %v831_v53 = vmul.f32 0.5, %v827_v55  ;;  %v839_v50 = vmul.f32 0.5, %v829_v52  ;;  %v510_v54 = vld [vmem:[#allocation3] sm:$0xff]  ;;  %v4949_v5 = vld [vmem:[#allocation45_spill] sm:$0xff] }
 0x1d2   : > { %3205 = vtanh.f32 %v830_v35 }
 0x1d3   : > { %3207 = vtanh.f32 %v831_v53 }
 0x1d4   : > { %3209 = vtanh.f32 %v828_v63 }
 0x1d5   : > { %3211 = vtanh.f32 %v839_v50  ;;  %v4946_v50 = vld [vmem:[#allocation42_spill] sm:$0xff] }
 0x1dc   : > { %v3206_v49 = vpop.eup %3205 }
 0x1dd   : > { %v3208_v58 = vpop.eup %3207  ;;  %v834_v62 = vmul.f32 0.5, %v3206_v49  ;;  %v4945_v49 = vld [vmem:[#allocation41_spill] sm:$0xff] }
 0x1de   : > { %v3210_v47 = vpop.eup %3209  ;;  %v835_v61 = vmul.f32 0.5, %v3208_v58  ;;  %v4950_v58 = vld [vmem:[#allocation46_spill] sm:$0xff] }
 0x1df   : > { %v836_v56 = vadd.f32 0.5, %v834_v62  ;;  %v3212_v53 = vpop.eup %3211  ;;  %v4951_v62 = vld [vmem:[#allocation47_spill] sm:$0xff] }
 0x1e0   : > { %v837_v60 = vadd.f32 0.5, %v835_v61  ;;  %v841_v32 = vmul.f32 0.5, %v3212_v53  ;;  %v4952_v61 = vld [vmem:[#allocation48_spill] sm:$0xff] }
 0x1e1   : > { %v844_v55 = vmul.f32 %v3210_v47, %v836_v56  ;;  %v4944_v47 = vld [vmem:[#allocation40_spill] sm:$0xff]  ;;  %v488_v56 = vlaneseq }
 0x1e2   : > { %v843_v3 = vmul.f32 %v837_v60, %v510_v54  ;;  %v842_v35 = vadd.f32 0.5, %v841_v32 }
 0x1e3   : > { %v489_v54 = vshrl.u32 %v488_v56, 7 }
 0x1e4   : > { %v4334_v57 = vadd.f32 %v844_v55, %v843_v3  ;;  %v486_v55 = vld [vmem:[%s4953_s11] sm:$0xf] }
 0x1e5   : > { %v490_v60 = vsub.s32 0, %v489_v54  ;;  %v494_v3 = vsub.s32 1, %v489_v54  ;;  %v498_v32 = vsub.s32 2, %v489_v54 }
 0x1e6   : > { %3213 = vtanh.f32 %v4334_v57 }
 0x1e7   : > { %v4408_v53 = vrot.slane %v486_v55, %v490_v60 }
 0x1f0   : > { %v3214_v51 = vpop.eup %3213 }
 0x1f1   : > { %v847_v52 = vmul.f32 %v3214_v51, %v842_v35  ;;  %v4410_v35 = vrot.slane %v486_v55, %v494_v3 }
 0x1f3   : > { %v1090_v63 = vpack.c.bf16 %v847_v52, %v847_v52 }
 0x1f5   : > { %1316 = vmatmul.mubr.bf16.vlgmr.msra.gmra.mrb[4].mxu0 %v1090_v63  ;;  %1357 = vmatmul.mubr.bf16.vlgmr.msra.gmra.mrb[4].mxu1 %v1090_v63 }
 0x1f6   : > { %1398 = vmatpush1.bf16.msra.mxu0 %v4036_v2  ;;  %1439 = vmatpush1.bf16.msra.mxu1 %v4048_v7  ;;  %v4931_v2 = vld [vmem:[#allocation27_spill] sm:$0xff] }
 0x1f7   : > { %1399 = vmatprep.subr.bf16.mxu0 %v4041_v4  ;;  %1440 = vmatprep.subr.bf16.mxu1 %v4054_v9  ;;  %v4932_v4 = vld [vmem:[#allocation28_spill] sm:$0xff]  ;;  %v4934_v7 = vld [vmem:[#allocation31_spill] sm:$0xff]  ;;  %4954 = vst [vmem:[#allocation27_spill] sm:$0xff] %v4408_v53 }
 0x1f8   : > { %1429 = vmatprep.mubr.bf16.mxu0 %v4906_v0  ;;  %1470 = vmatprep.mubr.bf16.mxu1 %v4906_v0  ;;  %v4936_v9 = vld [vmem:[#allocation32_spill] sm:$0xff]  ;;  %4955 = vst [vmem:[#allocation28_spill] sm:$0xff] %v4410_v35 }
 0x1fa   : > { %1400 = vmatpush1.bf16.msra.mxu0 %v4046_v6  ;;  %1441 = vmatpush1.bf16.msra.mxu1 %v4057_v10  ;;  %v4933_v6 = vld [vmem:[#allocation29_spill] sm:$0xff] }
 0x1fb   : > { %1401 = vmatprep.subr.bf16.mxu0 %v4051_v8  ;;  %1442 = vmatprep.subr.bf16.mxu1 %v4066_v13  ;;  %v4935_v8 = vld [vmem:[#allocation30_spill] sm:$0xff]  ;;  %v4937_v10 = vld [vmem:[#allocation33_spill] sm:$0xff]  ;;  %v4940_v13 = vld [vmem:[#allocation36_spill] sm:$0xff] }
 0x1fe   : > { %1402 = vmatpush1.bf16.msra.mxu0 %v4061_v11  ;;  %1443 = vmatpush1.bf16.msra.mxu1 %v4069_v14  ;;  %v4938_v11 = vld [vmem:[#allocation35_spill] sm:$0xff]  ;;  %v4941_v14 = vld [vmem:[#allocation37_spill] sm:$0xff] }
 0x1ff   : > { %1403 = vmatprep.subr.bf16.mxu0 %v4064_v12  ;;  %1444 = vmatprep.subr.bf16.mxu1 %v4075_v16  ;;  %v4939_v12 = vld [vmem:[#allocation34_spill] sm:$0xff] }
 0x202   : > { %1404 = vmatpush1.bf16.msra.mxu0 %v4073_v15  ;;  %1445 = vmatpush1.bf16.msra.mxu1 %v4083_v19  ;;  %v4942_v15 = vld [vmem:[#allocation39_spill] sm:$0xff] }
 0x203   : > { %1405 = vmatprep.subr.bf16.mxu0 %v4078_v17  ;;  %1446 = vmatprep.subr.bf16.mxu1 %v4087_v20  ;;  %v4943_v17 = vld [vmem:[#allocation38_spill] sm:$0xff] }
 0x206   : > { %1406 = vmatpush1.bf16.msra.mxu0 %v4081_v18  ;;  %1447 = vmatpush1.bf16.msra.mxu1 %v4093_v22 }
 0x207   : > { %1407 = vmatprep.subr.bf16.mxu0 %v4090_v21  ;;  %1448 = vmatprep.subr.bf16.mxu1 %v4099_v24 }
 0x20a   : > { %1408 = vmatpush1.bf16.msra.mxu0 %v4097_v23  ;;  %1449 = vmatpush1.bf16.msra.mxu1 %v4105_v26 }
 0x20b   : > { %1409 = vmatprep.subr.bf16.mxu0 %v4102_v25  ;;  %1450 = vmatprep.subr.bf16.mxu1 %v4111_v28 }
 0x20e   : > { %1410 = vmatpush1.bf16.msra.mxu0 %v4109_v27  ;;  %1451 = vmatpush1.bf16.msra.mxu1 %v4119_v31 }
 0x20f   : > { %1411 = vmatprep.subr.bf16.mxu0 %v4114_v29  ;;  %1452 = vmatprep.subr.bf16.mxu1 %v4123_v33 }
 0x212   : > { %1412 = vmatpush1.bf16.msra.mxu0 %v4117_v30  ;;  %1453 = vmatpush1.bf16.msra.mxu1 %v4129_v36 }
 0x213   : > { %1501 = vmatprep.subr.bf16.mxu0 %v4126_v34  ;;  %1542 = vmatprep.subr.bf16.mxu1 %v4133_v37 }
 0x215   : > { %1430 = vmatmul.mubr.bf16.vlgmr.msra.gmra.mrb[8].mxu0 %v1090_v63  ;;  %1471 = vmatmul.mubr.bf16.vlgmr.msra.gmra.mrb[8].mxu1 %v1090_v63 }
 0x216   : > { %1502 = vmatpush1.bf16.msra.mxu0 %v4135_v38  ;;  %1543 = vmatpush1.bf16.msra.mxu1 %v4141_v40 }
 0x217   : > { %1503 = vmatprep.subr.bf16.mxu0 %v4138_v39  ;;  %1544 = vmatprep.subr.bf16.mxu1 %v4143_v41 }
 0x218   : > { %1533 = vmatprep.mubr.bf16.mxu0 %v4906_v0  ;;  %1574 = vmatprep.mubr.bf16.mxu1 %v4906_v0 }
 0x21a   : > { %1504 = vmatpush1.bf16.msra.mxu0 %v4147_v42  ;;  %1545 = vmatpush1.bf16.msra.mxu1 %v4153_v44 }
 0x21b   : > { %1505 = vmatprep.subr.bf16.mxu0 %v4150_v43  ;;  %1546 = vmatprep.subr.bf16.mxu1 %v4156_v45 }
 0x21e   : > { %1506 = vmatpush1.bf16.msra.mxu0 %v4161_v46  ;;  %1547 = vmatpush1.bf16.msra.mxu1 %v4166_v48 }
 0x21f   : > { %1507 = vmatprep.subr.bf16.mxu0 %v4931_v2  ;;  %1548 = vmatprep.subr.bf16.mxu1 %v4932_v4 }
 0x222   : > { %1508 = vmatpush1.bf16.msra.mxu0 %v4933_v6  ;;  %1549 = vmatpush1.bf16.msra.mxu1 %v4934_v7 }
 0x223   : > { %1509 = vmatprep.subr.bf16.mxu0 %v4935_v8  ;;  %1550 = vmatprep.subr.bf16.mxu1 %v4936_v9 }
 0x226   : > { %1510 = vmatpush1.bf16.msra.mxu0 %v4937_v10  ;;  %1551 = vmatpush1.bf16.msra.mxu1 %v4938_v11 }
 0x227   : > { %1511 = vmatprep.subr.bf16.mxu0 %v4939_v12  ;;  %1552 = vmatprep.subr.bf16.mxu1 %v4940_v13 }
 0x22a   : > { %1512 = vmatpush1.bf16.msra.mxu0 %v4941_v14  ;;  %1553 = vmatpush1.bf16.msra.mxu1 %v4942_v15 }
 0x22b   : > { %1513 = vmatprep.subr.bf16.mxu0 %v4943_v17  ;;  %1554 = vmatprep.subr.bf16.mxu1 %v4944_v47 }
 0x22e   : > { %1514 = vmatpush1.bf16.msra.mxu0 %v4945_v49  ;;  %1555 = vmatpush1.bf16.msra.mxu1 %v4946_v50 }
 0x22f   : > { %1515 = vmatprep.subr.bf16.mxu0 %v4947_v59  ;;  %1556 = vmatprep.subr.bf16.mxu1 %v4948_v1 }
 0x232   : > { %1516 = vmatpush1.bf16.msra.mxu0 %v4949_v5  ;;  %1557 = vmatpush1.bf16.msra.mxu1 %v4950_v58  ;;  %v502_v58 = vsub.s32 3, %v489_v54 }
 0x233   : > { %1584 = vmatprep.subr.bf16.mxu0 %v4951_v62  ;;  %1625 = vmatprep.subr.bf16.mxu1 %v4952_v61  ;;  %v4413_v62 = vrot.slane %v486_v55, %v498_v32 }
 0x234   : > { %v4417_v17 = vrot.slane %v486_v55, %v502_v58 }
 0x235   : > { %4956 = vst [vmem:[#allocation29_spill] sm:$0xff] %v4413_v62 }
 0x236   : > { %4957 = vst [vmem:[#allocation31_spill] sm:$0xff] %v4417_v17 }
 0x2c8   : > { %v1317_v51 = vpop.f32.mrb[4].mxu0  ;;  %v1358_v52 = vpop.f32.mrb[4].mxu1 }
 0x2c9   : > { %v2880_v63 = vadd.f32 %v1317_v51, %v4408_v53  ;;  %v1319_v61 = vpop.f32.mrb[5].mxu0  ;;  %v1360_v56 = vpop.f32.mrb[5].mxu1  ;;  %v2882_v3 = vadd.f32 %v1358_v52, %v4413_v62  ;;  %v2787_v62 = vld [vmem:[%s4011_s12 + $0x30] sm:$0xff]  ;;  %v2788_v53 = vld [vmem:[%s4011_s12 + $0x38] sm:$0xff] }
 0x2ca   : > { %v2881_v5 = vadd.f32 %v1319_v61, %v4410_v35  ;;  %v1321_v1 = vpop.f32.mrb[6].mxu0  ;;  %v1362_v59 = vpop.f32.mrb[6].mxu1  ;;  %v2883_v32 = vadd.f32 %v1360_v56, %v4417_v17 }
 0x2cb   : > { %v1369_v50 = vmul.f32 0.5, %v2880_v63  ;;  %v1322_v49 = vpop.f32.mrb[7].mxu0  ;;  %v1363_v60 = vpop.f32.mrb[7].mxu1  ;;  %v512_v63 = vld [vmem:[#allocation5] sm:$0xff] }
 0x2cc   : > { %v1370_v47 = vmul.f32 0.5, %v2881_v5  ;;  %v1378_v51 = vmul.f32 0.5, %v2883_v32  ;;  %v2785_v60 = vld [vmem:[%s4011_s12 + $0x20] sm:$0xff] }
 0x2cd   : > { %3215 = vtanh.f32 %v1369_v50 }
 0x2ce   : > { %3217 = vtanh.f32 %v1370_v47 }
 0x2cf   : > { %3219 = vtanh.f32 %v2882_v3  ;;  %v2786_v3 = vld [vmem:[%s4011_s12 + $0x28] sm:$0xff] }
 0x2d0   : > { %3221 = vtanh.f32 %v1378_v51 }
 0x2d7   : > { %v3216_v54 = vpop.eup %3215 }
 0x2d8   : > { %v3218_v61 = vpop.eup %3217  ;;  %v1373_v1 = vmul.f32 0.5, %v3216_v54 }
 0x2d9   : > { %v1374_v59 = vmul.f32 0.5, %v3218_v61  ;;  %v3220_v5 = vpop.eup %3219 }
 0x2da   : > { %v1375_v49 = vadd.f32 0.5, %v1373_v1  ;;  %v3222_v47 = vpop.eup %3221 }
 0x2db   : > { %v1376_v50 = vadd.f32 0.5, %v1374_v59  ;;  %v1380_v56 = vmul.f32 0.5, %v3222_v47 }
 0x2dc   : > { %v1383_v52 = vmul.f32 %v3220_v5, %v1375_v49 }
 0x2dd   : > { %v1382_v58 = vmul.f32 %v1376_v50, %v512_v63  ;;  %v1381_v1 = vadd.f32 0.5, %v1380_v56 }
 0x2df   : > { %v4420_v55 = vadd.f32 %v1383_v52, %v1382_v58 }
 0x2e1   : > { %4958 = vst [vmem:[#allocation30_spill] sm:$0xff] %v4420_v55  ;;  %3223 = vtanh.f32 %v4420_v55 }
 0x2e8   : > { %v1431_v32 = vpop.f32.mrb[8].mxu0  ;;  %v1472_v17 = vpop.f32.mrb[8].mxu1 }
 0x2e9   : > { %v1479_v54 = vadd.f32 %v2785_v60, %v1431_v32  ;;  %v1433_v61 = vpop.f32.mrb[9].mxu0  ;;  %v1474_v51 = vpop.f32.mrb[9].mxu1  ;;  %v1481_v55 = vadd.f32 %v2787_v62, %v1472_v17  ;;  %v4960_v32 = vld [vmem:[#allocation50_spill] sm:$0xff]  ;;  %v4963_v62 = vld [vmem:[#allocation53_spill] sm:$0xff] }
 0x2ea   : > { %v1480_v35 = vadd.f32 %v2786_v3, %v1433_v61  ;;  %v1435_v59 = vpop.f32.mrb[10].mxu0  ;;  %v1476_v49 = vpop.f32.mrb[10].mxu1  ;;  %v1482_v56 = vadd.f32 %v2788_v53, %v1474_v51  ;;  %v4959_v3 = vld [vmem:[#allocation49_spill] sm:$0xff]  ;;  %v4962_v61 = vld [vmem:[#allocation52_spill] sm:$0xff] }
 0x2eb   : > { %v3224_v63 = vpop.eup %3223  ;;  %v1483_v5 = vmul.f32 0.5, %v1479_v54  ;;  %v1436_v50 = vpop.f32.mrb[11].mxu0  ;;  %v4961_v54 = vld [vmem:[#allocation51_spill] sm:$0xff]  ;;  %v4966_v53 = vld [vmem:[#allocation56_spill] sm:$0xff] }
 0x2ec   : > { %v1477_v52 = vpop.f32.mrb[11].mxu1  ;;  %v4426_v58 = vmul.f32 %v3224_v63, %v1381_v1  ;;  %v1484_v47 = vmul.f32 0.5, %v1480_v35  ;;  %v1492_v17 = vmul.f32 0.5, %v1482_v56  ;;  %v4964_v35 = vld [vmem:[#allocation54_spill] sm:$0xff]  ;;  %v4965_v1 = vld [vmem:[#allocation55_spill] sm:$0xff]  ;;  %v4967_v63 = vld [vmem:[#allocation57_spill] sm:$0xff] }
 0x2ed   : > { %3225 = vtanh.f32 %v1483_v5  ;;  %v4968_v5 = vld [vmem:[#allocation58_spill] sm:$0xff]  ;;  %v4969_v52 = vld [vmem:[#allocation59_spill] sm:$0xff] }
 0x2ee   : > { %3227 = vtanh.f32 %v1484_v47  ;;  %v1391_v60 = vpack.c.bf16 %v4426_v58, %v4426_v58  ;;  %v4970_v47 = vld [vmem:[#allocation60_spill] sm:$0xff] }
 0x2ef   : > { %3229 = vtanh.f32 %v1481_v55 }
 0x2f0   : > { %1534 = vmatmul.mubr.bf16.vlgmr.msra.gmra.mrb[12].mxu0 %v1391_v60  ;;  %1575 = vmatmul.mubr.bf16.vlgmr.msra.gmra.mrb[12].mxu1 %v1391_v60  ;;  %3231 = vtanh.f32 %v1492_v17  ;;  %v4974_v17 = vld [vmem:[#allocation64_spill] sm:$0xff] }
 0x2f1   : > { %1585 = vmatpush1.bf16.msra.mxu0 %v4959_v3  ;;  %1626 = vmatpush1.bf16.msra.mxu1 %v4960_v32 }
 0x2f2   : > { %1586 = vmatprep.subr.bf16.mxu0 %v4961_v54  ;;  %1627 = vmatprep.subr.bf16.mxu1 %v4962_v61 }
 0x2f3   : > { %1616 = vmatprep.mubr.bf16.mxu0 %v4906_v0  ;;  %1657 = vmatprep.mubr.bf16.mxu1 %v4906_v0 }
 0x2f5   : > { %1587 = vmatpush1.bf16.msra.mxu0 %v4963_v62  ;;  %1628 = vmatpush1.bf16.msra.mxu1 %v4964_v35  ;;  %v4972_v62 = vld [vmem:[#allocation62_spill] sm:$0xff] }
 0x2f6   : > { %1588 = vmatprep.subr.bf16.mxu0 %v4965_v1  ;;  %1629 = vmatprep.subr.bf16.mxu1 %v4966_v53  ;;  %v4971_v53 = vld [vmem:[#allocation61_spill] sm:$0xff] }
 0x2f7   : > { %v3226_v55 = vpop.eup %3225 }
 0x2f8   : > { %v3228_v51 = vpop.eup %3227  ;;  %v1487_v59 = vmul.f32 0.5, %v3226_v55  ;;  %v4973_v55 = vld [vmem:[#allocation63_spill] sm:$0xff] }
 0x2f9   : > { %v1488_v49 = vmul.f32 0.5, %v3228_v51  ;;  %1589 = vmatpush1.bf16.msra.mxu0 %v4967_v63  ;;  %1630 = vmatpush1.bf16.msra.mxu1 %v4968_v5  ;;  %v3230_v60 = vpop.eup %3229 }
 0x2fa   : > { %v1489_v50 = vadd.f32 0.5, %v1487_v59  ;;  %1590 = vmatprep.subr.bf16.mxu0 %v4969_v52  ;;  %1631 = vmatprep.subr.bf16.mxu1 %v4970_v47  ;;  %v4976_v59 = vld [vmem:[#allocation65_spill] sm:$0xff]  ;;  %v4977_v47 = vld [vmem:[#allocation66_spill] sm:$0xff] }
 0x2fb   : > { %v1490_v56 = vadd.f32 0.5, %v1488_v49  ;;  %v4978_v49 = vld [vmem:[#allocation67_spill] sm:$0xff] }
 0x2fc   : > { %v1497_v35 = vmul.f32 %v3230_v60, %v1489_v50  ;;  %v4979_v50 = vld [vmem:[#allocation68_spill] sm:$0xff]  ;;  %v4980_v60 = vld [vmem:[#allocation69_spill] sm:$0xff] }
 0x2fd   : > { %v1496_v1 = vmul.f32 %v1490_v56, %v4334_v57  ;;  %1591 = vmatpush1.bf16.msra.mxu0 %v4971_v53  ;;  %1632 = vmatpush1.bf16.msra.mxu1 %v4972_v62  ;;  %v3232_v57 = vpop.eup %3231  ;;  %v4981_v56 = vld [vmem:[#allocation70_spill] sm:$0xff]  ;;  %v4982_v62 = vld [vmem:[#allocation71_spill] sm:$0xff] }
 0x2fe   : > { %1592 = vmatprep.subr.bf16.mxu0 %v4973_v55  ;;  %1633 = vmatprep.subr.bf16.mxu1 %v4974_v17  ;;  %v1494_v55 = vmul.f32 0.5, %v3232_v57  ;;  %v4985_v17 = vld [vmem:[#allocation74_spill] sm:$0xff] }
 0x2ff   : > { %v4450_v51 = vadd.f32 %v1497_v35, %v1496_v1  ;;  %v4983_v35 = vld [vmem:[#allocation72_spill] sm:$0xff]  ;;  %v4984_v1 = vld [vmem:[#allocation73_spill] sm:$0xff] }
 0x301   : > { %4975 = vst [vmem:[#allocation32_spill] sm:$0xff] %v4450_v51  ;;  %3233 = vtanh.f32 %v4450_v51  ;;  %1593 = vmatpush1.bf16.msra.mxu0 %v4976_v59  ;;  %1634 = vmatpush1.bf16.msra.mxu1 %v4977_v47  ;;  %v1495_v59 = vadd.f32 0.5, %v1494_v55  ;;  %v4986_v47 = vld [vmem:[#allocation75_spill] sm:$0xff]  ;;  %v4988_v51 = vld [vmem:[#allocation77_spill] sm:$0xff]  ;;  %v4473_v55 = vld [vmem:[#allocation11] ss:$16 sps:$4 sm:$0xff]  }
 0x302   : > { %1594 = vmatprep.subr.bf16.mxu0 %v4978_v49  ;;  %1635 = vmatprep.subr.bf16.mxu1 %v4979_v50  ;;  %v4987_v49 = vld [vmem:[#allocation76_spill] sm:$0xff]  ;;  %4992 = vst [vmem:[#allocation34_spill] sm:$0xff] %v4473_v55 }
 0x305   : > { %1595 = vmatpush1.bf16.msra.mxu0 %v4980_v60  ;;  %1636 = vmatpush1.bf16.msra.mxu1 %v4981_v56  ;;  %v4989_v60 = vld [vmem:[#allocation78_spill] sm:$0xff] }
 0x306   : > { %1596 = vmatprep.subr.bf16.mxu0 %v4982_v62  ;;  %1637 = vmatprep.subr.bf16.mxu1 %v4983_v35  ;;  %v4467_v56 = vld [vmem:[#allocation11 + $0x4] ss:$16 sps:$4 sm:$0xff]   ;;  %v4470_v35 = vld [vmem:[#allocation11 + $0xc] ss:$16 sps:$4 sm:$0xff]  }
 0x307   : > { %4990 = vst [vmem:[#allocation33_spill] sm:$0xff] %v4467_v56  ;;  %4991 = vst [vmem:[#allocation35_spill] sm:$0xff] %v4470_v35 }
 0x309   : > { %1597 = vmatpush1.bf16.msra.mxu0 %v4984_v1  ;;  %1638 = vmatpush1.bf16.msra.mxu1 %v4985_v17 }
 0x30a   : > { %1598 = vmatprep.subr.bf16.mxu0 %v4986_v47  ;;  %1639 = vmatprep.subr.bf16.mxu1 %v4987_v49 }
 0x30b   : > { %v3234_v50 = vpop.eup %3233 }
 0x30c   : > { %v1500_v53 = vmul.f32 %v3234_v50, %v1495_v59  ;;  %v4476_v59 = vld [vmem:[#allocation11 + $0x8] ss:$16 sps:$4 sm:$0xff]   ;;  %v4479_v50 = vld [vmem:[#allocation11 + $0x24] ss:$16 sps:$4 sm:$0xff]  }
 0x30d   : > { %1599 = vmatpush1.bf16.msra.mxu0 %v4988_v51  ;;  %1640 = vmatpush1.bf16.msra.mxu1 %v4989_v60  ;;  %4993 = vst [vmem:[#allocation36_spill] sm:$0xff] %v4476_v59  ;;  %4994 = vst [vmem:[#allocation37_spill] sm:$0xff] %v4479_v50 }
 0x30e   : > { %v1583_v57 = vpack.c.bf16 %v1500_v53, %v1500_v53  ;;  %1699 = vmatprep.subr.bf16.mxu0 %v4467_v56  ;;  %1740 = vmatprep.subr.bf16.mxu1 %v4470_v35  ;;  %v4482_v53 = vld [vmem:[#allocation11 + $0x2c] ss:$16 sps:$4 sm:$0xff]   ;;  %v4487_v35 = vld [vmem:[#allocation11 + $0x20] ss:$16 sps:$4 sm:$0xff]   ;;  %v4502_v56 = vld [vmem:[#allocation11 + $0x48] ss:$16 sps:$4 sm:$0xff]  }
 0x30f   : > { %4995 = vst [vmem:[#allocation39_spill] sm:$0xff] %v4482_v53  ;;  %4996 = vst [vmem:[#allocation49_spill] sm:$0xff] %v4487_v35 }
 0x310   : > { %1617 = vmatmul.mubr.bf16.vlgmr.msra.gmra.mrb[12].mxu0 %v1583_v57  ;;  %1658 = vmatmul.mubr.bf16.vlgmr.msra.gmra.mrb[12].mxu1 %v1583_v57 }
 0x311   : > { %1700 = vmatpush1.bf16.msra.mxu0 %v4473_v55  ;;  %1741 = vmatpush1.bf16.msra.mxu1 %v4476_v59  ;;  %v4490_v55 = vld [vmem:[#allocation11 + $0x28] ss:$16 sps:$4 sm:$0xff]   ;;  %v4493_v59 = vld [vmem:[#allocation11 + $0x44] ss:$16 sps:$4 sm:$0xff]  }
 0x312   : > { %1701 = vmatprep.subr.bf16.mxu0 %v4479_v50  ;;  %1742 = vmatprep.subr.bf16.mxu1 %v4482_v53  ;;  %4997 = vst [vmem:[#allocation50_spill] sm:$0xff] %v4490_v55  ;;  %v4496_v50 = vld [vmem:[#allocation11 + $0x4c] ss:$16 sps:$4 sm:$0xff]   ;;  %v4499_v53 = vld [vmem:[#allocation11 + $0x40] ss:$16 sps:$4 sm:$0xff]  }
 0x313   : > { %1731 = vmatprep.mubr.bf16.mxu0 %v4906_v0  ;;  %1772 = vmatprep.mubr.bf16.mxu1 %v4906_v0  ;;  %4998 = vst [vmem:[#allocation51_spill] sm:$0xff] %v4496_v50 }
 0x315   : > { %1702 = vmatpush1.bf16.msra.mxu0 %v4487_v35  ;;  %1743 = vmatpush1.bf16.msra.mxu1 %v4490_v55  ;;  %v4505_v35 = vld [vmem:[#allocation11 + $0x64] ss:$16 sps:$4 sm:$0xff]   ;;  %v4509_v55 = vld [vmem:[#allocation11 + $0x60] ss:$16 sps:$4 sm:$0xff]  }
 0x316   : > { %1703 = vmatprep.subr.bf16.mxu0 %v4493_v59  ;;  %1744 = vmatprep.subr.bf16.mxu1 %v4496_v50  ;;  %v4513_v50 = vld [vmem:[#allocation11 + $0x84] ss:$16 sps:$4 sm:$0xff]  }
 0x319   : > { %1704 = vmatpush1.bf16.msra.mxu0 %v4499_v53  ;;  %1745 = vmatpush1.bf16.msra.mxu1 %v4502_v56 }
 0x31a   : > { %1705 = vmatprep.subr.bf16.mxu0 %v4505_v35  ;;  %1746 = vmatprep.subr.bf16.mxu1 %v4075_v16  ;;  %v4999_v16 = vld [vmem:[#allocation38_spill] sm:$0xff] }
 0x31d   : > { %1706 = vmatpush1.bf16.msra.mxu0 %v4509_v55  ;;  %1747 = vmatpush1.bf16.msra.mxu1 %v4083_v19  ;;  %v5001_v19 = vld [vmem:[#allocation41_spill] sm:$0xff] }
 0x31e   : > { %1707 = vmatprep.subr.bf16.mxu0 %v4513_v50  ;;  %1748 = vmatprep.subr.bf16.mxu1 %v4087_v20  ;;  %v5002_v20 = vld [vmem:[#allocation42_spill] sm:$0xff] }
 0x321   : > { %1708 = vmatpush1.bf16.msra.mxu0 %v4081_v18  ;;  %1749 = vmatpush1.bf16.msra.mxu1 %v4093_v22  ;;  %v5000_v18 = vld [vmem:[#allocation40_spill] sm:$0xff] }
 0x322   : > { %1709 = vmatprep.subr.bf16.mxu0 %v4090_v21  ;;  %1750 = vmatprep.subr.bf16.mxu1 %v4099_v24  ;;  %v5003_v21 = vld [vmem:[#allocation43_spill] sm:$0xff]  ;;  %v5004_v22 = vld [vmem:[#allocation44_spill] sm:$0xff]  ;;  %v5006_v24 = vld [vmem:[#allocation46_spill] sm:$0xff] }
 0x325   : > { %1710 = vmatpush1.bf16.msra.mxu0 %v4097_v23  ;;  %1751 = vmatpush1.bf16.msra.mxu1 %v4105_v26  ;;  %v5005_v23 = vld [vmem:[#allocation45_spill] sm:$0xff]  ;;  %v5008_v26 = vld [vmem:[#allocation48_spill] sm:$0xff] }
 0x326   : > { %1711 = vmatprep.subr.bf16.mxu0 %v4102_v25  ;;  %1752 = vmatprep.subr.bf16.mxu1 %v4111_v28  ;;  %v5007_v25 = vld [vmem:[#allocation47_spill] sm:$0xff] }
 0x329   : > { %1712 = vmatpush1.bf16.msra.mxu0 %v4109_v27  ;;  %1753 = vmatpush1.bf16.msra.mxu1 %v4119_v31 }
 0x32a   : > { %1713 = vmatprep.subr.bf16.mxu0 %v4114_v29  ;;  %1754 = vmatprep.subr.bf16.mxu1 %v4123_v33  ;;  %v5009_v29 = vld [vmem:[#allocation27_spill] sm:$0xff] }
 0x32d   : > { %1714 = vmatpush1.bf16.msra.mxu0 %v4117_v30  ;;  %1755 = vmatpush1.bf16.msra.mxu1 %v4129_v36 }
 0x32e   : > { %1803 = vmatprep.subr.bf16.mxu0 %v4126_v34  ;;  %1844 = vmatprep.subr.bf16.mxu1 %v4133_v37  ;;  %v5010_v34 = vld [vmem:[#allocation28_spill] sm:$0xff] }
 0x330   : > { %1732 = vmatmul.mubr.bf16.vlgmr.msra.gmra.mrb[16].mxu0 %v1583_v57  ;;  %1773 = vmatmul.mubr.bf16.vlgmr.msra.gmra.mrb[16].mxu1 %v1583_v57 }
 0x331   : > { %1804 = vmatpush1.bf16.msra.mxu0 %v4135_v38  ;;  %1845 = vmatpush1.bf16.msra.mxu1 %v4141_v40 }
 0x332   : > { %1805 = vmatprep.subr.bf16.mxu0 %v4138_v39  ;;  %1846 = vmatprep.subr.bf16.mxu1 %v4143_v41 }
 0x333   : > { %1835 = vmatprep.mubr.bf16.mxu0 %v4906_v0  ;;  %1876 = vmatprep.mubr.bf16.mxu1 %v4906_v0 }
 0x335   : > { %1806 = vmatpush1.bf16.msra.mxu0 %v4147_v42  ;;  %1847 = vmatpush1.bf16.msra.mxu1 %v4153_v44 }
 0x336   : > { %1807 = vmatprep.subr.bf16.mxu0 %v4150_v43  ;;  %1848 = vmatprep.subr.bf16.mxu1 %v4156_v45  ;;  %v5011_v43 = vld [vmem:[#allocation29_spill] sm:$0xff]  ;;  %v5012_v45 = vld [vmem:[#allocation31_spill] sm:$0xff] }
 0x339   : > { %1808 = vmatpush1.bf16.msra.mxu0 %v4161_v46  ;;  %1849 = vmatpush1.bf16.msra.mxu1 %v4166_v48 }
 0x33a   : > { %1809 = vmatprep.subr.bf16.mxu0 %v4931_v2  ;;  %1850 = vmatprep.subr.bf16.mxu1 %v4932_v4 }
 0x33d   : > { %1810 = vmatpush1.bf16.msra.mxu0 %v4933_v6  ;;  %1851 = vmatpush1.bf16.msra.mxu1 %v4934_v7 }
 0x33e   : > { %1811 = vmatprep.subr.bf16.mxu0 %v4935_v8  ;;  %1852 = vmatprep.subr.bf16.mxu1 %v4936_v9 }
 0x341   : > { %1812 = vmatpush1.bf16.msra.mxu0 %v4937_v10  ;;  %1853 = vmatpush1.bf16.msra.mxu1 %v4938_v11 }
 0x342   : > { %1813 = vmatprep.subr.bf16.mxu0 %v4939_v12  ;;  %1854 = vmatprep.subr.bf16.mxu1 %v4940_v13  ;;  %v5013_v12 = vld [vmem:[#allocation30_spill] sm:$0xff] }
 0x345   : > { %1814 = vmatpush1.bf16.msra.mxu0 %v4941_v14  ;;  %1855 = vmatpush1.bf16.msra.mxu1 %v4942_v15 }
 0x346   : > { %1815 = vmatprep.subr.bf16.mxu0 %v4999_v16  ;;  %1856 = vmatprep.subr.bf16.mxu1 %v5000_v18  ;;  %v2789_v16 = vld [vmem:[%s4011_s12 + $0x40] sm:$0xff]  ;;  %v1388_v18 = vstv %s1387_s4 }
 0x349   : > { %1816 = vmatpush1.bf16.msra.mxu0 %v5001_v19  ;;  %1857 = vmatpush1.bf16.msra.mxu1 %v5002_v20  ;;  %v2790_v19 = vld [vmem:[%s4011_s12 + $0x48] sm:$0xff] }
 0x34a   : > { %1817 = vmatprep.subr.bf16.mxu0 %v5003_v21  ;;  %1858 = vmatprep.subr.bf16.mxu1 %v5004_v22 }
 0x34d   : > { %1818 = vmatpush1.bf16.msra.mxu0 %v5005_v23  ;;  %1859 = vmatpush1.bf16.msra.mxu1 %v5006_v24 }
 0x34e   : > { %1886 = vmatprep.subr.bf16.mxu0 %v5007_v25  ;;  %1927 = vmatprep.subr.bf16.mxu1 %v5008_v26  ;;  %v1389_v25 = vmul.f32 %v1388_v18, %v4426_v58  ;;  %v2792_v58 = vld [vmem:[%s4011_s12 + $0x58] sm:$0xff]  ;;  %v5019_v18 = vld [vmem:[#allocation32_spill] sm:$0xff] }
 0x3e3   : > { %v1618_v27 = vpop.f32.mrb[12].mxu0  ;;  %v1659_v28 = vpop.f32.mrb[12].mxu1 }
 0x3e4   : > { %v2884_v30 = vadd.f32 %v1618_v27, %v5009_v29  ;;  %v1620_v31 = vpop.f32.mrb[13].mxu0  ;;  %v1661_v33 = vpop.f32.mrb[13].mxu1  ;;  %v2886_v44 = vadd.f32 %v1659_v28, %v5011_v43  ;;  %v2791_v27 = vld [vmem:[%s4011_s12 + $0x50] sm:$0xff] }
 0x3e5   : > { %v2885_v36 = vadd.f32 %v1620_v31, %v5010_v34  ;;  %v1622_v37 = vpop.f32.mrb[14].mxu0  ;;  %v1663_v38 = vpop.f32.mrb[14].mxu1  ;;  %v2887_v46 = vadd.f32 %v1661_v33, %v5012_v45 }
 0x3e6   : > { %v1670_v39 = vmul.f32 0.5, %v2884_v30  ;;  %v1623_v40 = vpop.f32.mrb[15].mxu0  ;;  %v1664_v41 = vpop.f32.mrb[15].mxu1  ;;  %v1690_v37 = vstv %s1689_s6 }
 0x3e7   : > { %v1671_v42 = vmul.f32 0.5, %v2885_v36  ;;  %v1679_v48 = vmul.f32 0.5, %v2887_v46  ;;  %v513_v36 = vld [vmem:[#allocation6] sm:$0xff] }
 0x3e8   : > { %3235 = vtanh.f32 %v1670_v39  ;;  %v1390_v46 = vadd.f32 %v1389_v25, %v513_v36  ;;  %v5027_v25 = vld [vmem:[#allocation68_spill] sm:$0xff] }
 0x3e9   : > { %3237 = vtanh.f32 %v1671_v42 }
 0x3ea   : > { %3239 = vtanh.f32 %v2886_v44 }
 0x3eb   : > { %3241 = vtanh.f32 %v1679_v48 }
 0x3f2   : > { %v3236_v2 = vpop.eup %3235 }
 0x3f3   : > { %v3238_v4 = vpop.eup %3237  ;;  %v1674_v6 = vmul.f32 0.5, %v3236_v2 }
 0x3f4   : > { %v1675_v7 = vmul.f32 0.5, %v3238_v4  ;;  %v3240_v9 = vpop.eup %3239 }
 0x3f5   : > { %v1676_v8 = vadd.f32 0.5, %v1674_v6  ;;  %v3242_v15 = vpop.eup %3241 }
 0x3f6   : > { %v1677_v10 = vadd.f32 0.5, %v1675_v7  ;;  %v1681_v57 = vmul.f32 0.5, %v3242_v15 }
 0x3f7   : > { %v1684_v11 = vmul.f32 %v3240_v9, %v1676_v8  ;;  %v5014_v8 = vld [vmem:[#allocation53_spill] sm:$0xff]  ;;  %v5015_v9 = vld [vmem:[#allocation54_spill] sm:$0xff] }
 0x3f8   : > { %v1683_v13 = vmul.f32 %v1677_v10, %v5013_v12  ;;  %v1682_v26 = vadd.f32 0.5, %v1681_v57  ;;  %v5016_v10 = vld [vmem:[#allocation55_spill] sm:$0xff] }
 0x3fa   : > { %v4576_v14 = vadd.f32 %v1684_v11, %v1683_v13  ;;  %v5017_v11 = vld [vmem:[#allocation56_spill] sm:$0xff] }
 0x3fc   : > { %3243 = vtanh.f32 %v4576_v14 }
 0x403   : > { %v1733_v20 = vpop.f32.mrb[16].mxu0  ;;  %v1774_v21 = vpop.f32.mrb[16].mxu1 }
 0x404   : > { %v1781_v22 = vadd.f32 %v2789_v16, %v1733_v20  ;;  %v1735_v23 = vpop.f32.mrb[17].mxu0  ;;  %v1776_v24 = vpop.f32.mrb[17].mxu1  ;;  %v1783_v44 = vadd.f32 %v2791_v27, %v1774_v21  ;;  %v5020_v20 = vld [vmem:[#allocation61_spill] sm:$0xff]  ;;  %v5021_v21 = vld [vmem:[#allocation62_spill] sm:$0xff] }
 0x405   : > { %v1782_v28 = vadd.f32 %v2790_v19, %v1735_v23  ;;  %v1737_v30 = vpop.f32.mrb[18].mxu0  ;;  %v1778_v31 = vpop.f32.mrb[18].mxu1  ;;  %v1784_v6 = vadd.f32 %v2792_v58, %v1776_v24  ;;  %v5023_v23 = vld [vmem:[#allocation64_spill] sm:$0xff]  ;;  %v5026_v24 = vld [vmem:[#allocation67_spill] sm:$0xff]  ;;  %v5028_v27 = vld [vmem:[#allocation69_spill] sm:$0xff] }
 0x406   : > { %v3244_v33 = vpop.eup %3243  ;;  %v1785_v38 = vmul.f32 0.5, %v1781_v22  ;;  %v1738_v39 = vpop.f32.mrb[19].mxu0  ;;  %v5022_v22 = vld [vmem:[#allocation63_spill] sm:$0xff]  ;;  %v5030_v31 = vld [vmem:[#allocation72_spill] sm:$0xff] }
 0x407   : > { %v1779_v40 = vpop.f32.mrb[19].mxu1  ;;  %v1687_v41 = vmul.f32 %v3244_v33, %v1682_v26  ;;  %v1786_v42 = vmul.f32 0.5, %v1782_v28  ;;  %v1794_v7 = vmul.f32 0.5, %v1784_v6  ;;  %v5029_v28 = vld [vmem:[#allocation70_spill] sm:$0xff]  ;;  %v5031_v39 = vld [vmem:[#allocation33_spill] sm:$0xff] }
 0x408   : > { %3245 = vtanh.f32 %v1785_v38  ;;  %v5039_v40 = vld [vmem:[#allocation51_spill] sm:$0xff]  ;;  %v3309_v58 = vld [vmem:[#allocation11 + $0xc4] ss:$16 sps:$4 sm:$0xff]  }
 0x409   : > { %v1691_v48 = vmul.f32 %v1690_v37, %v1687_v41  ;;  %3247 = vtanh.f32 %v1786_v42  ;;  %v1693_v2 = vpack.c.bf16 %v1687_v41, %v1687_v41  ;;  %v3300_v41 = vld [vmem:[#allocation11 + $0x6c] ss:$16 sps:$4 sm:$0xff]   ;;  %v3301_v42 = vld [vmem:[#allocation11 + $0x68] ss:$16 sps:$4 sm:$0xff]   ;;  %v3313_v6 = vld [vmem:[#allocation11 + $0xe4] ss:$16 sps:$4 sm:$0xff]  }
 0x40a   : > { %3249 = vtanh.f32 %v1783_v44  ;;  %v3302_v44 = vld [vmem:[#allocation11 + $0x8c] ss:$16 sps:$4 sm:$0xff]  }
 0x40b   : > { %v4585_v4 = vadd.f32 %v1691_v48, %v1390_v46  ;;  %1836 = vmatmul.mubr.bf16.vlgmr.msra.gmra.mrb[20].mxu0 %v1693_v2  ;;  %1877 = vmatmul.mubr.bf16.vlgmr.msra.gmra.mrb[20].mxu1 %v1693_v2  ;;  %3251 = vtanh.f32 %v1794_v7  ;;  %v3303_v46 = vld [vmem:[#allocation11 + $0x80] ss:$16 sps:$4 sm:$0xff]   ;;  %v3305_v48 = vld [vmem:[#allocation11 + $0xa4] ss:$16 sps:$4 sm:$0xff]   ;;  %v3314_v7 = vld [vmem:[#allocation11 + $0xec] ss:$16 sps:$4 sm:$0xff]  }
 0x40c   : > { %1887 = vmatpush1.bf16.msra.mxu0 %v4959_v3  ;;  %1928 = vmatpush1.bf16.msra.mxu1 %v4960_v32  ;;  %v3311_v2 = vld [vmem:[#allocation11 + $0xc0] ss:$16 sps:$4 sm:$0xff]  }
 0x40d   : > { %1888 = vmatprep.subr.bf16.mxu0 %v4961_v54  ;;  %1929 = vmatprep.subr.bf16.mxu1 %v4962_v61  ;;  %v5018_v61 = vld [vmem:[#allocation60_spill] sm:$0xff] }
 0x40e   : > { %1918 = vmatprep.mubr.bf16.mxu0 %v4906_v0  ;;  %1959 = vmatprep.mubr.bf16.mxu1 %v4906_v0 }
 0x410   : > { %1889 = vmatpush1.bf16.msra.mxu0 %v5014_v8  ;;  %1930 = vmatpush1.bf16.msra.mxu1 %v5015_v9  ;;  %v3315_v8 = vld [vmem:[#allocation11 + $0xe0] ss:$16 sps:$4 sm:$0xff]   ;;  %v3316_v9 = vld [vmem:[#allocation11 + $0xe8] ss:$16 sps:$4 sm:$0xff]  }
 0x411   : > { %1890 = vmatprep.subr.bf16.mxu0 %v5016_v10  ;;  %1931 = vmatprep.subr.bf16.mxu1 %v5017_v11  ;;  %v3317_v10 = vld [vmem:[#allocation14 + $0x4] ss:$16 sps:$4 sm:$0xff]   ;;  %v3318_v11 = vld [vmem:[#allocation14 + $0xc] ss:$16 sps:$4 sm:$0xff]  }
 0x412   : > { %v3246_v3 = vpop.eup %3245 }
 0x413   : > { %v3248_v12 = vpop.eup %3247  ;;  %v1789_v32 = vmul.f32 0.5, %v3246_v3  ;;  %v3319_v3 = vld [vmem:[#allocation14] ss:$16 sps:$4 sm:$0xff]  }
 0x414   : > { %v1790_v13 = vmul.f32 0.5, %v3248_v12  ;;  %1891 = vmatpush1.bf16.msra.mxu0 %v4967_v63  ;;  %1932 = vmatpush1.bf16.msra.mxu1 %v4968_v5  ;;  %v3250_v15 = vpop.eup %3249  ;;  %v5024_v5 = vld [vmem:[#allocation65_spill] sm:$0xff] }
 0x415   : > { %v1791_v54 = vadd.f32 0.5, %v1789_v32  ;;  %1892 = vmatprep.subr.bf16.mxu0 %v4969_v52  ;;  %1933 = vmatprep.subr.bf16.mxu1 %v5018_v61  ;;  %v5025_v52 = vld [vmem:[#allocation66_spill] sm:$0xff]  ;;  %v3252_v26 = vpop.eup %3251  ;;  %v3320_v12 = vld [vmem:[#allocation14 + $0x8] ss:$16 sps:$4 sm:$0xff]  }
 0x416   : > { %v1792_v57 = vadd.f32 0.5, %v1790_v13  ;;  %v1796_v30 = vmul.f32 0.5, %v3252_v26  ;;  %v3321_v32 = vld [vmem:[#allocation14 + $0x24] ss:$16 sps:$4 sm:$0xff]   ;;  %v3322_v13 = vld [vmem:[#allocation14 + $0x2c] ss:$16 sps:$4 sm:$0xff]  }
 0x417   : > { %v1799_v16 = vmul.f32 %v3250_v15, %v1791_v54  ;;  %v3323_v54 = vld [vmem:[#allocation14 + $0x20] ss:$16 sps:$4 sm:$0xff]   ;;  %v3324_v61 = vld [vmem:[#allocation14 + $0x28] ss:$16 sps:$4 sm:$0xff]   ;;  %v3325_v15 = vld [vmem:[#allocation14 + $0x44] ss:$16 sps:$4 sm:$0xff]  }
 0x418   : > { %v1798_v19 = vmul.f32 %v1792_v57, %v5019_v18  ;;  %1893 = vmatpush1.bf16.msra.mxu0 %v5020_v20  ;;  %1934 = vmatpush1.bf16.msra.mxu1 %v5021_v21  ;;  %v1797_v33 = vadd.f32 0.5, %v1796_v30  ;;  %v3326_v57 = vld [vmem:[#allocation14 + $0x4c] ss:$16 sps:$4 sm:$0xff]   ;;  %v3328_v18 = vld [vmem:[#allocation14 + $0x48] ss:$16 sps:$4 sm:$0xff]  }
 0x419   : > { %1894 = vmatprep.subr.bf16.mxu0 %v5022_v22  ;;  %1935 = vmatprep.subr.bf16.mxu1 %v5023_v23  ;;  %v3330_v20 = vld [vmem:[#allocation14 + $0x6c] ss:$16 sps:$4 sm:$0xff]   ;;  %v3331_v21 = vld [vmem:[#allocation14 + $0x60] ss:$16 sps:$4 sm:$0xff]   ;;  %v3332_v22 = vld [vmem:[#allocation14 + $0x68] ss:$16 sps:$4 sm:$0xff]  }
 0x41a   : > { %v4606_v63 = vadd.f32 %v1799_v16, %v1798_v19  ;;  %v3327_v16 = vld [vmem:[#allocation14 + $0x40] ss:$16 sps:$4 sm:$0xff]   ;;  %v3329_v19 = vld [vmem:[#allocation14 + $0x64] ss:$16 sps:$4 sm:$0xff]   ;;  %v3338_v26 = vld [vmem:[#allocation14 + $0xac] ss:$16 sps:$4 sm:$0xff]  }
 0x41b   : > { %v3333_v23 = vld [vmem:[#allocation14 + $0x84] ss:$16 sps:$4 sm:$0xff]  }
 0x41c   : > { %3253 = vtanh.f32 %v4606_v63  ;;  %1895 = vmatpush1.bf16.msra.mxu0 %v5024_v5  ;;  %1936 = vmatpush1.bf16.msra.mxu1 %v5025_v52  ;;  %v3334_v5 = vld [vmem:[#allocation14 + $0x8c] ss:$16 sps:$4 sm:$0xff]   ;;  %v3335_v52 = vld [vmem:[#allocation14 + $0x80] ss:$16 sps:$4 sm:$0xff]   ;;  %v3341_v30 = vld [vmem:[#allocation14 + $0xc4] ss:$16 sps:$4 sm:$0xff]  }
 0x41d   : > { %1896 = vmatprep.subr.bf16.mxu0 %v5026_v24  ;;  %1937 = vmatprep.subr.bf16.mxu1 %v5027_v25  ;;  %v3336_v24 = vld [vmem:[#allocation14 + $0x88] ss:$16 sps:$4 sm:$0xff]   ;;  %v3337_v25 = vld [vmem:[#allocation14 + $0xa4] ss:$16 sps:$4 sm:$0xff]  }
 0x420   : > { %1897 = vmatpush1.bf16.msra.mxu0 %v5028_v27  ;;  %1938 = vmatpush1.bf16.msra.mxu1 %v5029_v28  ;;  %v3339_v27 = vld [vmem:[#allocation14 + $0xa0] ss:$16 sps:$4 sm:$0xff]   ;;  %v3340_v28 = vld [vmem:[#allocation14 + $0xa8] ss:$16 sps:$4 sm:$0xff]  }
 0x421   : > { %1898 = vmatprep.subr.bf16.mxu0 %v4982_v62  ;;  %1939 = vmatprep.subr.bf16.mxu1 %v5030_v31  ;;  %v5032_v62 = vld [vmem:[#allocation35_spill] sm:$0xff] }
 0x422   : > { %v3342_v31 = vld [vmem:[#allocation14 + $0xcc] ss:$16 sps:$4 sm:$0xff]  }
 0x424   : > { %1899 = vmatpush1.bf16.msra.mxu0 %v4984_v1  ;;  %1940 = vmatpush1.bf16.msra.mxu1 %v4985_v17  ;;  %v5033_v1 = vld [vmem:[#allocation34_spill] sm:$0xff]  ;;  %v5034_v17 = vld [vmem:[#allocation36_spill] sm:$0xff] }
 0x425   : > { %1900 = vmatprep.subr.bf16.mxu0 %v4986_v47  ;;  %1941 = vmatprep.subr.bf16.mxu1 %v4987_v49  ;;  %v5035_v47 = vld [vmem:[#allocation37_spill] sm:$0xff]  ;;  %v5036_v49 = vld [vmem:[#allocation39_spill] sm:$0xff] }
 0x426   : > { %v3254_v36 = vpop.eup %3253 }
 0x427   : > { %v1802_v37 = vmul.f32 %v3254_v36, %v1797_v33  ;;  %v3343_v33 = vld [vmem:[#allocation14 + $0xc0] ss:$16 sps:$4 sm:$0xff]   ;;  %v3344_v36 = vld [vmem:[#allocation14 + $0xc8] ss:$16 sps:$4 sm:$0xff]  }
 0x428   : > { %1901 = vmatpush1.bf16.msra.mxu0 %v4988_v51  ;;  %1942 = vmatpush1.bf16.msra.mxu1 %v4989_v60  ;;  %v5037_v51 = vld [vmem:[#allocation49_spill] sm:$0xff]  ;;  %v5038_v60 = vld [vmem:[#allocation50_spill] sm:$0xff] }
 0x429   : > { %v1885_v38 = vpack.c.bf16 %v1802_v37, %v1802_v37  ;;  %2001 = vmatprep.subr.bf16.mxu0 %v5031_v39  ;;  %2042 = vmatprep.subr.bf16.mxu1 %v5032_v62  ;;  %v3345_v37 = vld [vmem:[#allocation14 + $0xe4] ss:$16 sps:$4 sm:$0xff]   ;;  %v3347_v39 = vld [vmem:[#allocation14 + $0xe0] ss:$16 sps:$4 sm:$0xff]   ;;  %v3348_v62 = vld [vmem:[#allocation14 + $0xe8] ss:$16 sps:$4 sm:$0xff]  }
 0x42b   : > { %1919 = vmatmul.mubr.bf16.vlgmr.msra.gmra.mrb[20].mxu0 %v1885_v38  ;;  %1960 = vmatmul.mubr.bf16.vlgmr.msra.gmra.mrb[20].mxu1 %v1885_v38 }
 0x42c   : > { %2002 = vmatpush1.bf16.msra.mxu0 %v5033_v1  ;;  %2043 = vmatpush1.bf16.msra.mxu1 %v5034_v17  ;;  %v3349_v1 = vld [vmem:[#allocation13 + $0x4] ss:$16 sps:$4 sm:$0xff]   ;;  %v3350_v17 = vld [vmem:[#allocation13 + $0xc] ss:$16 sps:$4 sm:$0xff]  }
 0x42d   : > { %2003 = vmatprep.subr.bf16.mxu0 %v5035_v47  ;;  %2044 = vmatprep.subr.bf16.mxu1 %v5036_v49 }
 0x42e   : > { %2033 = vmatprep.mubr.bf16.mxu0 %v4906_v0  ;;  %2074 = vmatprep.mubr.bf16.mxu1 %v4906_v0 }
 0x430   : > { %2004 = vmatpush1.bf16.msra.mxu0 %v5037_v51  ;;  %2045 = vmatpush1.bf16.msra.mxu1 %v5038_v60 }
 0x431   : > { %2005 = vmatprep.subr.bf16.mxu0 %v4493_v59  ;;  %2046 = vmatprep.subr.bf16.mxu1 %v5039_v40  ;;  %v3304_v59 = vld [vmem:[#allocation11 + $0x88] ss:$16 sps:$4 sm:$0xff]  }
 0x434   : > { %2006 = vmatpush1.bf16.msra.mxu0 %v4499_v53  ;;  %2047 = vmatpush1.bf16.msra.mxu1 %v4502_v56  ;;  %v3306_v53 = vld [vmem:[#allocation11 + $0xac] ss:$16 sps:$4 sm:$0xff]   ;;  %v3307_v56 = vld [vmem:[#allocation11 + $0xa0] ss:$16 sps:$4 sm:$0xff]  }
 0x435   : > { %2007 = vmatprep.subr.bf16.mxu0 %v4505_v35  ;;  %2048 = vmatprep.subr.bf16.mxu1 %v3300_v41  ;;  %v3308_v35 = vld [vmem:[#allocation11 + $0xa8] ss:$16 sps:$4 sm:$0xff]  }
 0x438   : > { %2008 = vmatpush1.bf16.msra.mxu0 %v4509_v55  ;;  %2049 = vmatpush1.bf16.msra.mxu1 %v3301_v42  ;;  %v3310_v55 = vld [vmem:[#allocation11 + $0xcc] ss:$16 sps:$4 sm:$0xff]  }
 0x439   : > { %2009 = vmatprep.subr.bf16.mxu0 %v4513_v50  ;;  %2050 = vmatprep.subr.bf16.mxu1 %v3302_v44  ;;  %v3312_v50 = vld [vmem:[#allocation11 + $0xc8] ss:$16 sps:$4 sm:$0xff]  }
 0x43c   : > { %2010 = vmatpush1.bf16.msra.mxu0 %v3303_v46  ;;  %2051 = vmatpush1.bf16.msra.mxu1 %v3304_v59 }
 0x43d   : > { %2011 = vmatprep.subr.bf16.mxu0 %v3305_v48  ;;  %2052 = vmatprep.subr.bf16.mxu1 %v3306_v53 }
 0x440   : > { %2012 = vmatpush1.bf16.msra.mxu0 %v3307_v56  ;;  %2053 = vmatpush1.bf16.msra.mxu1 %v3308_v35 }
 0x441   : > { %2013 = vmatprep.subr.bf16.mxu0 %v3309_v58  ;;  %2054 = vmatprep.subr.bf16.mxu1 %v3310_v55 }
 0x444   : > { %2014 = vmatpush1.bf16.msra.mxu0 %v3311_v2  ;;  %2055 = vmatpush1.bf16.msra.mxu1 %v3312_v50 }
 0x445   : > { %2015 = vmatprep.subr.bf16.mxu0 %v3313_v6  ;;  %2056 = vmatprep.subr.bf16.mxu1 %v3314_v7 }
 0x448   : > { %2016 = vmatpush1.bf16.msra.mxu0 %v3315_v8  ;;  %2057 = vmatpush1.bf16.msra.mxu1 %v3316_v9 }
 0x449   : > { %2105 = vmatprep.subr.bf16.mxu0 %v3317_v10  ;;  %2146 = vmatprep.subr.bf16.mxu1 %v3318_v11 }
 0x44b   : > { %2034 = vmatmul.mubr.bf16.vlgmr.msra.gmra.mrb[24].mxu0 %v1885_v38  ;;  %2075 = vmatmul.mubr.bf16.vlgmr.msra.gmra.mrb[24].mxu1 %v1885_v38  ;;  %v3346_v38 = vld [vmem:[#allocation14 + $0xec] ss:$16 sps:$4 sm:$0xff]  }
 0x44c   : > { %2106 = vmatpush1.bf16.msra.mxu0 %v3319_v3  ;;  %2147 = vmatpush1.bf16.msra.mxu1 %v3320_v12 }
 0x44d   : > { %2107 = vmatprep.subr.bf16.mxu0 %v3321_v32  ;;  %2148 = vmatprep.subr.bf16.mxu1 %v3322_v13  ;;  %v2793_v13 = vld [vmem:[%s4011_s12 + $0x60] sm:$0xff] }
 0x44e   : > { %2137 = vmatprep.mubr.bf16.mxu0 %v4906_v0  ;;  %2178 = vmatprep.mubr.bf16.mxu1 %v4906_v0 }
 0x450   : > { %2108 = vmatpush1.bf16.msra.mxu0 %v3323_v54  ;;  %2149 = vmatpush1.bf16.msra.mxu1 %v3324_v61  ;;  %v2794_v54 = vld [vmem:[%s4011_s12 + $0x68] sm:$0xff] }
 0x451   : > { %2109 = vmatprep.subr.bf16.mxu0 %v3325_v15  ;;  %2150 = vmatprep.subr.bf16.mxu1 %v3326_v57 }
 0x454   : > { %2110 = vmatpush1.bf16.msra.mxu0 %v3327_v16  ;;  %2151 = vmatpush1.bf16.msra.mxu1 %v3328_v18 }
 0x455   : > { %2111 = vmatprep.subr.bf16.mxu0 %v3329_v19  ;;  %2152 = vmatprep.subr.bf16.mxu1 %v3330_v20  ;;  %v2795_v20 = vld [vmem:[%s4011_s12 + $0x70] sm:$0xff] }
 0x458   : > { %2112 = vmatpush1.bf16.msra.mxu0 %v3331_v21  ;;  %2153 = vmatpush1.bf16.msra.mxu1 %v3332_v22 }
 0x459   : > { %2113 = vmatprep.subr.bf16.mxu0 %v3333_v23  ;;  %2154 = vmatprep.subr.bf16.mxu1 %v3334_v5  ;;  %v1992_v5 = vstv %s1991_s25 }
 0x45c   : > { %2114 = vmatpush1.bf16.msra.mxu0 %v3335_v52  ;;  %2155 = vmatpush1.bf16.msra.mxu1 %v3336_v24 }
 0x45d   : > { %2115 = vmatprep.subr.bf16.mxu0 %v3337_v25  ;;  %2156 = vmatprep.subr.bf16.mxu1 %v3338_v26 }
 0x460   : > { %2116 = vmatpush1.bf16.msra.mxu0 %v3339_v27  ;;  %2157 = vmatpush1.bf16.msra.mxu1 %v3340_v28 }
 0x461   : > { %2117 = vmatprep.subr.bf16.mxu0 %v3341_v30  ;;  %2158 = vmatprep.subr.bf16.mxu1 %v3342_v31  ;;  %v2796_v31 = vld [vmem:[%s4011_s12 + $0x78] sm:$0xff] }
 0x464   : > { %2118 = vmatpush1.bf16.msra.mxu0 %v3343_v33  ;;  %2159 = vmatpush1.bf16.msra.mxu1 %v3344_v36 }
 0x465   : > { %2119 = vmatprep.subr.bf16.mxu0 %v3345_v37  ;;  %2160 = vmatprep.subr.bf16.mxu1 %v3346_v38  ;;  %v3351_v38 = vld [vmem:[#allocation13] ss:$16 sps:$4 sm:$0xff]  }
 0x468   : > { %2120 = vmatpush1.bf16.msra.mxu0 %v3347_v39  ;;  %2161 = vmatpush1.bf16.msra.mxu1 %v3348_v62  ;;  %v3352_v39 = vld [vmem:[#allocation13 + $0x8] ss:$16 sps:$4 sm:$0xff]   ;;  %v3353_v62 = vld [vmem:[#allocation13 + $0x24] ss:$16 sps:$4 sm:$0xff]  }
 0x469   : > { %2188 = vmatprep.subr.bf16.mxu0 %v3349_v1  ;;  %2229 = vmatprep.subr.bf16.mxu1 %v3350_v17  ;;  %v3354_v1 = vld [vmem:[#allocation13 + $0x2c] ss:$16 sps:$4 sm:$0xff]  }
 0x4fe   : > { %v1920_v47 = vpop.f32.mrb[20].mxu0  ;;  %v1961_v49 = vpop.f32.mrb[20].mxu1 }
 0x4ff   : > { %v2888_v51 = vadd.f32 %v1920_v47, %v5009_v29  ;;  %v1922_v60 = vpop.f32.mrb[21].mxu0  ;;  %v1963_v40 = vpop.f32.mrb[21].mxu1  ;;  %v2890_v56 = vadd.f32 %v1961_v49, %v5011_v43  ;;  %v3355_v47 = vld [vmem:[#allocation13 + $0x20] ss:$16 sps:$4 sm:$0xff]   ;;  %v3357_v49 = vld [vmem:[#allocation13 + $0x44] ss:$16 sps:$4 sm:$0xff]  }
 0x500   : > { %v2889_v41 = vadd.f32 %v1922_v60, %v5010_v34  ;;  %v1924_v42 = vpop.f32.mrb[22].mxu0  ;;  %v1965_v44 = vpop.f32.mrb[22].mxu1  ;;  %v2891_v35 = vadd.f32 %v1963_v40, %v5012_v45 }
 0x501   : > { %v1972_v46 = vmul.f32 0.5, %v2888_v51  ;;  %v1925_v59 = vpop.f32.mrb[23].mxu0  ;;  %v1966_v48 = vpop.f32.mrb[23].mxu1  ;;  %v3358_v51 = vld [vmem:[#allocation13 + $0x4c] ss:$16 sps:$4 sm:$0xff]  }
 0x502   : > { %v1973_v53 = vmul.f32 0.5, %v2889_v41  ;;  %v1981_v58 = vmul.f32 0.5, %v2891_v35  ;;  %v3359_v44 = vld [vmem:[#allocation13 + $0x40] ss:$16 sps:$4 sm:$0xff]   ;;  %v3362_v48 = vld [vmem:[#allocation13 + $0x6c] ss:$16 sps:$4 sm:$0xff]  }
 0x503   : > { %3255 = vtanh.f32 %v1972_v46  ;;  %v3360_v46 = vld [vmem:[#allocation13 + $0x48] ss:$16 sps:$4 sm:$0xff]  }
 0x504   : > { %3257 = vtanh.f32 %v1973_v53 }
 0x505   : > { %3259 = vtanh.f32 %v2890_v56 }
 0x506   : > { %3261 = vtanh.f32 %v1981_v58 }
 0x50d   : > { %v3256_v55 = vpop.eup %3255 }
 0x50e   : > { %v3258_v2 = vpop.eup %3257  ;;  %v1976_v50 = vmul.f32 0.5, %v3256_v55  ;;  %v3363_v55 = vld [vmem:[#allocation13 + $0x60] ss:$16 sps:$4 sm:$0xff]  }
 0x50f   : > { %v1977_v6 = vmul.f32 0.5, %v3258_v2  ;;  %v3260_v8 = vpop.eup %3259  ;;  %v3364_v2 = vld [vmem:[#allocation13 + $0x68] ss:$16 sps:$4 sm:$0xff]  }
 0x510   : > { %v1978_v7 = vadd.f32 0.5, %v1976_v50  ;;  %v3262_v12 = vpop.eup %3261  ;;  %v3365_v50 = vld [vmem:[#allocation13 + $0x84] ss:$16 sps:$4 sm:$0xff]  }
 0x511   : > { %v1979_v9 = vadd.f32 0.5, %v1977_v6  ;;  %v1983_v32 = vmul.f32 0.5, %v3262_v12  ;;  %v3366_v6 = vld [vmem:[#allocation13 + $0x8c] ss:$16 sps:$4 sm:$0xff]   ;;  %v3371_v12 = vld [vmem:[#allocation13 + $0xa0] ss:$16 sps:$4 sm:$0xff]  }
 0x512   : > { %v1986_v10 = vmul.f32 %v3260_v8, %v1978_v7  ;;  %v3367_v8 = vld [vmem:[#allocation13 + $0x80] ss:$16 sps:$4 sm:$0xff]  }
 0x513   : > { %v1985_v11 = vmul.f32 %v1979_v9, %v4576_v14  ;;  %v1984_v19 = vadd.f32 0.5, %v1983_v32  ;;  %v3368_v9 = vld [vmem:[#allocation13 + $0x88] ss:$16 sps:$4 sm:$0xff]  }
 0x514   : > { %v3372_v32 = vld [vmem:[#allocation13 + $0xa8] ss:$16 sps:$4 sm:$0xff]  }
 0x515   : > { %v4647_v3 = vadd.f32 %v1986_v10, %v1985_v11  ;;  %v3369_v10 = vld [vmem:[#allocation13 + $0xa4] ss:$16 sps:$4 sm:$0xff]   ;;  %v3370_v11 = vld [vmem:[#allocation13 + $0xac] ss:$16 sps:$4 sm:$0xff]  }
 0x517   : > { %3263 = vtanh.f32 %v4647_v3 }
 0x51e   : > { %v2035_v61 = vpop.f32.mrb[24].mxu0  ;;  %v2076_v15 = vpop.f32.mrb[24].mxu1 }
 0x51f   : > { %v2083_v57 = vadd.f32 %v2793_v13, %v2035_v61  ;;  %v2037_v16 = vpop.f32.mrb[25].mxu0  ;;  %v2078_v18 = vpop.f32.mrb[25].mxu1  ;;  %v2085_v28 = vadd.f32 %v2795_v20, %v2076_v15  ;;  %v3374_v61 = vld [vmem:[#allocation13 + $0xcc] ss:$16 sps:$4 sm:$0xff]   ;;  %v3375_v15 = vld [vmem:[#allocation13 + $0xc0] ss:$16 sps:$4 sm:$0xff]  }
 0x520   : > { %v2084_v21 = vadd.f32 %v2794_v54, %v2037_v16  ;;  %v2039_v14 = vpop.f32.mrb[26].mxu0  ;;  %v2080_v22 = vpop.f32.mrb[26].mxu1  ;;  %v2086_v37 = vadd.f32 %v2796_v31, %v2078_v18  ;;  %v3373_v54 = vld [vmem:[#allocation13 + $0xc4] ss:$16 sps:$4 sm:$0xff]  }
 0x521   : > { %v3264_v23 = vpop.eup %3263  ;;  %v2087_v52 = vmul.f32 0.5, %v2083_v57  ;;  %v2040_v24 = vpop.f32.mrb[27].mxu0  ;;  %v3376_v57 = vld [vmem:[#allocation13 + $0xc8] ss:$16 sps:$4 sm:$0xff]   ;;  %v3377_v18 = vld [vmem:[#allocation13 + $0xe4] ss:$16 sps:$4 sm:$0xff]  }
 0x522   : > { %v2081_v25 = vpop.f32.mrb[27].mxu1  ;;  %v1989_v26 = vmul.f32 %v3264_v23, %v1984_v19  ;;  %v2088_v27 = vmul.f32 0.5, %v2084_v21  ;;  %v2096_v17 = vmul.f32 0.5, %v2086_v37  ;;  %v3378_v19 = vld [vmem:[#allocation13 + $0xec] ss:$16 sps:$4 sm:$0xff]  }
 0x523   : > { %3265 = vtanh.f32 %v2087_v52  ;;  %v3379_v14 = vld [vmem:[#allocation13 + $0xe0] ss:$16 sps:$4 sm:$0xff]   ;;  %v3380_v22 = vld [vmem:[#allocation13 + $0xe8] ss:$16 sps:$4 sm:$0xff]  }
 0x524   : > { %v1993_v30 = vmul.f32 %v1992_v5, %v1989_v26  ;;  %3267 = vtanh.f32 %v2088_v27  ;;  %v1995_v33 = vpack.c.bf16 %v1989_v26, %v1989_v26 }
 0x525   : > { %3269 = vtanh.f32 %v2085_v28 }
 0x526   : > { %v4656_v36 = vadd.f32 %v1993_v30, %v4585_v4  ;;  %2138 = vmatmul.mubr.bf16.vlgmr.msra.gmra.mrb[28].mxu0 %v1995_v33  ;;  %2179 = vmatmul.mubr.bf16.vlgmr.msra.gmra.mrb[28].mxu1 %v1995_v33  ;;  %v3356_v4 = vld [vmem:[#allocation13 + $0x28] ss:$16 sps:$4 sm:$0xff]   ;;  %3271 = vtanh.f32 %v2096_v17 }
 0x527   : > { %2189 = vmatpush1.bf16.msra.mxu0 %v3351_v38  ;;  %2230 = vmatpush1.bf16.msra.mxu1 %v3352_v39 }
 0x528   : > { %2190 = vmatprep.subr.bf16.mxu0 %v3353_v62  ;;  %2231 = vmatprep.subr.bf16.mxu1 %v3354_v1 }
 0x529   : > { %2220 = vmatprep.mubr.bf16.mxu0 %v4906_v0  ;;  %2261 = vmatprep.mubr.bf16.mxu1 %v4906_v0  ;;  %v3361_v0 = vld [vmem:[#allocation13 + $0x64] ss:$16 sps:$4 sm:$0xff]  }
 0x52b   : > { %2191 = vmatpush1.bf16.msra.mxu0 %v3355_v47  ;;  %2232 = vmatpush1.bf16.msra.mxu1 %v3356_v4 }
 0x52c   : > { %2192 = vmatprep.subr.bf16.mxu0 %v3357_v49  ;;  %2233 = vmatprep.subr.bf16.mxu1 %v3358_v51 }
 0x52d   : > { %v3266_v60 = vpop.eup %3265 }
 0x52e   : > { %v3268_v40 = vpop.eup %3267  ;;  %v2091_v41 = vmul.f32 0.5, %v3266_v60 }
 0x52f   : > { %v2092_v42 = vmul.f32 0.5, %v3268_v40  ;;  %2193 = vmatpush1.bf16.msra.mxu0 %v3359_v44  ;;  %2234 = vmatpush1.bf16.msra.mxu1 %v3360_v46  ;;  %v3270_v53 = vpop.eup %3269  ;;  %v2294_v46 = vstv %s2293_s23 }
 0x530   : > { %v2093_v59 = vadd.f32 0.5, %v2091_v41  ;;  %2194 = vmatprep.subr.bf16.mxu0 %v3361_v0  ;;  %2235 = vmatprep.subr.bf16.mxu1 %v3362_v48 }
 0x531   : > { %v2094_v56 = vadd.f32 0.5, %v2092_v42 }
 0x532   : > { %v2101_v35 = vmul.f32 %v3270_v53, %v2093_v59  ;;  %v3695_v53 = vmov (!%p2797_p11), 0.0  }
 0x533   : > { %v2100_v58 = vmul.f32 %v2094_v56, %v4606_v63  ;;  %2195 = vmatpush1.bf16.msra.mxu0 %v3363_v55  ;;  %2236 = vmatpush1.bf16.msra.mxu1 %v3364_v2  ;;  %v3272_v63 = vpop.eup %3271  ;;  %v3382_v56 = vld [vmem:[#allocation16 + $0x8] sm:$0xff] (!%p2797_p11)   ;;  %v3385_v2 = vld [vmem:[#allocation16 + $0x20] sm:$0xff] (!%p2797_p11)  }
 0x534   : > { %2196 = vmatprep.subr.bf16.mxu0 %v3365_v50  ;;  %2237 = vmatprep.subr.bf16.mxu1 %v3366_v6  ;;  %v2098_v13 = vmul.f32 0.5, %v3272_v63  ;;  %v3390_v55 = vld [vmem:[#allocation17 + $0x8] sm:$0xff] (!%p2797_p11)   ;;  %v3391_v50 = vld [vmem:[#allocation17 + $0x10] sm:$0xff] (!%p2797_p11)  }
 0x535   : > { %v2102_v7 = vadd.f32 %v2101_v35, %v2100_v58  ;;  %v3383_v35 = vld [vmem:[#allocation16 + $0x10] sm:$0xff] (!%p2797_p11)   ;;  %v3389_v58 = vld [vmem:[#allocation17] sm:$0xff] (!%p2797_p11)   ;;  %v3386_v6 = vld [vmem:[#allocation16 + $0x28] sm:$0xff] (!%p2797_p11)  }
 0x536   : > { %v2099_v16 = vadd.f32 0.5, %v2098_v13  ;;  %v3394_v63 = vld [vmem:[#allocation17 + $0x28] sm:$0xff] (!%p2797_p11)   ;;  %v3396_v13 = vld [vmem:[#allocation17 + $0x38] sm:$0xff] (!%p2797_p11)  }
 0x537   : > { %3273 = vtanh.f32 %v2102_v7  ;;  %2298 = vst [vmem:[#allocation3] sm:$0xff] %v2102_v7  ;;  %2197 = vmatpush1.bf16.msra.mxu0 %v3367_v8  ;;  %2238 = vmatpush1.bf16.msra.mxu1 %v3368_v9  ;;  %v3392_v7 = vld [vmem:[#allocation17 + $0x18] sm:$0xff] (!%p2797_p11)   ;;  %v3387_v8 = vld [vmem:[#allocation16 + $0x30] sm:$0xff] (!%p2797_p11)   ;;  %v3393_v9 = vld [vmem:[#allocation17 + $0x20] sm:$0xff] (!%p2797_p11)  }
 0x538   : > { %2198 = vmatprep.subr.bf16.mxu0 %v3369_v10  ;;  %2239 = vmatprep.subr.bf16.mxu1 %v3370_v11  ;;  %v3388_v10 = vld [vmem:[#allocation16 + $0x38] sm:$0xff] (!%p2797_p11)  }
 0x53b   : > { %2199 = vmatpush1.bf16.msra.mxu0 %v3371_v12  ;;  %2240 = vmatpush1.bf16.msra.mxu1 %v3372_v32  ;;  %v3395_v32 = vld [vmem:[#allocation17 + $0x30] sm:$0xff] (!%p2797_p11)  }
 0x53c   : > { %2200 = vmatprep.subr.bf16.mxu0 %v3373_v54  ;;  %2241 = vmatprep.subr.bf16.mxu1 %v3374_v61  ;;  %v2798_v54 = vld [vmem:[%s5040_s26] ss:$0 sm:$0xff] (!%p2797_p11) }
 0x53f   : > { %2201 = vmatpush1.bf16.msra.mxu0 %v3375_v15  ;;  %2242 = vmatpush1.bf16.msra.mxu1 %v3376_v57 }
 0x540   : > { %2202 = vmatprep.subr.bf16.mxu0 %v3377_v18  ;;  %2243 = vmatprep.subr.bf16.mxu1 %v3378_v19 }
 0x541   : > { %v3274_v20 = vpop.eup %3273 }
 0x542   : > { %v2104_v21 = vmul.f32 %v3274_v20, %v2099_v16 }
 0x543   : > { %2203 = vmatpush1.bf16.msra.mxu0 %v3379_v14  ;;  %2244 = vmatpush1.bf16.msra.mxu1 %v3380_v22 }
 0x544   : > { %2297 = vst [vmem:[#allocation2] sm:$0xff] %v2104_v21  ;;  %v2187_v23 = vpack.c.bf16 %v2104_v21, %v2104_v21  ;;  %2840 = vmatprep.subr.bf16.mxu0 (!%p2797_p11), %v3695_v53  ;;  %2860 = vmatprep.subr.bf16.mxu1 (!%p2797_p11), %v3695_v53  ;;  %v2807_v21 = vld [vmem:[%s5041_s30] ss:$0 sm:$0xff] (!%p2797_p11) }
 0x546   : > { %2221 = vmatmul.mubr.bf16.vlgmr.msra.gmra.mrb[28].mxu0 %v2187_v23  ;;  %2262 = vmatmul.mubr.bf16.vlgmr.msra.gmra.mrb[28].mxu1 %v2187_v23 }
 0x547   : > { %2856 = vmatprep.mubr.msk.bf16.mxu0 (!%p2797_p11), %vm3696_vm0, %v3695_v53  ;;  %2876 = vmatprep.mubr.msk.bf16.mxu1 (!%p2797_p11), %vm3696_vm0, %v3695_v53 }
 0x548   : > { %2861 = vmatpush3.bf16.msra.mxu1 (!%p2797_p11), %v3389_v58 }
 0x549   : > { %2862 = vmatprep.subr.bf16.mxu1 (!%p2797_p11), %v3695_v53 }
 0x54c   : > { %2863 = vmatpush3.bf16.msra.mxu1 (!%p2797_p11), %v3390_v55 }
 0x54d   : > { %2864 = vmatprep.subr.bf16.mxu1 (!%p2797_p11), %v3695_v53 }
 0x550   : > { %2865 = vmatpush3.bf16.msra.mxu1 (!%p2797_p11), %v3391_v50 }
 0x551   : > { %2866 = vmatprep.subr.bf16.mxu1 (!%p2797_p11), %v3695_v53 }
 0x554   : > { %2867 = vmatpush3.bf16.msra.mxu1 (!%p2797_p11), %v3392_v7 }
 0x555   : > { %2868 = vmatprep.subr.bf16.mxu1 (!%p2797_p11), %v3695_v53 }
 0x558   : > { %2869 = vmatpush3.bf16.msra.mxu1 (!%p2797_p11), %v3393_v9 }
 0x559   : > { %2870 = vmatprep.subr.bf16.mxu1 (!%p2797_p11), %v3695_v53 }
 0x55c   : > { %2871 = vmatpush3.bf16.msra.mxu1 (!%p2797_p11), %v3394_v63 }
 0x55d   : > { %2872 = vmatprep.subr.bf16.mxu1 (!%p2797_p11), %v3695_v53 }
 0x560   : > { %2873 = vmatpush3.bf16.msra.mxu1 (!%p2797_p11), %v3395_v32 }
 0x561   : > { %2874 = vmatprep.subr.bf16.mxu1 (!%p2797_p11), %v3695_v53 }
 0x564   : > { %2875 = vmatpush3.bf16.msra.mxu1 (!%p2797_p11), %v3396_v13 }
 0x619   : > { %v2222_v5 = vpop.f32.mrb[28].mxu0  ;;  %v2263_v52 = vpop.f32.mrb[28].mxu1 }
 0x61a   : > { %v2892_v24 = vadd.f32 %v2222_v5, %v5009_v29  ;;  %v2224_v25 = vpop.f32.mrb[29].mxu0  ;;  %v2265_v26 = vpop.f32.mrb[29].mxu1  ;;  %v2894_v39 = vadd.f32 %v2263_v52, %v5011_v43 }
 0x61b   : > { %v2893_v27 = vadd.f32 %v2224_v25, %v5010_v34  ;;  %v2226_v28 = vpop.f32.mrb[30].mxu0  ;;  %v2267_v30 = vpop.f32.mrb[30].mxu1  ;;  %v2895_v62 = vadd.f32 %v2265_v26, %v5012_v45 }
 0x61c   : > { %v2274_v31 = vmul.f32 0.5, %v2892_v24  ;;  %v2227_v33 = vpop.f32.mrb[31].mxu0  ;;  %v2268_v37 = vpop.f32.mrb[31].mxu1 }
 0x61d   : > { %v2275_v38 = vmul.f32 0.5, %v2893_v27  ;;  %v2283_v1 = vmul.f32 0.5, %v2895_v62 }
 0x61e   : > { %3275 = vtanh.f32 %v2274_v31 }
 0x61f   : > { %3277 = vtanh.f32 %v2275_v38 }
 0x620   : > { %3279 = vtanh.f32 %v2894_v39 }
 0x621   : > { %3281 = vtanh.f32 %v2283_v1 }
 0x628   : > { %v3276_v29 = vpop.eup %3275 }
 0x629   : > { %v3278_v17 = vpop.eup %3277  ;;  %v2278_v47 = vmul.f32 0.5, %v3276_v29 }
 0x62a   : > { %v2279_v4 = vmul.f32 0.5, %v3278_v17  ;;  %v3280_v49 = vpop.eup %3279 }
 0x62b   : > { %v2280_v34 = vadd.f32 0.5, %v2278_v47  ;;  %v3282_v43 = vpop.eup %3281 }
 0x62c   : > { %v2281_v51 = vadd.f32 0.5, %v2279_v4  ;;  %v2285_v42 = vmul.f32 0.5, %v3282_v43 }
 0x62d   : > { %v2288_v60 = vmul.f32 %v3280_v49, %v2280_v34 }
 0x62e   : > { %v2287_v40 = vmul.f32 %v2281_v51, %v4647_v3  ;;  %v2286_v45 = vadd.f32 0.5, %v2285_v42  ;;  %v3381_v3 = vld [vmem:[#allocation16] sm:$0xff] (!%p2797_p11)  }
 0x62f   : > { %2841 = vmatpush3.bf16.msra.mxu0 (!%p2797_p11), %v3381_v3 }
 0x630   : > { %v2289_v41 = vadd.f32 %v2288_v60, %v2287_v40  ;;  %2842 = vmatprep.subr.bf16.mxu0 (!%p2797_p11), %v3695_v53 }
 0x632   : > { %3283 = vtanh.f32 %v2289_v41  ;;  %2300 = vst [vmem:[#allocation5] sm:$0xff] %v2289_v41 }
 0x633   : > { %2843 = vmatpush3.bf16.msra.mxu0 (!%p2797_p11), %v3382_v56 }
 0x634   : > { %2844 = vmatprep.subr.bf16.mxu0 (!%p2797_p11), %v3695_v53 }
 0x637   : > { %2845 = vmatpush3.bf16.msra.mxu0 (!%p2797_p11), %v3383_v35 }
 0x638   : > { %2846 = vmatprep.subr.bf16.mxu0 (!%p2797_p11), %v3695_v53 }
 0x63c   : > { %v3284_v44 = vpop.eup %3283 }
 0x63d   : > { %v2291_v59 = vmul.f32 %v3284_v44, %v2286_v45  ;;  %2305 = sbr.rel (%p2797_p11) target bundleno = 2054 (0x806), region = 96 }
 0x63f   : > { %v2295_v0 = vmul.f32 %v2294_v46, %v2291_v59  ;;  %2299 = vst [vmem:[#allocation4] sm:$0xff] %v2291_v59 }
 0x641   : > { %v2296_v48 = vadd.f32 %v2295_v0, %v4656_v36  ;;  %v3384_v36 = vld [vmem:[#allocation16 + $0x18] sm:$0xff] (!%p2797_p11)  }
 0x642   : > { %2847 = vmatpush3.bf16.msra.mxu0 (!%p2797_p11), %v3384_v36 }
 0x643   : > { %2301 = vst [vmem:[#allocation6] sm:$0xff] %v2296_v48  ;;  %2848 = vmatprep.subr.bf16.mxu0 (!%p2797_p11), %v3695_v53 }
 0x646   : > { %2849 = vmatpush3.bf16.msra.mxu0 %v3385_v2 }
 0x647   : > { %2850 = vmatprep.subr.bf16.mxu0 %v3695_v53 }
 0x64a   : > { %2851 = vmatpush3.bf16.msra.mxu0 %v3386_v6  ;;  %v2306_v11 = vld [vmem:[#allocation6] sm:$0xff] }
 0x64b   : > { %2852 = vmatprep.subr.bf16.mxu0 %v3695_v53  ;;  %v2307_v12 = vpack.c.bf16 %v2306_v11, %v2306_v11 }
 0x64e   : > { %2853 = vmatpush3.bf16.msra.mxu0 %v3387_v8 }
 0x64f   : > { %2854 = vmatprep.subr.bf16.mxu0 %v3695_v53 }
 0x652   : > { %2855 = vmatpush3.bf16.msra.mxu0 %v3388_v10 }
 0x655   : > { %2857 = vmatmul.mubr.bf16.vlgmr.msra.gmra.mrb[0].mxu0 %v2307_v12 }
 0x728   : > { %v2413_v61 = vpop.f32.mrb[0].mxu0 }
 0x729   : > { %v2414_v15 = vadd.f32 %v2798_v54, %v2413_v61  ;;  %v2858_v57 = vpop.f32.mrb[1].mxu0 }
 0x72a   : > { %v2416_v16 = vpop.f32.mrb[2].mxu0 }
 0x72b   : > { %v2419_v18 = vmax.f32 %v2414_v15, 0.0  ;;  %v2859_v19 = vpop.f32.mrb[3].mxu0 }
 0x72d   : > { %v2420_v20 = vpack.c.bf16 %v2419_v18, %v2419_v18 }
 0x72f   : > { %2877 = vmatmul.mubr.bf16.vlgmr.msra.gmra.mrb[0].mxu1 %v2420_v20 }
 0x802   : > { %v2526_v14 = vpop.f32.mrb[0].mxu1 }
 0x803   : > { %v2527_v22 = vadd.f32 %v2807_v21, %v2526_v14  ;;  %v2878_v23 = vpop.f32.mrb[1].mxu1 }
 0x804   : > { %v2529_v5 = vpop.f32.mrb[2].mxu1 }
 0x805   : > { %2532 = vst [vmem:[#allocation20] sm:$0xff] %v2527_v22  ;;  %v2879_v52 = vpop.f32.mrb[3].mxu1 }
 0x806 PF: > { %s5042_s24 = sadd.s32 4294967295, %s3678_s18   ;;  %s3697_s20 = smov [#allocation20]  }
 0x807   : > { %p4677_p8 = scmp.eq.s32.totalorder %s5042_s24, 1  ;;  %s2542_s21 = sshll.u32 %s3697_s20, 4  ;;  %s2543_s21 = int_to_ptr.vmem [resolvable:$true] %s2542_s21 }
 0x808   : > { %s3582_s11 = scalar_lea.vmem %s2543_s21, 128  ;;  %p3589_p3 = scmp.lt.s32.totalorder %s2543_s21, %s2543_s21 }
 0x809   : > { %p3583_p9 = scmp.ne.s32.totalorder %s2543_s21, %s3582_s11  ;;  %p3590_p12 = scmp.lt.s32.totalorder %s3582_s11, %s3582_s11 }
 0x80b   : > { %p3584_p10 = pnand %p3583_p9, %p4677_p8  ;;  %p3591_p0 = por %p3590_p12, %p3589_p3 }
 0x80d   : > { %p3585_p5 = pneg %p3584_p10 }
 0x80f   : > { %p3592_p7 = pnand %p3591_p0, %p3585_p5 }
 0x811   : > { %3595 = shalt.err (!%p3592_p7)
}
 0x812   : > { %s5044_s1 = sld [smem:[#allocation83_spill]] }
 0x818   : > { %s3596_s6 = scalar_lea.hbm %s5044_s1, 128 }
 0x819   : > { %p3597_p4 = scmp.ne.s32.totalorder %s5044_s1, %s3596_s6  ;;  %p3602_p2 = scmp.lt.u32.totalorder %s3596_s6, %s5044_s1 }
 0x81b   : > { %p3598_p6 = pnand %p3597_p4, %p4677_p8 }
 0x81d   : > { %p3599_p13 = pneg %p3598_p6 }
 0x81f   : > { %p3604_p1 = pnand %p3602_p2, %p3599_p13 }
 0x821   : > { %3607 = shalt.err (!%p3604_p1)
}
 0x822   : > { %2955 = dma.vmem_to_hbm [thread:$0]  (%p4677_p8), %s2543_s21, 128, %s5044_s1, [#allocation9]  }
 0x823   : > { %3653 = dma.done.wait (%p4677_p8), [#allocation9], 128  }
 0x824   : > { %3655 = vsyncadd (%p4677_p8), [#allocation9], 4294967168 }
 0x825 PF: > { %s28_s18 = sadd.s32 1, %s3678_s18   ;;  %s5045_s13 = smov %s3662_s14 }
 0x826   : > { %p25_p11 = scmp.ge.s32.totalorder %s28_s18, 4   ;;  %s5046_s14 = smov %s3666_s15 }
 0x827   : > { %s5047_s15 = smov %s3964_s29  ;;  %s5048_s16 = smov %s3674_s17 }
 0x828   : > { %s5049_s17 = smov %s5051_s19  ;;  %27 = sbr.rel (!%p25_p11) target bundleno = 15 (0xf), region = 134 }
 0x82f   :  { %2555 = vsyncpa [#allocation8], 1 }
 0x830   :  { %2557 = vsyncpa [#allocation8 + $0x1], 1 }
 0x831   :  { %2558 = vsyncpa [#allocation12], 1 }
 0x832   :  { %2559 = vsyncpa [#allocation15], 1 }
 0x833   :  { %2560 = vsyncpa [#allocation18], 1 }
 0x834   :  { %2561 = vsyncpa [#allocation9], 1 }
 0x835   :  { %2563 = vsyncpa [#allocation9 + $0x1], 1 }
 0x836   :  { %2564 = vsyncpa [#allocation10], 1 }
 0x837   :  { %2566 = vsyncpa [#allocation10 + $0x1], 1 }

</bundles_post_ra>
